<compile_context>
chip_gen: v7x
topology: tpu7x:2x2x1
jax: 0.10.0
libtpu: 0.0.40
codegen_flags: <defaults>
</compile_context>

<pallas_src>
import math

import jax
import jax.numpy as jnp
from jax.experimental import pallas as pl
from jax.experimental.pallas import tpu as pltpu

# Module hyper-parameters (PyTorch defaults: in_dims=512, token_dim=256, heads=2)
IN_DIMS = 512
TOKEN_DIM = 256
NUM_HEADS = 2
D_HID = TOKEN_DIM * NUM_HEADS          # 512
SCALE = TOKEN_DIM ** (-0.5)
EPS = 1e-12                            # torch.nn.functional.normalize default
EPS2 = EPS * EPS


def _l2_normalize(x, axis):
    # x / max(||x||_2, eps)  ==  x * rsqrt(max(sum(x^2), eps^2))
    ssq = jnp.sum(x * x, axis=axis, keepdims=True)
    return x * jax.lax.rsqrt(jnp.maximum(ssq, EPS2))


# ----------------------------------------------------------------------------
# Pallas kernel: entire EfficientAdditiveAttnetion forward in one body.
# ----------------------------------------------------------------------------
def eaa_kernel(x_ref, m_ref, wqk_ref, bqk_ref, wg_ref, wp_ref, bp_ref,
               wf_ref, bf_ref, o_ref):
    x = x_ref[...]                                              # (B*N, IN_DIMS)

    # Fused Q/K in-projection: one lane-dense matmul, then lane-slice at a
    # 128-multiple boundary.
    qk = jnp.dot(x, wqk_ref[...],
                 preferred_element_type=jnp.float32) + bqk_ref[...]
    q = _l2_normalize(qk[:, :D_HID], axis=-1)                   # (B*N, D)
    k = _l2_normalize(qk[:, D_HID:], axis=-1)                   # (B*N, D)

    # Additive attention logits: (q . w_g) * scale  (VPU mul + XLU row reduce
    # instead of a 1-lane-wide matmul).
    aw = jnp.sum(q * wg_ref[...], axis=-1, keepdims=True) * SCALE   # (B*N, 1)

    # Per-batch normalization of A over the token axis and the global query
    # descriptor G (broadcast back over tokens) are done with a block-diagonal
    # batch mask M (M[i,j]=1 iff tokens i,j belong to the same batch):
    #   ssq[i] = sum_{j in batch(i)} aw[j]^2
    #   gb[i]  = rsqrt(max(ssq[i], eps^2)) * sum_{j in batch(i)} aw[j] * q[j]
    # This is exactly  G_b = sum_n normalize(A)_bn * q_bn  repeated over tokens,
    # with no 3-D reshape / sublane reduce / broadcast_to in the kernel.
    m = m_ref[...]                                              # (B*N, B*N)
    ssq = jnp.dot(m, aw * aw, preferred_element_type=jnp.float32)   # (B*N, 1)
    gb = (jnp.dot(m, aw * q, preferred_element_type=jnp.float32)
          * jax.lax.rsqrt(jnp.maximum(ssq, EPS2)))                  # (B*N, D)

    # out = Proj(G * key) + query ; out = final(out)
    t = (jnp.dot(gb * k, wp_ref[...], preferred_element_type=jnp.float32)
         + bp_ref[...] + q)
    o_ref[...] = (jnp.dot(t, wf_ref[...], preferred_element_type=jnp.float32)
                  + bf_ref[...])


# ----------------------------------------------------------------------------
# Wrapper: layout plumbing (flatten tokens, fuse + transpose weights, build
# batch mask), one pallas_call with full-array blocks.
# ----------------------------------------------------------------------------
def _full_spec(shape):
    nd = len(shape)
    return pl.BlockSpec(shape, lambda i, _nd=nd: (0,) * _nd)


def efficient_additive_attention(x, params):
    """x: (B, N, IN_DIMS) float32 -> (B, N, TOKEN_DIM) float32."""
    B, N, Din = x.shape
    x2 = x.reshape(B * N, Din)

    # Block-diagonal "same batch" mask for token-axis reduce + broadcast.
    batch_mask = jnp.kron(jnp.eye(B, dtype=jnp.float32),
                          jnp.ones((N, N), dtype=jnp.float32))   # (B*N, B*N)

    # Fuse Q/K projection weights and pre-transpose everything so the kernel
    # only does (rows, in) @ (in, out) matmuls.
    wqk_t = jnp.concatenate([params["wq"], params["wk"]], axis=0).T  # (Din, 2D)
    bqk = jnp.concatenate([params["bq"], params["bk"]], axis=1)      # (1, 2D)
    wg_row = params["w_g"].T                                         # (1, D)
    wp_t = params["wp"].T                                            # (D, D)
    wf_t = params["wf"].T                                            # (D, TOKEN_DIM)

    operands = [x2, batch_mask, wqk_t, bqk, wg_row, wp_t, params["bp"],
                wf_t, params["bf"]]

    out2 = pl.pallas_call(
        eaa_kernel,
        out_shape=jax.ShapeDtypeStruct((B * N, TOKEN_DIM), jnp.float32),
        grid=(1,),
        in_specs=[_full_spec(op.shape) for op in operands],
        out_specs=_full_spec((B * N, TOKEN_DIM)),
        compiler_params=pltpu.CompilerParams(
            dimension_semantics=("arbitrary",)),
    )(*operands)
    return out2.reshape(B, N, TOKEN_DIM)


# ----------------------------------------------------------------------------
# Plain-JAX reference mirroring the PyTorch module (for verification).
# ----------------------------------------------------------------------------
def reference_eaa(x, p):
    B, N, _ = x.shape
    q = jnp.einsum("bnd,ed->bne", x, p["wq"]) + p["bq"]
    k = jnp.einsum("bnd,ed->bne", x, p["wk"]) + p["bk"]
    q = q / jnp.maximum(jnp.linalg.norm(q, axis=-1, keepdims=True), EPS)
    k = k / jnp.maximum(jnp.linalg.norm(k, axis=-1, keepdims=True), EPS)
    qw = q @ p["w_g"]                                   # (B, N, 1)
    A = qw * SCALE
    A = A / jnp.maximum(jnp.linalg.norm(A, axis=1, keepdims=True), EPS)
    G = jnp.sum(A * q, axis=1)                          # (B, D)
    G = jnp.repeat(G[:, None, :], N, axis=1)            # (B, N, D)
    out = jnp.einsum("bnd,ed->bne", G * k, p["wp"]) + p["bp"] + q
    out = jnp.einsum("bnd,ed->bne", out, p["wf"]) + p["bf"]
    return out


def init_params(key):
    ks = jax.random.split(key, 9)
    s_in = 1.0 / math.sqrt(IN_DIMS)
    s_hid = 1.0 / math.sqrt(D_HID)

    def w(k, shape, scale):
        return (scale * jax.random.normal(k, shape)).astype(jnp.float32)

    return {
        "wq": w(ks[0], (D_HID, IN_DIMS), s_in),
        "bq": w(ks[1], (1, D_HID), 0.02),
        "wk": w(ks[2], (D_HID, IN_DIMS), s_in),
        "bk": w(ks[3], (1, D_HID), 0.02),
        "w_g": w(ks[4], (D_HID, 1), 1.0),            # torch.randn parameter
        "wp": w(ks[5], (D_HID, D_HID), s_hid),
        "bp": w(ks[6], (1, D_HID), 0.02),
        "wf": w(ks[7], (TOKEN_DIM, D_HID), s_hid),
        "bf": w(ks[8], (1, TOKEN_DIM), 0.02),
    }


if __name__ == "__main__":
    B, N = 2, 8
    key = jax.random.PRNGKey(0)
    kx, kp = jax.random.split(key)

    x = jax.random.normal(kx, (B, N, IN_DIMS), jnp.float32)
    params = init_params(kp)

    out = efficient_additive_attention(x, params)
    out = jax.block_until_ready(out)

    ref = reference_eaa(x, params)
    assert out.shape == (B, N, TOKEN_DIM)
    max_err = float(jnp.max(jnp.abs(out - ref)))
    assert max_err < 1e-2, f"mismatch vs reference: max abs err {max_err}"

    print("KERNEL_OK")
</pallas_src>

<mosaic_0001>
module attributes {stable_mosaic.version = 11 : i64} {
  func.func @eaa_kernel(%arg0: i32, %arg1: memref<16x512xf32, #tpu.memory_space<vmem>>, %arg2: memref<16x16xf32, #tpu.memory_space<vmem>>, %arg3: memref<512x1024xf32, #tpu.memory_space<vmem>>, %arg4: memref<1x1024xf32, #tpu.memory_space<vmem>>, %arg5: memref<1x512xf32, #tpu.memory_space<vmem>>, %arg6: memref<512x512xf32, #tpu.memory_space<vmem>>, %arg7: memref<1x512xf32, #tpu.memory_space<vmem>>, %arg8: memref<512x256xf32, #tpu.memory_space<vmem>>, %arg9: memref<1x256xf32, #tpu.memory_space<vmem>>, %arg10: memref<16x256xf32, #tpu.memory_space<vmem>>) attributes {dimension_semantics = [#tpu.dimension_semantics<arbitrary>], iteration_bounds = array<i64: 1>, scalar_prefetch = 0 : i64, scratch_operands = 0 : i64, tpu.core_type = #tpu.core_type<tc>, window_params = [{pipeline_mode = #tpu.pipeline_mode<synchronous>, transform_indices = @transform_0, window_bounds = array<i64: 16, 512>}, {pipeline_mode = #tpu.pipeline_mode<synchronous>, transform_indices = @transform_1, window_bounds = array<i64: 16, 16>}, {pipeline_mode = #tpu.pipeline_mode<synchronous>, transform_indices = @transform_2, window_bounds = array<i64: 512, 1024>}, {pipeline_mode = #tpu.pipeline_mode<synchronous>, transform_indices = @transform_3, window_bounds = array<i64: 1, 1024>}, {pipeline_mode = #tpu.pipeline_mode<synchronous>, transform_indices = @transform_4, window_bounds = array<i64: 1, 512>}, {pipeline_mode = #tpu.pipeline_mode<synchronous>, transform_indices = @transform_5, window_bounds = array<i64: 512, 512>}, {pipeline_mode = #tpu.pipeline_mode<synchronous>, transform_indices = @transform_6, window_bounds = array<i64: 1, 512>}, {pipeline_mode = #tpu.pipeline_mode<synchronous>, transform_indices = @transform_7, window_bounds = array<i64: 512, 256>}, {pipeline_mode = #tpu.pipeline_mode<synchronous>, transform_indices = @transform_8, window_bounds = array<i64: 1, 256>}, {pipeline_mode = #tpu.pipeline_mode<synchronous>, transform_indices = @transform_9, window_bounds = array<i64: 16, 256>}]} {
    %c0 = arith.constant 0 : index
    %c0_0 = arith.constant 0 : index
    %0 = vector.load %arg1[%c0, %c0_0] : memref<16x512xf32, #tpu.memory_space<vmem>>, vector<16x512xf32>
    %c0_1 = arith.constant 0 : index
    %c0_2 = arith.constant 0 : index
    %1 = vector.load %arg3[%c0_1, %c0_2] : memref<512x1024xf32, #tpu.memory_space<vmem>>, vector<512x1024xf32>
    %cst = arith.constant dense<0.000000e+00> : vector<16x1024xf32>
    %2 = tpu.matmul %0, %1, %cst {dimension_numbers = #tpu.dot_dimension_numbers<[1], [0], [0], [1], [0, 0, 1, 1], [], []>} : vector<16x512xf32>, vector<512x1024xf32>, vector<16x1024xf32> -> vector<16x1024xf32>
    %c0_3 = arith.constant 0 : index
    %c0_4 = arith.constant 0 : index
    %3 = vector.load %arg4[%c0_3, %c0_4] : memref<1x1024xf32, #tpu.memory_space<vmem>>, vector<1x1024xf32>
    %4 = vector.broadcast %3 : vector<1x1024xf32> to vector<16x1024xf32>
    %5 = arith.addf %2, %4 : vector<16x1024xf32>
    %6 = vector.extract_strided_slice %5 {offsets = [0, 0], sizes = [16, 512], strides = [1, 1]} : vector<16x1024xf32> to vector<16x512xf32>
    %7 = arith.mulf %6, %6 : vector<16x512xf32>
    %cst_5 = arith.constant dense<0.000000e+00> : vector<16xf32>
    %8 = vector.multi_reduction <add>, %7, %cst_5 [1] : vector<16x512xf32> to vector<16xf32>
    %9 = vector.shape_cast %8 : vector<16xf32> to vector<16x1xf32>
    %cst_6 = arith.constant 1.000000e-24 : f32
    %10 = vector.broadcast %cst_6 : f32 to vector<16x1xf32>
    %11 = arith.maximumf %9, %10 : vector<16x1xf32>
    %12 = math.rsqrt %11 : vector<16x1xf32>
    %13 = vector.broadcast %12 : vector<16x1xf32> to vector<16x512xf32>
    %14 = arith.mulf %6, %13 : vector<16x512xf32>
    %15 = vector.extract_strided_slice %5 {offsets = [0, 512], sizes = [16, 512], strides = [1, 1]} : vector<16x1024xf32> to vector<16x512xf32>
    %16 = arith.mulf %15, %15 : vector<16x512xf32>
    %cst_7 = arith.constant dense<0.000000e+00> : vector<16xf32>
    %17 = vector.multi_reduction <add>, %16, %cst_7 [1] : vector<16x512xf32> to vector<16xf32>
    %18 = vector.shape_cast %17 : vector<16xf32> to vector<16x1xf32>
    %cst_8 = arith.constant 1.000000e-24 : f32
    %19 = vector.broadcast %cst_8 : f32 to vector<16x1xf32>
    %20 = arith.maximumf %18, %19 : vector<16x1xf32>
    %21 = math.rsqrt %20 : vector<16x1xf32>
    %22 = vector.broadcast %21 : vector<16x1xf32> to vector<16x512xf32>
    %23 = arith.mulf %15, %22 : vector<16x512xf32>
    %c0_9 = arith.constant 0 : index
    %c0_10 = arith.constant 0 : index
    %24 = vector.load %arg5[%c0_9, %c0_10] : memref<1x512xf32, #tpu.memory_space<vmem>>, vector<1x512xf32>
    %25 = vector.broadcast %24 : vector<1x512xf32> to vector<16x512xf32>
    %26 = arith.mulf %14, %25 : vector<16x512xf32>
    %cst_11 = arith.constant dense<0.000000e+00> : vector<16xf32>
    %27 = vector.multi_reduction <add>, %26, %cst_11 [1] : vector<16x512xf32> to vector<16xf32>
    %28 = vector.shape_cast %27 : vector<16xf32> to vector<16x1xf32>
    %cst_12 = arith.constant 6.250000e-02 : f32
    %29 = vector.broadcast %cst_12 : f32 to vector<16x1xf32>
    %30 = arith.mulf %28, %29 : vector<16x1xf32>
    %c0_13 = arith.constant 0 : index
    %c0_14 = arith.constant 0 : index
    %31 = vector.load %arg2[%c0_13, %c0_14] : memref<16x16xf32, #tpu.memory_space<vmem>>, vector<16x16xf32>
    %32 = arith.mulf %30, %30 : vector<16x1xf32>
    %cst_15 = arith.constant dense<0.000000e+00> : vector<16x1xf32>
    %33 = tpu.matmul %31, %32, %cst_15 {dimension_numbers = #tpu.dot_dimension_numbers<[1], [0], [0], [1], [0, 0, 1, 1], [], []>} : vector<16x16xf32>, vector<16x1xf32>, vector<16x1xf32> -> vector<16x1xf32>
    %34 = vector.broadcast %30 : vector<16x1xf32> to vector<16x512xf32>
    %35 = arith.mulf %34, %14 : vector<16x512xf32>
    %cst_16 = arith.constant dense<0.000000e+00> : vector<16x512xf32>
    %36 = tpu.matmul %31, %35, %cst_16 {dimension_numbers = #tpu.dot_dimension_numbers<[1], [0], [0], [1], [0, 0, 1, 1], [], []>} : vector<16x16xf32>, vector<16x512xf32>, vector<16x512xf32> -> vector<16x512xf32>
    %cst_17 = arith.constant 1.000000e-24 : f32
    %37 = vector.broadcast %cst_17 : f32 to vector<16x1xf32>
    %38 = arith.maximumf %33, %37 : vector<16x1xf32>
    %39 = math.rsqrt %38 : vector<16x1xf32>
    %40 = vector.broadcast %39 : vector<16x1xf32> to vector<16x512xf32>
    %41 = arith.mulf %36, %40 : vector<16x512xf32>
    %42 = arith.mulf %41, %23 : vector<16x512xf32>
    %c0_18 = arith.constant 0 : index
    %c0_19 = arith.constant 0 : index
    %43 = vector.load %arg6[%c0_18, %c0_19] : memref<512x512xf32, #tpu.memory_space<vmem>>, vector<512x512xf32>
    %cst_20 = arith.constant dense<0.000000e+00> : vector<16x512xf32>
    %44 = tpu.matmul %42, %43, %cst_20 {dimension_numbers = #tpu.dot_dimension_numbers<[1], [0], [0], [1], [0, 0, 1, 1], [], []>} : vector<16x512xf32>, vector<512x512xf32>, vector<16x512xf32> -> vector<16x512xf32>
    %c0_21 = arith.constant 0 : index
    %c0_22 = arith.constant 0 : index
    %45 = vector.load %arg7[%c0_21, %c0_22] : memref<1x512xf32, #tpu.memory_space<vmem>>, vector<1x512xf32>
    %46 = vector.broadcast %45 : vector<1x512xf32> to vector<16x512xf32>
    %47 = arith.addf %44, %46 : vector<16x512xf32>
    %48 = arith.addf %47, %14 : vector<16x512xf32>
    %c0_23 = arith.constant 0 : index
    %c0_24 = arith.constant 0 : index
    %49 = vector.load %arg8[%c0_23, %c0_24] : memref<512x256xf32, #tpu.memory_space<vmem>>, vector<512x256xf32>
    %cst_25 = arith.constant dense<0.000000e+00> : vector<16x256xf32>
    %50 = tpu.matmul %48, %49, %cst_25 {dimension_numbers = #tpu.dot_dimension_numbers<[1], [0], [0], [1], [0, 0, 1, 1], [], []>} : vector<16x512xf32>, vector<512x256xf32>, vector<16x256xf32> -> vector<16x256xf32>
    %c0_26 = arith.constant 0 : index
    %c0_27 = arith.constant 0 : index
    %51 = vector.load %arg9[%c0_26, %c0_27] : memref<1x256xf32, #tpu.memory_space<vmem>>, vector<1x256xf32>
    %52 = vector.broadcast %51 : vector<1x256xf32> to vector<16x256xf32>
    %53 = arith.addf %50, %52 : vector<16x256xf32>
    %c0_28 = arith.constant 0 : index
    %c0_29 = arith.constant 0 : index
    %54 = vector.load %arg10[%c0_28, %c0_29] : memref<16x256xf32, #tpu.memory_space<vmem>>, vector<16x256xf32>
    tpu.vector_store %arg10[%c0_28, %c0_29], %53 {strides = array<i32>} : memref<16x256xf32, #tpu.memory_space<vmem>>, vector<16x256xf32>,
    return
  }
  func.func @transform_0(%arg0: i32) -> (i32, i32) {
    %c0_i32 = arith.constant 0 : i32
    %c0_i32_0 = arith.constant 0 : i32
    %c0_i32_1 = arith.constant 0 : i32
    return %c0_i32, %c0_i32_0 : i32, i32
  }
  func.func @transform_1(%arg0: i32) -> (i32, i32) {
    %c0_i32 = arith.constant 0 : i32
    %c0_i32_0 = arith.constant 0 : i32
    %c0_i32_1 = arith.constant 0 : i32
    return %c0_i32, %c0_i32_0 : i32, i32
  }
  func.func @transform_2(%arg0: i32) -> (i32, i32) {
    %c0_i32 = arith.constant 0 : i32
    %c0_i32_0 = arith.constant 0 : i32
    %c0_i32_1 = arith.constant 0 : i32
    return %c0_i32, %c0_i32_0 : i32, i32
  }
  func.func @transform_3(%arg0: i32) -> (i32, i32) {
    %c0_i32 = arith.constant 0 : i32
    %c0_i32_0 = arith.constant 0 : i32
    %c0_i32_1 = arith.constant 0 : i32
    return %c0_i32, %c0_i32_0 : i32, i32
  }
  func.func @transform_4(%arg0: i32) -> (i32, i32) {
    %c0_i32 = arith.constant 0 : i32
    %c0_i32_0 = arith.constant 0 : i32
    %c0_i32_1 = arith.constant 0 : i32
    return %c0_i32, %c0_i32_0 : i32, i32
  }
  func.func @transform_5(%arg0: i32) -> (i32, i32) {
    %c0_i32 = arith.constant 0 : i32
    %c0_i32_0 = arith.constant 0 : i32
    %c0_i32_1 = arith.constant 0 : i32
    return %c0_i32, %c0_i32_0 : i32, i32
  }
  func.func @transform_6(%arg0: i32) -> (i32, i32) {
    %c0_i32 = arith.constant 0 : i32
    %c0_i32_0 = arith.constant 0 : i32
    %c0_i32_1 = arith.constant 0 : i32
    return %c0_i32, %c0_i32_0 : i32, i32
  }
  func.func @transform_7(%arg0: i32) -> (i32, i32) {
    %c0_i32 = arith.constant 0 : i32
    %c0_i32_0 = arith.constant 0 : i32
    %c0_i32_1 = arith.constant 0 : i32
    return %c0_i32, %c0_i32_0 : i32, i32
  }
  func.func @transform_8(%arg0: i32) -> (i32, i32) {
    %c0_i32 = arith.constant 0 : i32
    %c0_i32_0 = arith.constant 0 : i32
    %c0_i32_1 = arith.constant 0 : i32
    return %c0_i32, %c0_i32_0 : i32, i32
  }
  func.func @transform_9(%arg0: i32) -> (i32, i32) {
    %c0_i32 = arith.constant 0 : i32
    %c0_i32_0 = arith.constant 0 : i32
    %c0_i32_1 = arith.constant 0 : i32
    return %c0_i32, %c0_i32_0 : i32, i32
  }
}

</mosaic_0001>

<bundles_post_ra>
// kernel: tpu_custom_call.1
= control target key start
LH: loop header
LB: loop body
LE: loop exit
PB: predicated region body
PF: predicated region fallthrough
CT: control target
= control target key end

     0   :  { %14 = vsyncpa [#allocation3], 0  ;;  %s4303_s0 = inlined_call_operand.hbm [shape: f32[16,512], index: 0, kind: input, shape index: {}]   ;;  %s4304_s1 = inlined_call_operand.hbm [shape: f32[16,16], index: 1, kind: input, shape index: {}]   ;;  %s4305_s2 = inlined_call_operand.hbm [shape: f32[512,1024], index: 2, kind: input, shape index: {}]   ;;  %s4306_s3 = inlined_call_operand.hbm [shape: f32[1,1024], index: 3, kind: input, shape index: {}]   ;;  %s4307_s4 = inlined_call_operand.hbm [shape: f32[1,512], index: 4, kind: input, shape index: {}]   ;;  %s4308_s5 = inlined_call_operand.hbm [shape: f32[512,512], index: 5, kind: input, shape index: {}]   ;;  %s4309_s6 = inlined_call_operand.hbm [shape: f32[1,512], index: 6, kind: input, shape index: {}]   ;;  %s4310_s7 = inlined_call_operand.hbm [shape: f32[512,256], index: 7, kind: input, shape index: {}]   ;;  %s4311_s8 = inlined_call_operand.hbm [shape: f32[1,256], index: 8, kind: input, shape index: {}]   ;;  %s4312_s9 = inlined_call_operand.hbm [shape: f32[16,256], index: 9, kind: output, shape index: {}]  }
   0x1   :  { %15 = vsyncpa [#allocation6], 0 }
   0x2   :  { %16 = vsyncpa [#allocation9], 0 }
   0x3   :  { %17 = vsyncpa [#allocation12], 0 }
   0x4   :  { %18 = vsyncpa [#allocation15], 0 }
   0x5   :  { %19 = vsyncpa [#allocation4], 0  ;;  %s3872_s30 = smov [#allocation5]   ;;  %s3640_s13 = scalar_lea.hbm %s4304_s1, 256 }
   0x6   :  { %s37_s10 = sshll.u32 %s3872_s30, 4  ;;  %p3641_p0 = scmp.ne.s32.totalorder %s4304_s1, %s3640_s13  ;;  %s38_s10 = int_to_ptr.vmem [resolvable:$true] %s37_s10 }
   0x7   :  { %p3644_p1 = scmp.lt.u32.totalorder %s3640_s13, %s4304_s1 }
   0x9   :  { %p3646_p2 = pnand %p3644_p1, %p3641_p0 }
   0xb   :  { %3649 = shalt.err (!%p3646_p2)
}
   0xc   :  { %s3650_s18 = scalar_lea.vmem %s38_s10, 256  ;;  %p3655_p4 = scmp.lt.s32.totalorder %s38_s10, %s38_s10 }
   0xd   :  { %p3651_p3 = scmp.ne.s32.totalorder %s38_s10, %s3650_s18  ;;  %p3656_p5 = scmp.lt.s32.totalorder %s3650_s18, %s3650_s18 }
   0xf   :  { %p3657_p6 = por %p3656_p5, %p3655_p4 }
  0x11   :  { %p3658_p7 = pnand %p3657_p6, %p3651_p3 }
  0x13   :  { %3661 = shalt.err (!%p3658_p7)
}
  0x14   :  { %s3873_s19 = smov 128   ;;  %s3874_s20 = smov 8  }
  0x15   :  { %43 = dma.hbm_to_vmem [thread:$0]  %s4304_s1, 256, %s38_s10, [#allocation6], %s3873_s19, %s3873_s19, %s3874_s20  }
  0x16   :  { %s3875_s23 = smov [#allocation8]   ;;  %s3662_s27 = scalar_lea.hbm %s4306_s3, 128 }
  0x17   :  { %s62_s24 = sshll.u32 %s3875_s23, 4  ;;  %p3663_p8 = scmp.ne.s32.totalorder %s4306_s3, %s3662_s27  ;;  %s63_s24 = int_to_ptr.vmem [resolvable:$true] %s62_s24 }
  0x18   :  { %p3666_p9 = scmp.lt.u32.totalorder %s3662_s27, %s4306_s3 }
  0x1a   :  { %p3668_p10 = pnand %p3666_p9, %p3663_p8 }
  0x1c   :  { %3671 = shalt.err (!%p3668_p10)
}
  0x1d   :  { %s3672_s12 = scalar_lea.vmem %s63_s24, 128  ;;  %p3677_p12 = scmp.lt.s32.totalorder %s63_s24, %s63_s24 }
  0x1e   :  { %p3673_p11 = scmp.ne.s32.totalorder %s63_s24, %s3672_s12  ;;  %p3678_p13 = scmp.lt.s32.totalorder %s3672_s12, %s3672_s12 }
  0x20   :  { %p3679_p0 = por %p3678_p13, %p3677_p12 }
  0x22   :  { %p3680_p1 = pnand %p3679_p0, %p3673_p11 }
  0x24   :  { %3683 = shalt.err (!%p3680_p1)
}
  0x25   :  { %65 = dma.hbm_to_vmem [thread:$0]  %s4306_s3, 128, %s63_s24, [#allocation9]  }
  0x26   :  { %s3876_s13 = smov [#allocation11]   ;;  %s3877_s15 = smov [#allocation14]  }
  0x27   :  { %s81_s14 = sshll.u32 %s3876_s13, 4  ;;  %s103_s16 = sshll.u32 %s3877_s15, 4  ;;  %s82_s14 = int_to_ptr.vmem [resolvable:$true] %s81_s14  ;;  %s3966_s16 = int_to_ptr.vmem [resolvable:$true] %s103_s16 }
  0x28   :  { %s3684_s19 = scalar_lea.hbm %s4308_s5, 32768 }
  0x29   :  { %p3685_p2 = scmp.ne.s32.totalorder %s4308_s5, %s3684_s19  ;;  %p3688_p3 = scmp.lt.u32.totalorder %s3684_s19, %s4308_s5 }
  0x2b   :  { %p3690_p4 = pnand %p3688_p3, %p3685_p2 }
  0x2d   :  { %3693 = shalt.err (!%p3690_p4)
}
  0x2e   :  { %s3694_s3 = scalar_lea.vmem %s82_s14, 32768  ;;  %p3699_p6 = scmp.lt.s32.totalorder %s82_s14, %s82_s14 }
  0x2f   :  { %p3695_p5 = scmp.ne.s32.totalorder %s82_s14, %s3694_s3  ;;  %p3700_p7 = scmp.lt.s32.totalorder %s3694_s3, %s3694_s3 }
  0x31   :  { %p3701_p8 = por %p3700_p7, %p3699_p6 }
  0x33   :  { %p3702_p9 = pnand %p3701_p8, %p3695_p5 }
  0x35   :  { %3705 = shalt.err (!%p3702_p9)
}
  0x36   :  { %s3878_s24 = smov 512   ;;  %s3879_s25 = smov 32  }
  0x37   :  { %87 = dma.hbm_to_vmem [thread:$0]  %s4308_s5, 32768, %s82_s14, [#allocation12], %s3878_s24, %s3878_s24, %s3879_s25  }
  0x38   :  { %s3706_s30 = scalar_lea.hbm %s4310_s7, 16384 }
  0x39   :  { %p3707_p10 = scmp.ne.s32.totalorder %s4310_s7, %s3706_s30  ;;  %p3710_p11 = scmp.lt.u32.totalorder %s3706_s30, %s4310_s7 }
  0x3b   :  { %p3712_p12 = pnand %p3710_p11, %p3707_p10 }
  0x3d   :  { %3715 = shalt.err (!%p3712_p12)
}
  0x3e   :  { %s3716_s13 = scalar_lea.vmem %s3966_s16, 16384  ;;  %p3721_p0 = scmp.lt.s32.totalorder %s3966_s16, %s3966_s16 }
  0x3f   :  { %p3717_p13 = scmp.ne.s32.totalorder %s3966_s16, %s3716_s13  ;;  %p3722_p1 = scmp.lt.s32.totalorder %s3716_s13, %s3716_s13 }
  0x41   :  { %p3723_p2 = por %p3722_p1, %p3721_p0 }
  0x43   :  { %p3724_p3 = pnand %p3723_p2, %p3717_p13 }
  0x45   :  { %3727 = shalt.err (!%p3724_p3)
}
  0x46   :  { %s3880_s5 = smov 256   ;;  %s3881_s14 = smov 16  }
  0x47   :  { %109 = dma.hbm_to_vmem [thread:$0]  %s4310_s7, 16384, %s3966_s16, [#allocation15], %s3880_s5, %s3880_s5, %s3881_s14  }
  0x48   :  { %s3882_s18 = smov [#allocation2]   ;;  %s3883_s20 = smov [#allocation7]  }
  0x49   :  { %s25_s19 = sshll.u32 %s3882_s18, 4  ;;  %s49_s21 = sshll.u32 %s3883_s20, 4  ;;  %s26_s19 = int_to_ptr.vmem [resolvable:$true] %s25_s19  ;;  %s4003_s21 = int_to_ptr.vmem [resolvable:$true] %s49_s21 }
  0x4a   :  { %s3728_s3 = scalar_lea.hbm %s4303_s0, 1024 }
  0x4b   :  { %p3729_p4 = scmp.ne.s32.totalorder %s4303_s0, %s3728_s3  ;;  %p3732_p5 = scmp.lt.u32.totalorder %s3728_s3, %s4303_s0 }
  0x4d   :  { %p3734_p6 = pnand %p3732_p5, %p3729_p4 }
  0x4f   :  { %3737 = shalt.err (!%p3734_p6)
}
  0x50   :  { %s3738_s7 = scalar_lea.vmem %s26_s19, 1024  ;;  %p3743_p8 = scmp.lt.s32.totalorder %s26_s19, %s26_s19 }
  0x51   :  { %p3739_p7 = scmp.ne.s32.totalorder %s26_s19, %s3738_s7  ;;  %p3744_p9 = scmp.lt.s32.totalorder %s3738_s7, %s3738_s7 }
  0x53   :  { %p3745_p10 = por %p3744_p9, %p3743_p8 }
  0x55   :  { %p3746_p11 = pnand %p3745_p10, %p3739_p7 }
  0x57   :  { %3749 = shalt.err (!%p3746_p11)
}
  0x58   :  { %31 = dma.hbm_to_vmem [thread:$0]  %s4303_s0, 1024, %s26_s19, [#allocation3], %s3878_s24, %s3878_s24, %s3879_s25  }
  0x59   :  { %s3750_s1 = scalar_lea.hbm %s4305_s2, 65536 }
  0x5a   :  { %p3751_p12 = scmp.ne.s32.totalorder %s4305_s2, %s3750_s1  ;;  %p3754_p13 = scmp.lt.u32.totalorder %s3750_s1, %s4305_s2 }
  0x5c   :  { %p3756_p0 = pnand %p3754_p13, %p3751_p12 }
  0x5e   :  { %3759 = shalt.err (!%p3756_p0)
}
  0x5f   :  { %s3760_s18 = scalar_lea.vmem %s4003_s21, 65536  ;;  %p3765_p2 = scmp.lt.s32.totalorder %s4003_s21, %s4003_s21 }
  0x60   :  { %p3761_p1 = scmp.ne.s32.totalorder %s4003_s21, %s3760_s18  ;;  %p3766_p3 = scmp.lt.s32.totalorder %s3760_s18, %s3760_s18 }
  0x62   :  { %p3767_p4 = por %p3766_p3, %p3765_p2 }
  0x64   :  { %p3768_p5 = pnand %p3767_p4, %p3761_p1 }
  0x66   :  { %3771 = shalt.err (!%p3768_p5)
}
  0x67   :  { %s3884_s0 = smov 1024   ;;  %s3885_s24 = smov 64  }
  0x68   :  { %55 = dma.hbm_to_vmem [thread:$0]  %s4305_s2, 65536, %s4003_s21, [#allocation6], %s3884_s0, %s3884_s0, %s3885_s24  }
  0x69   :  { %s3886_s20 = smov [#allocation10]   ;;  %s3887_s23 = smov [#allocation13]  }
  0x6a   :  { %s72_s22 = sshll.u32 %s3886_s20, 4  ;;  %s94_s3 = sshll.u32 %s3887_s23, 4  ;;  %s73_s22 = int_to_ptr.vmem [resolvable:$true] %s72_s22  ;;  %s95_s3 = int_to_ptr.vmem [resolvable:$true] %s94_s3 }
  0x6b   :  { %s3772_s28 = scalar_lea.hbm %s4307_s4, 64 }
  0x6c   :  { %p3773_p6 = scmp.ne.s32.totalorder %s4307_s4, %s3772_s28  ;;  %p3776_p7 = scmp.lt.u32.totalorder %s3772_s28, %s4307_s4 }
  0x6e   :  { %p3778_p8 = pnand %p3776_p7, %p3773_p6 }
  0x70   :  { %3781 = shalt.err (!%p3778_p8)
}
  0x71   :  { %s3782_s2 = scalar_lea.vmem %s73_s22, 64  ;;  %p3787_p10 = scmp.lt.s32.totalorder %s73_s22, %s73_s22 }
  0x72   :  { %p3783_p9 = scmp.ne.s32.totalorder %s73_s22, %s3782_s2  ;;  %p3788_p11 = scmp.lt.s32.totalorder %s3782_s2, %s3782_s2 }
  0x74   :  { %p3789_p12 = por %p3788_p11, %p3787_p10 }
  0x76   :  { %p3790_p13 = pnand %p3789_p12, %p3783_p9 }
  0x78   :  { %3793 = shalt.err (!%p3790_p13)
}
  0x79   :  { %75 = dma.hbm_to_vmem [thread:$0]  %s4307_s4, 64, %s73_s22, [#allocation9]  }
  0x7a   :  { %s3794_s10 = scalar_lea.hbm %s4309_s6, 64 }
  0x7b   :  { %p3795_p0 = scmp.ne.s32.totalorder %s4309_s6, %s3794_s10  ;;  %p3798_p1 = scmp.lt.u32.totalorder %s3794_s10, %s4309_s6 }
  0x7d   :  { %p3800_p2 = pnand %p3798_p1, %p3795_p0 }
  0x7f   :  { %3803 = shalt.err (!%p3800_p2)
}
  0x80   :  { %s3804_s0 = scalar_lea.vmem %s95_s3, 64  ;;  %p3809_p4 = scmp.lt.s32.totalorder %s95_s3, %s95_s3 }
  0x81   :  { %p3805_p3 = scmp.ne.s32.totalorder %s95_s3, %s3804_s0  ;;  %p3810_p5 = scmp.lt.s32.totalorder %s3804_s0, %s3804_s0 }
  0x83   :  { %p3811_p6 = por %p3810_p5, %p3809_p4 }
  0x85   :  { %p3812_p7 = pnand %p3811_p6, %p3805_p3 }
  0x87   :  { %3815 = shalt.err (!%p3812_p7)
}
  0x88   :  { %97 = dma.hbm_to_vmem [thread:$0]  %s4309_s6, 64, %s95_s3, [#allocation12]  }
  0x89   :  { %s3888_s25 = smov [#allocation16]   ;;  %s3816_s23 = scalar_lea.hbm %s4311_s8, 32 }
  0x8a   :  { %s116_s19 = sshll.u32 %s3888_s25, 4  ;;  %p3817_p8 = scmp.ne.s32.totalorder %s4311_s8, %s3816_s23  ;;  %s117_s19 = int_to_ptr.vmem [resolvable:$true] %s116_s19 }
  0x8b   :  { %p3820_p9 = scmp.lt.u32.totalorder %s3816_s23, %s4311_s8 }
  0x8d   :  { %p3822_p10 = pnand %p3820_p9, %p3817_p8 }
  0x8f   :  { %3825 = shalt.err (!%p3822_p10)
}
  0x90   :  { %s3826_s7 = scalar_lea.vmem %s117_s19, 32  ;;  %p3831_p12 = scmp.lt.s32.totalorder %s117_s19, %s117_s19 }
  0x91   :  { %p3827_p11 = scmp.ne.s32.totalorder %s117_s19, %s3826_s7  ;;  %p3832_p13 = scmp.lt.s32.totalorder %s3826_s7, %s3826_s7 }
  0x93   :  { %p3833_p0 = por %p3832_p13, %p3831_p12 }
  0x95   :  { %p3834_p1 = pnand %p3833_p0, %p3827_p11 }
  0x97   :  { %3837 = shalt.err (!%p3834_p1)
}
  0x98   :  { %119 = dma.hbm_to_vmem [thread:$0]  %s4311_s8, 32, %s117_s19, [#allocation15]  }
  0x99   :  { %3860 = dma.done.wait [#allocation3], 1024  }
  0x9a   :  { %3861 = vsyncadd [#allocation3], 4294966272 }
  0x9b   :  { %3862 = dma.done.wait [#allocation6], 65792  }
  0x9c   :  { %3863 = vsyncadd [#allocation6], 4294901504 }
  0x9d   :  { %3864 = dma.done.wait [#allocation9], 192  }
  0x9e   :  { %3865 = vsyncadd [#allocation9], 4294967104 }
  0x9f   :  { %3866 = dma.done.wait [#allocation12], 32832  }
  0xa0   :  { %3867 = vsyncadd [#allocation12], 4294934464 }
  0xa1   :  { %3868 = dma.done.wait [#allocation15], 16416  }
  0xa2   :  { %3869 = vsyncadd [#allocation15], 4294950880  ;;  %v156_v0 = vld [vmem:[#allocation7 + $0x8] sm:$0xff]  ;;  %v155_v2 = vld [vmem:[#allocation7] sm:$0xff]  ;;  %vm1431_vm0 = vcmask 130048   ;;  %s3891_s8 = smov [#allocation17]  }
  0xa3   :  { %v164_v1 = vld [vmem:[#allocation7 + $0x48] sm:$0xff]  ;;  %v163_v4 = vld [vmem:[#allocation7 + $0x40] sm:$0xff]  ;;  %v4073_v41 = vld [vmem:[#allocation2 + $0x8] sm:$0xff]  ;;  %s2602_s16 = sshll.u32 %s3891_s8, 4  ;;  %s2603_s16 = int_to_ptr.vmem [resolvable:$true] %s2602_s16 }
  0xa4   :  { %v2635_v3 = vpack.c.bf16 %v164_v1, %v156_v0  ;;  %v172_v5 = vld [vmem:[#allocation7 + $0x88] sm:$0xff]  ;;  %v2637_v7 = vpack.c.bf16 %v163_v4, %v155_v2  ;;  %v171_v9 = vld [vmem:[#allocation7 + $0x80] sm:$0xff]  ;;  %773 = vmatprep.mubr.f32.mxu0 %v4073_v41  ;;  %s3838_s30 = scalar_lea.vmem %s2603_s16, 512  ;;  %p3843_p3 = scmp.lt.s32.totalorder %s2603_s16, %s2603_s16 }
  0xa5   :  { %v180_v6 = vld [vmem:[#allocation7 + $0xc8] sm:$0xff]  ;;  %v179_v10 = vld [vmem:[#allocation7 + $0xc0] sm:$0xff]  ;;  %p3839_p2 = scmp.ne.s32.totalorder %s2603_s16, %s3838_s30  ;;  %p3844_p4 = scmp.lt.s32.totalorder %s3838_s30, %s3838_s30 }
  0xa6   :  { %v2639_v8 = vpack.c.bf16 %v180_v6, %v172_v5  ;;  %v188_v11 = vld [vmem:[#allocation7 + $0x108] sm:$0xff]  ;;  %2636 = vmatprep.subr.bf16.mxu0 %v2635_v3  ;;  %v2641_v13 = vpack.c.bf16 %v179_v10, %v171_v9  ;;  %v187_v15 = vld [vmem:[#allocation7 + $0x100] sm:$0xff] }
  0xa7   :  { %v196_v12 = vld [vmem:[#allocation7 + $0x148] sm:$0xff]  ;;  %2638 = vmatpush1.bf16.msra.mxu0 %v2637_v7  ;;  %v195_v16 = vld [vmem:[#allocation7 + $0x140] sm:$0xff]  ;;  %p3845_p5 = por %p3844_p4, %p3843_p3 }
  0xa8   :  { %2640 = vmatprep.subr.bf16.mxu0 %v2639_v8  ;;  %v2643_v14 = vpack.c.bf16 %v196_v12, %v188_v11  ;;  %v204_v17 = vld [vmem:[#allocation7 + $0x188] sm:$0xff]  ;;  %v2645_v19 = vpack.c.bf16 %v195_v16, %v187_v15  ;;  %v203_v21 = vld [vmem:[#allocation7 + $0x180] sm:$0xff] }
  0xa9   :  { %v212_v18 = vld [vmem:[#allocation7 + $0x1c8] sm:$0xff]  ;;  %v211_v22 = vld [vmem:[#allocation7 + $0x1c0] sm:$0xff]  ;;  %p3846_p6 = pnand %p3845_p5, %p3839_p2 }
  0xaa   :  { %v2647_v20 = vpack.c.bf16 %v212_v18, %v204_v17  ;;  %v220_v23 = vld [vmem:[#allocation7 + $0x208] sm:$0xff]  ;;  %v2649_v25 = vpack.c.bf16 %v211_v22, %v203_v21  ;;  %v219_v27 = vld [vmem:[#allocation7 + $0x200] sm:$0xff]  ;;  %v414_v17 = vld [vmem:[#allocation7 + $0x818] sm:$0xff] }
  0xab   :  { %2642 = vmatpush1.bf16.msra.mxu0 %v2641_v13  ;;  %v228_v24 = vld [vmem:[#allocation7 + $0x248] sm:$0xff]  ;;  %v227_v28 = vld [vmem:[#allocation7 + $0x240] sm:$0xff]  ;;  %v422_v18 = vld [vmem:[#allocation7 + $0x858] sm:$0xff] }
  0xac   :  { %2644 = vmatprep.subr.bf16.mxu0 %v2643_v14  ;;  %v2651_v26 = vpack.c.bf16 %v228_v24, %v220_v23  ;;  %v236_v29 = vld [vmem:[#allocation7 + $0x288] sm:$0xff]  ;;  %v2653_v31 = vpack.c.bf16 %v227_v28, %v219_v27  ;;  %v235_v33 = vld [vmem:[#allocation7 + $0x280] sm:$0xff]  ;;  %v421_v21 = vld [vmem:[#allocation7 + $0x850] sm:$0xff] }
  0xad   :  { %v244_v30 = vld [vmem:[#allocation7 + $0x2c8] sm:$0xff]  ;;  %v243_v34 = vld [vmem:[#allocation7 + $0x2c0] sm:$0xff]  ;;  %v430_v28 = vld [vmem:[#allocation7 + $0x898] sm:$0xff] }
  0xae   :  { %v2655_v32 = vpack.c.bf16 %v244_v30, %v236_v29  ;;  %v252_v35 = vld [vmem:[#allocation7 + $0x308] sm:$0xff]  ;;  %v2657_v37 = vpack.c.bf16 %v243_v34, %v235_v33  ;;  %v251_v39 = vld [vmem:[#allocation7 + $0x300] sm:$0xff]  ;;  %v438_v29 = vld [vmem:[#allocation7 + $0x8d8] sm:$0xff] }
  0xaf   :  { %2646 = vmatpush1.bf16.msra.mxu0 %v2645_v19  ;;  %v260_v36 = vld [vmem:[#allocation7 + $0x348] sm:$0xff]  ;;  %v259_v40 = vld [vmem:[#allocation7 + $0x340] sm:$0xff]  ;;  %v413_v19 = vld [vmem:[#allocation7 + $0x810] sm:$0xff] }
  0xb0   :  { %2648 = vmatprep.subr.bf16.mxu0 %v2647_v20  ;;  %v2659_v38 = vpack.c.bf16 %v260_v36, %v252_v35  ;;  %v268_v42 = vld [vmem:[#allocation7 + $0x388] sm:$0xff]  ;;  %v2661_v44 = vpack.c.bf16 %v259_v40, %v251_v39  ;;  %v267_v46 = vld [vmem:[#allocation7 + $0x380] sm:$0xff]  ;;  %v2827_v20 = vpack.c.bf16 %v422_v18, %v414_v17  ;;  %v437_v33 = vld [vmem:[#allocation7 + $0x8d0] sm:$0xff] }
  0xb1   :  { %v276_v43 = vld [vmem:[#allocation7 + $0x3c8] sm:$0xff]  ;;  %v275_v47 = vld [vmem:[#allocation7 + $0x3c0] sm:$0xff]  ;;  %v446_v36 = vld [vmem:[#allocation7 + $0x918] sm:$0xff] }
  0xb2   :  { %v2663_v45 = vpack.c.bf16 %v276_v43, %v268_v42  ;;  %v284_v48 = vld [vmem:[#allocation7 + $0x408] sm:$0xff]  ;;  %v2665_v50 = vpack.c.bf16 %v275_v47, %v267_v46  ;;  %v283_v52 = vld [vmem:[#allocation7 + $0x400] sm:$0xff]  ;;  %2828 = vmatprep.subr.bf16.mxu1 %v2827_v20  ;;  %v518_v17 = vld [vmem:[#allocation7 + $0xb58] sm:$0xff] }
  0xb3   :  { %2650 = vmatpush1.bf16.msra.mxu0 %v2649_v25  ;;  %v292_v49 = vld [vmem:[#allocation7 + $0x448] sm:$0xff]  ;;  %v291_v53 = vld [vmem:[#allocation7 + $0x440] sm:$0xff]  ;;  %v2829_v25 = vpack.c.bf16 %v421_v21, %v413_v19  ;;  %v4081_v21 = vld [vmem:[#allocation2 + $0x28] sm:$0xff] }
  0xb4   :  { %2652 = vmatprep.subr.bf16.mxu0 %v2651_v26  ;;  %v2667_v51 = vpack.c.bf16 %v292_v49, %v284_v48  ;;  %v300_v54 = vld [vmem:[#allocation7 + $0x488] sm:$0xff]  ;;  %v2669_v56 = vpack.c.bf16 %v291_v53, %v283_v52  ;;  %v299_v58 = vld [vmem:[#allocation7 + $0x480] sm:$0xff]  ;;  %v462_v48 = vld [vmem:[#allocation7 + $0x998] sm:$0xff] }
  0xb5   :  { %v308_v55 = vld [vmem:[#allocation7 + $0x4c8] sm:$0xff]  ;;  %v307_v59 = vld [vmem:[#allocation7 + $0x4c0] sm:$0xff]  ;;  %2830 = vmatpush1.bf16.msra.mxu1 %v2829_v25  ;;  %v470_v49 = vld [vmem:[#allocation7 + $0x9d8] sm:$0xff] }
  0xb6   :  { %v2671_v57 = vpack.c.bf16 %v308_v55, %v300_v54  ;;  %v316_v60 = vld [vmem:[#allocation7 + $0x508] sm:$0xff]  ;;  %v2673_v62 = vpack.c.bf16 %v307_v59, %v299_v58  ;;  %v315_v0 = vld [vmem:[#allocation7 + $0x500] sm:$0xff]  ;;  %v2839_v54 = vpack.c.bf16 %v470_v49, %v462_v48  ;;  %v486_v58 = vld [vmem:[#allocation7 + $0xa58] sm:$0xff] }
  0xb7   :  { %2654 = vmatpush1.bf16.msra.mxu0 %v2653_v31  ;;  %v324_v61 = vld [vmem:[#allocation7 + $0x548] sm:$0xff]  ;;  %v323_v1 = vld [vmem:[#allocation7 + $0x540] sm:$0xff]  ;;  %v2831_v31 = vpack.c.bf16 %v438_v29, %v430_v28  ;;  %v4085_v29 = vld [vmem:[#allocation2 + $0x20] sm:$0xff] }
  0xb8   :  { %2656 = vmatprep.subr.bf16.mxu0 %v2655_v32  ;;  %v2675_v63 = vpack.c.bf16 %v324_v61, %v316_v60  ;;  %v332_v2 = vld [vmem:[#allocation7 + $0x588] sm:$0xff]  ;;  %v2677_v4 = vpack.c.bf16 %v323_v1, %v315_v0  ;;  %v331_v6 = vld [vmem:[#allocation7 + $0x580] sm:$0xff]  ;;  %v429_v32 = vld [vmem:[#allocation7 + $0x890] sm:$0xff] }
  0xb9   :  { %v340_v3 = vld [vmem:[#allocation7 + $0x5c8] sm:$0xff]  ;;  %v339_v7 = vld [vmem:[#allocation7 + $0x5c0] sm:$0xff]  ;;  %v2833_v34 = vpack.c.bf16 %v437_v33, %v429_v32  ;;  %2832 = vmatprep.subr.bf16.mxu1 %v2831_v31  ;;  %v485_v0 = vld [vmem:[#allocation7 + $0xa50] sm:$0xff] }
  0xba   :  { %v2679_v5 = vpack.c.bf16 %v340_v3, %v332_v2  ;;  %v348_v8 = vld [vmem:[#allocation7 + $0x608] sm:$0xff]  ;;  %v2681_v10 = vpack.c.bf16 %v339_v7, %v331_v6  ;;  %v347_v11 = vld [vmem:[#allocation7 + $0x600] sm:$0xff]  ;;  %v494_v2 = vld [vmem:[#allocation7 + $0xa98] sm:$0xff] }
  0xbb   :  { %2658 = vmatpush1.bf16.msra.mxu0 %v2657_v37  ;;  %v356_v9 = vld [vmem:[#allocation7 + $0x648] sm:$0xff]  ;;  %v355_v14 = vld [vmem:[#allocation7 + $0x640] sm:$0xff]  ;;  %v454_v37 = vld [vmem:[#allocation7 + $0x958] sm:$0xff]  ;;  %2834 = vmatpush1.bf16.msra.mxu1 %v2833_v34 }
  0xbc   :  { %2660 = vmatprep.subr.bf16.mxu0 %v2659_v38  ;;  %v4076_v12 = vld [vmem:[#allocation2 + $0x18] sm:$0xff]  ;;  %v2683_v13 = vpack.c.bf16 %v356_v9, %v348_v8  ;;  %v2685_v22 = vpack.c.bf16 %v355_v14, %v347_v11  ;;  %v363_v23 = vld [vmem:[#allocation7 + $0x680] sm:$0xff]  ;;  %v445_v38 = vld [vmem:[#allocation7 + $0x910] sm:$0xff]  ;;  %v2835_v43 = vpack.c.bf16 %v454_v37, %v446_v36 }
  0xbd   :  { %v364_v15 = vld [vmem:[#allocation7 + $0x688] sm:$0xff]  ;;  %1004 = vmatprep.mubr.f32.mxu1 %v4076_v12  ;;  %v371_v24 = vld [vmem:[#allocation7 + $0x6c0] sm:$0xff]  ;;  %v502_v3 = vld [vmem:[#allocation7 + $0xad8] sm:$0xff] }
  0xbe   :  { %v372_v16 = vld [vmem:[#allocation7 + $0x6c8] sm:$0xff]  ;;  %v2689_v35 = vpack.c.bf16 %v371_v24, %v363_v23  ;;  %v379_v40 = vld [vmem:[#allocation7 + $0x700] sm:$0xff]  ;;  %2836 = vmatprep.subr.bf16.mxu1 %v2835_v43  ;;  %v493_v11 = vld [vmem:[#allocation7 + $0xa90] sm:$0xff] }
  0xbf   :  { %2662 = vmatpush1.bf16.msra.mxu0 %v2661_v44  ;;  %v2687_v26 = vpack.c.bf16 %v372_v16, %v364_v15  ;;  %v380_v27 = vld [vmem:[#allocation7 + $0x708] sm:$0xff]  ;;  %v387_v42 = vld [vmem:[#allocation7 + $0x740] sm:$0xff]  ;;  %v453_v44 = vld [vmem:[#allocation7 + $0x950] sm:$0xff] }
  0xc0   :  { %2664 = vmatprep.subr.bf16.mxu0 %v2663_v45  ;;  %v388_v30 = vld [vmem:[#allocation7 + $0x748] sm:$0xff]  ;;  %v2837_v47 = vpack.c.bf16 %v453_v44, %v445_v38  ;;  %v2693_v52 = vpack.c.bf16 %v387_v42, %v379_v40  ;;  %v395_v53 = vld [vmem:[#allocation7 + $0x780] sm:$0xff]  ;;  %v4079_v14 = vld [vmem:[#allocation2] sm:$0xff] }
  0xc1   :  { %v2691_v39 = vpack.c.bf16 %v388_v30, %v380_v27  ;;  %v396_v45 = vld [vmem:[#allocation7 + $0x788] sm:$0xff]  ;;  %v419_v6 = vld [vmem:[#allocation7 + $0x840] sm:$0xff]  ;;  %v510_v16 = vld [vmem:[#allocation7 + $0xb18] sm:$0xff] }
  0xc2   :  { %v404_v46 = vld [vmem:[#allocation7 + $0x7c8] sm:$0xff]  ;;  %2838 = vmatpush1.bf16.msra.mxu1 %v2837_v47  ;;  %v427_v19 = vld [vmem:[#allocation7 + $0x880] sm:$0xff]  ;;  %v2851_v25 = vpack.c.bf16 %v518_v17, %v510_v16  ;;  %v517_v27 = vld [vmem:[#allocation7 + $0xb50] sm:$0xff] }
  0xc3   :  { %2666 = vmatpush1.bf16.msra.mxu0 %v2665_v50  ;;  %v461_v50 = vld [vmem:[#allocation7 + $0x990] sm:$0xff]  ;;  %v2695_v55 = vpack.c.bf16 %v404_v46, %v396_v45  ;;  %v412_v59 = vld [vmem:[#allocation7 + $0x808] sm:$0xff]  ;;  %2840 = vmatprep.subr.bf16.mxu1 %v2839_v54  ;;  %v435_v20 = vld [vmem:[#allocation7 + $0x8c0] sm:$0xff] }
  0xc4   :  { %2668 = vmatprep.subr.bf16.mxu0 %v2667_v51  ;;  %v469_v51 = vld [vmem:[#allocation7 + $0x9d0] sm:$0xff]  ;;  %v420_v60 = vld [vmem:[#allocation7 + $0x848] sm:$0xff]  ;;  %v2705_v28 = vpack.c.bf16 %v435_v20, %v427_v19  ;;  %v526_v30 = vld [vmem:[#allocation7 + $0xb98] sm:$0xff] }
  0xc5   :  { %v2841_v61 = vpack.c.bf16 %v469_v51, %v461_v50  ;;  %v428_v7 = vld [vmem:[#allocation7 + $0x888] sm:$0xff]  ;;  %v534_v31 = vld [vmem:[#allocation7 + $0xbd8] sm:$0xff]  ;;  %v443_v33 = vld [vmem:[#allocation7 + $0x900] sm:$0xff] }
  0xc6   :  { %v436_v8 = vld [vmem:[#allocation7 + $0x8c8] sm:$0xff]  ;;  %v451_v34 = vld [vmem:[#allocation7 + $0x940] sm:$0xff]  ;;  %v2855_v38 = vpack.c.bf16 %v534_v31, %v526_v30  ;;  %v533_v40 = vld [vmem:[#allocation7 + $0xbd0] sm:$0xff] }
  0xc7   :  { %2670 = vmatpush1.bf16.msra.mxu0 %v2669_v56  ;;  %v403_v56 = vld [vmem:[#allocation7 + $0x7c0] sm:$0xff]  ;;  %2842 = vmatpush1.bf16.msra.mxu1 %v2841_v61  ;;  %v2703_v18 = vpack.c.bf16 %v436_v8, %v428_v7  ;;  %v452_v23 = vld [vmem:[#allocation7 + $0x948] sm:$0xff]  ;;  %v2709_v42 = vpack.c.bf16 %v451_v34, %v443_v33  ;;  %v542_v43 = vld [vmem:[#allocation7 + $0xc18] sm:$0xff] }
  0xc8   :  { %2672 = vmatprep.subr.bf16.mxu0 %v2671_v57  ;;  %v478_v57 = vld [vmem:[#allocation7 + $0xa18] sm:$0xff]  ;;  %v2697_v1 = vpack.c.bf16 %v403_v56, %v395_v53  ;;  %v468_v36 = vld [vmem:[#allocation7 + $0x9c8] sm:$0xff]  ;;  %v459_v46 = vld [vmem:[#allocation7 + $0x980] sm:$0xff] }
  0xc9   :  { %v550_v44 = vld [vmem:[#allocation7 + $0xc58] sm:$0xff]  ;;  %v467_v47 = vld [vmem:[#allocation7 + $0x9c0] sm:$0xff]  ;;  %v476_v48 = vld [vmem:[#allocation7 + $0xa08] sm:$0xff] }
  0xca   :  { %v484_v49 = vld [vmem:[#allocation7 + $0xa48] sm:$0xff]  ;;  %v2859_v51 = vpack.c.bf16 %v550_v44, %v542_v43  ;;  %v549_v53 = vld [vmem:[#allocation7 + $0xc50] sm:$0xff]  ;;  %v2713_v54 = vpack.c.bf16 %v467_v47, %v459_v46  ;;  %v566_v56 = vld [vmem:[#allocation7 + $0xcd8] sm:$0xff] }
  0xcb   :  { %2674 = vmatpush1.bf16.msra.mxu0 %v2673_v62  ;;  %v2843_v62 = vpack.c.bf16 %v486_v58, %v478_v57  ;;  %v475_v57 = vld [vmem:[#allocation7 + $0xa00] sm:$0xff]  ;;  %v508_v7 = vld [vmem:[#allocation7 + $0xb08] sm:$0xff]  ;;  %v590_v16 = vld [vmem:[#allocation7 + $0xd98] sm:$0xff] }
  0xcc   :  { %2676 = vmatprep.subr.bf16.mxu0 %v2675_v63  ;;  %v477_v63 = vld [vmem:[#allocation7 + $0xa10] sm:$0xff]  ;;  %v483_v58 = vld [vmem:[#allocation7 + $0xa40] sm:$0xff]  ;;  %v516_v8 = vld [vmem:[#allocation7 + $0xb48] sm:$0xff] }
  0xcd   :  { %v2845_v9 = vpack.c.bf16 %v485_v0, %v477_v63  ;;  %2844 = vmatprep.subr.bf16.mxu1 %v2843_v62  ;;  %v557_v63 = vld [vmem:[#allocation7 + $0xc90] sm:$0xff]  ;;  %v598_v17 = vld [vmem:[#allocation7 + $0xdd8] sm:$0xff]  ;;  %v507_v19 = vld [vmem:[#allocation7 + $0xb00] sm:$0xff] }
  0xce   :  { %v565_v0 = vld [vmem:[#allocation7 + $0xcd0] sm:$0xff]  ;;  %v515_v20 = vld [vmem:[#allocation7 + $0xb40] sm:$0xff]  ;;  %v606_v30 = vld [vmem:[#allocation7 + $0xe18] sm:$0xff] }
  0xcf   :  { %2678 = vmatpush1.bf16.msra.mxu0 %v2677_v4  ;;  %v2699_v4 = vpack.c.bf16 %v420_v60, %v412_v59  ;;  %2846 = vmatpush1.bf16.msra.mxu1 %v2845_v9  ;;  %v492_v59 = vld [vmem:[#allocation7 + $0xa88] sm:$0xff]  ;;  %v2865_v9 = vpack.c.bf16 %v565_v0, %v557_v63  ;;  %v614_v31 = vld [vmem:[#allocation7 + $0xe58] sm:$0xff]  ;;  %v523_v33 = vld [vmem:[#allocation7 + $0xb80] sm:$0xff] }
  0xd0   :  { %2680 = vmatprep.subr.bf16.mxu0 %v2679_v5  ;;  %v411_v5 = vld [vmem:[#allocation7 + $0x800] sm:$0xff]  ;;  %v500_v60 = vld [vmem:[#allocation7 + $0xac8] sm:$0xff]  ;;  %v622_v43 = vld [vmem:[#allocation7 + $0xe98] sm:$0xff] }
  0xd1   :  { %v2701_v15 = vpack.c.bf16 %v419_v6, %v411_v5  ;;  %v491_v5 = vld [vmem:[#allocation7 + $0xa80] sm:$0xff]  ;;  %v630_v44 = vld [vmem:[#allocation7 + $0xed8] sm:$0xff]  ;;  %v637_v63 = vld [vmem:[#allocation7 + $0xf10] sm:$0xff] }
  0xd2   :  { %v499_v6 = vld [vmem:[#allocation7 + $0xac0] sm:$0xff]  ;;  %v645_v0 = vld [vmem:[#allocation7 + $0xf50] sm:$0xff] }
  0xd3   :  { %2682 = vmatpush1.bf16.msra.mxu0 %v2681_v10  ;;  %v2847_v10 = vpack.c.bf16 %v502_v3, %v494_v2  ;;  %v574_v2 = vld [vmem:[#allocation7 + $0xd18] sm:$0xff]  ;;  %v531_v34 = vld [vmem:[#allocation7 + $0xbc0] sm:$0xff] }
  0xd4   :  { %2684 = vmatprep.subr.bf16.mxu0 %v2683_v13  ;;  %v501_v13 = vld [vmem:[#allocation7 + $0xad0] sm:$0xff]  ;;  %v582_v3 = vld [vmem:[#allocation7 + $0xd58] sm:$0xff]  ;;  %v539_v46 = vld [vmem:[#allocation7 + $0xc00] sm:$0xff] }
  0xd5   :  { %v2849_v24 = vpack.c.bf16 %v501_v13, %v493_v11  ;;  %2848 = vmatprep.subr.bf16.mxu1 %v2847_v10  ;;  %v2867_v10 = vpack.c.bf16 %v582_v3, %v574_v2  ;;  %v573_v11 = vld [vmem:[#allocation7 + $0xd10] sm:$0xff]  ;;  %v547_v47 = vld [vmem:[#allocation7 + $0xc40] sm:$0xff]  ;;  %v654_v2 = vld [vmem:[#allocation7 + $0xf98] sm:$0xff] }
  0xd6   :  { %v581_v13 = vld [vmem:[#allocation7 + $0xd50] sm:$0xff]  ;;  %v662_v3 = vld [vmem:[#allocation7 + $0xfd8] sm:$0xff] }
  0xd7   :  { %2686 = vmatpush1.bf16.msra.mxu0 %v2685_v22  ;;  %v444_v22 = vld [vmem:[#allocation7 + $0x908] sm:$0xff]  ;;  %2850 = vmatpush1.bf16.msra.mxu1 %v2849_v24  ;;  %v2869_v24 = vpack.c.bf16 %v581_v13, %v573_v11  ;;  %v653_v11 = vld [vmem:[#allocation7 + $0xf90] sm:$0xff] }
  0xd8   :  { %2688 = vmatprep.subr.bf16.mxu0 %v2687_v26  ;;  %v509_v26 = vld [vmem:[#allocation7 + $0xb10] sm:$0xff]  ;;  %v2707_v32 = vpack.c.bf16 %v452_v23, %v444_v22  ;;  %2852 = vmatprep.subr.bf16.mxu1 %v2851_v25  ;;  %v524_v22 = vld [vmem:[#allocation7 + $0xb88] sm:$0xff]  ;;  %v2871_v25 = vpack.c.bf16 %v598_v17, %v590_v16  ;;  %v587_v17 = vld [vmem:[#allocation7 + $0xd80] sm:$0xff] }
  0xd9   :  { %v2853_v37 = vpack.c.bf16 %v517_v27, %v509_v26  ;;  %v532_v23 = vld [vmem:[#allocation7 + $0xbc8] sm:$0xff]  ;;  %v589_v26 = vld [vmem:[#allocation7 + $0xd90] sm:$0xff] }
  0xda   :  { %v597_v27 = vld [vmem:[#allocation7 + $0xdd0] sm:$0xff] }
  0xdb   :  { %2690 = vmatpush1.bf16.msra.mxu0 %v2689_v35  ;;  %v460_v35 = vld [vmem:[#allocation7 + $0x988] sm:$0xff]  ;;  %2854 = vmatpush1.bf16.msra.mxu1 %v2853_v37  ;;  %v2873_v37 = vpack.c.bf16 %v597_v27, %v589_v26  ;;  %v661_v13 = vld [vmem:[#allocation7 + $0xfd0] sm:$0xff]  ;;  %v611_v26 = vld [vmem:[#allocation7 + $0xe40] sm:$0xff] }
  0xdc   :  { %2692 = vmatprep.subr.bf16.mxu0 %v2691_v39  ;;  %v525_v39 = vld [vmem:[#allocation7 + $0xb90] sm:$0xff]  ;;  %v2711_v45 = vpack.c.bf16 %v468_v36, %v460_v35  ;;  %2856 = vmatprep.subr.bf16.mxu1 %v2855_v38  ;;  %v540_v35 = vld [vmem:[#allocation7 + $0xc08] sm:$0xff]  ;;  %v2875_v38 = vpack.c.bf16 %v614_v31, %v606_v30  ;;  %v149_v31 = vld [vmem:[#allocation2 + $0x10] sm:$0xff] }
  0xdd   :  { %v2857_v50 = vpack.c.bf16 %v533_v40, %v525_v39  ;;  %v548_v36 = vld [vmem:[#allocation7 + $0xc48] sm:$0xff]  ;;  %v605_v39 = vld [vmem:[#allocation7 + $0xe10] sm:$0xff] }
  0xde   :  { %v613_v40 = vld [vmem:[#allocation7 + $0xe50] sm:$0xff]  ;;  %v620_v27 = vld [vmem:[#allocation7 + $0xe88] sm:$0xff] }
  0xdf   :  { %2694 = vmatpush1.bf16.msra.mxu0 %v2693_v52  ;;  %v541_v52 = vld [vmem:[#allocation7 + $0xc10] sm:$0xff]  ;;  %2858 = vmatpush1.bf16.msra.mxu1 %v2857_v50  ;;  %v2877_v50 = vpack.c.bf16 %v613_v40, %v605_v39  ;;  %v153_v39 = vld [vmem:[#allocation2 + $0x30] sm:$0xff] }
  0xe0   :  { %2696 = vmatprep.subr.bf16.mxu0 %v2695_v55  ;;  %v558_v55 = vld [vmem:[#allocation7 + $0xc98] sm:$0xff]  ;;  %v2861_v61 = vpack.c.bf16 %v549_v53, %v541_v52  ;;  %2860 = vmatprep.subr.bf16.mxu1 %v2859_v51  ;;  %v2879_v51 = vpack.c.bf16 %v630_v44, %v622_v43  ;;  %v621_v52 = vld [vmem:[#allocation7 + $0xe90] sm:$0xff]  ;;  %v643_v43 = vld [vmem:[#allocation7 + $0xf40] sm:$0xff] }
  0xe1   :  { %v2863_v62 = vpack.c.bf16 %v566_v56, %v558_v55  ;;  %v629_v53 = vld [vmem:[#allocation7 + $0xed0] sm:$0xff]  ;;  %v638_v55 = vld [vmem:[#allocation7 + $0xf18] sm:$0xff]  ;;  %v652_v44 = vld [vmem:[#allocation7 + $0xf88] sm:$0xff] }
  0xe2   :  { %v646_v56 = vld [vmem:[#allocation7 + $0xf58] sm:$0xff] }
  0xe3   :  { %2698 = vmatpush1.bf16.msra.mxu0 %v2697_v1  ;;  %v2717_v1 = vpack.c.bf16 %v483_v58, %v475_v57  ;;  %2862 = vmatpush1.bf16.msra.mxu1 %v2861_v61  ;;  %v555_v57 = vld [vmem:[#allocation7 + $0xc80] sm:$0xff]  ;;  %v2881_v61 = vpack.c.bf16 %v629_v53, %v621_v52 }
  0xe4   :  { %2700 = vmatprep.subr.bf16.mxu0 %v2699_v4  ;;  %v2719_v4 = vpack.c.bf16 %v500_v60, %v492_v59  ;;  %2864 = vmatprep.subr.bf16.mxu1 %v2863_v62  ;;  %v563_v58 = vld [vmem:[#allocation7 + $0xcc0] sm:$0xff]  ;;  %v572_v59 = vld [vmem:[#allocation7 + $0xd08] sm:$0xff]  ;;  %v2883_v62 = vpack.c.bf16 %v646_v56, %v638_v55  ;;  %v165_v55 = vld [vmem:[#allocation7 + $0x50] sm:$0xff] }
  0xe5   :  { %v580_v60 = vld [vmem:[#allocation7 + $0xd48] sm:$0xff]  ;;  %v174_v56 = vld [vmem:[#allocation7 + $0x98] sm:$0xff] }
  0xe6   :  { %774 = vmatmul.mubr.f32.vlgmr.msra.gmra.mrb[0].mxu0 %v4079_v14 }
  0xe7   :  { %2702 = vmatpush1.bf16.msra.mxu0 %v2701_v15  ;;  %779 = vmatprep.mubr.f32.mxu0 %v4081_v21  ;;  %v2721_v15 = vpack.c.bf16 %v499_v6, %v491_v5  ;;  %v571_v5 = vld [vmem:[#allocation7 + $0xd00] sm:$0xff] }
  0xe8   :  { %2704 = vmatprep.subr.bf16.mxu0 %v2703_v18  ;;  %v2723_v18 = vpack.c.bf16 %v516_v8, %v508_v7  ;;  %2866 = vmatpush1.bf16.msra.mxu1 %v2865_v9  ;;  %v579_v6 = vld [vmem:[#allocation7 + $0xd40] sm:$0xff]  ;;  %v588_v7 = vld [vmem:[#allocation7 + $0xd88] sm:$0xff]  ;;  %v2885_v9 = vpack.c.bf16 %v645_v0, %v637_v63 }
  0xe9   :  { %2868 = vmatprep.subr.bf16.mxu1 %v2867_v10  ;;  %v596_v8 = vld [vmem:[#allocation7 + $0xdc8] sm:$0xff]  ;;  %v2887_v10 = vpack.c.bf16 %v662_v3, %v654_v2  ;;  %v197_v2 = vld [vmem:[#allocation7 + $0x150] sm:$0xff]  ;;  %v206_v3 = vld [vmem:[#allocation7 + $0x198] sm:$0xff] }
  0xea   :  { %780 = vmatmul.mubr.f32.gmra.mrb[2].mxu0 %v4085_v29  ;;  %v2743_v16 = vpack.c.bf16 %v596_v8, %v588_v7  ;;  %v205_v7 = vld [vmem:[#allocation7 + $0x190] sm:$0xff] }
  0xeb   :  { %2706 = vmatpush1.bf16.msra.mxu0 %v2705_v28  ;;  %850 = vmatprep.mubr.f32.mxu0 %v4076_v12  ;;  %v2715_v12 = vpack.c.bf16 %v484_v49, %v476_v48  ;;  %v2725_v28 = vpack.c.bf16 %v515_v20, %v507_v19  ;;  %v556_v48 = vld [vmem:[#allocation7 + $0xc88] sm:$0xff]  ;;  %v213_v8 = vld [vmem:[#allocation7 + $0x1d0] sm:$0xff] }
  0xec   :  { %2708 = vmatprep.subr.bf16.mxu0 %v2707_v32  ;;  %v2727_v32 = vpack.c.bf16 %v532_v23, %v524_v22  ;;  %2870 = vmatpush1.bf16.msra.mxu1 %v2869_v24  ;;  %v564_v49 = vld [vmem:[#allocation7 + $0xcc8] sm:$0xff]  ;;  %v2889_v22 = vpack.c.bf16 %v661_v13, %v653_v11  ;;  %v2777_v11 = vpack.c.bf16 %v213_v8, %v205_v7  ;;  %v365_v7 = vld [vmem:[#allocation7 + $0x690] sm:$0xff] }
  0xed   :  { %2872 = vmatprep.subr.bf16.mxu1 %v2871_v25  ;;  %v604_v19 = vld [vmem:[#allocation7 + $0xe08] sm:$0xff]  ;;  %v603_v25 = vld [vmem:[#allocation7 + $0xe00] sm:$0xff]  ;;  %v373_v8 = vld [vmem:[#allocation7 + $0x6d0] sm:$0xff] }
  0xee   :  { %v612_v20 = vld [vmem:[#allocation7 + $0xe48] sm:$0xff]  ;;  %v2749_v30 = vpack.c.bf16 %v611_v26, %v603_v25  ;;  %v262_v25 = vld [vmem:[#allocation7 + $0x358] sm:$0xff] }
  0xef   :  { %2710 = vmatpush1.bf16.msra.mxu0 %v2709_v42  ;;  %v2729_v42 = vpack.c.bf16 %v531_v34, %v523_v33  ;;  %v2747_v24 = vpack.c.bf16 %v612_v20, %v604_v19  ;;  %v619_v33 = vld [vmem:[#allocation7 + $0xe80] sm:$0xff] }
  0xf0   :  { %2712 = vmatprep.subr.bf16.mxu0 %v2711_v45  ;;  %v2731_v45 = vpack.c.bf16 %v548_v36, %v540_v35  ;;  %2874 = vmatpush1.bf16.msra.mxu1 %v2873_v37  ;;  %v627_v34 = vld [vmem:[#allocation7 + $0xec0] sm:$0xff]  ;;  %v154_v35 = vld [vmem:[#allocation2 + $0x38] sm:$0xff] }
  0xf1   :  { %2876 = vmatprep.subr.bf16.mxu1 %v2875_v38  ;;  %v636_v36 = vld [vmem:[#allocation7 + $0xf08] sm:$0xff]  ;;  %v2753_v38 = vpack.c.bf16 %v627_v34, %v619_v33 }
  0xf2   :  { %v644_v37 = vld [vmem:[#allocation7 + $0xf48] sm:$0xff] }
  0xf3   :  { %2714 = vmatpush1.bf16.msra.mxu0 %v2713_v54  ;;  %v2733_v54 = vpack.c.bf16 %v547_v47, %v539_v46  ;;  %v2755_v40 = vpack.c.bf16 %v644_v37, %v636_v36  ;;  %v277_v36 = vld [vmem:[#allocation7 + $0x3d0] sm:$0xff]  ;;  %v286_v37 = vld [vmem:[#allocation7 + $0x418] sm:$0xff] }
  0xf4   :  { %2716 = vmatprep.subr.bf16.mxu0 %v2715_v12  ;;  %v2735_v12 = vpack.c.bf16 %v564_v49, %v556_v48  ;;  %2878 = vmatpush1.bf16.msra.mxu1 %v2877_v50  ;;  %v651_v48 = vld [vmem:[#allocation7 + $0xf80] sm:$0xff]  ;;  %v158_v50 = vld [vmem:[#allocation7 + $0x18] sm:$0xff] }
  0xf5   :  { %2880 = vmatprep.subr.bf16.mxu1 %v2879_v51  ;;  %v659_v49 = vld [vmem:[#allocation7 + $0xfc0] sm:$0xff]  ;;  %v166_v51 = vld [vmem:[#allocation7 + $0x58] sm:$0xff] }
  0xf6   :  { %v2761_v52 = vpack.c.bf16 %v659_v49, %v651_v48  ;;  %v2763_v53 = vpack.c.bf16 %v166_v51, %v158_v50  ;;  %v301_v48 = vld [vmem:[#allocation7 + $0x490] sm:$0xff]  ;;  %v318_v50 = vld [vmem:[#allocation7 + $0x518] sm:$0xff] }
  0xf7   :  { %2718 = vmatpush1.bf16.msra.mxu0 %v2717_v1  ;;  %v2737_v1 = vpack.c.bf16 %v563_v58, %v555_v57  ;;  %v309_v49 = vld [vmem:[#allocation7 + $0x4d0] sm:$0xff]  ;;  %v326_v51 = vld [vmem:[#allocation7 + $0x558] sm:$0xff] }
  0xf8   :  { %2720 = vmatprep.subr.bf16.mxu0 %v2719_v4  ;;  %v2739_v4 = vpack.c.bf16 %v580_v60, %v572_v59  ;;  %2882 = vmatpush1.bf16.msra.mxu1 %v2881_v61  ;;  %v173_v59 = vld [vmem:[#allocation7 + $0x90] sm:$0xff]  ;;  %v190_v61 = vld [vmem:[#allocation7 + $0x118] sm:$0xff] }
  0xf9   :  { %2884 = vmatprep.subr.bf16.mxu1 %v2883_v62  ;;  %v181_v60 = vld [vmem:[#allocation7 + $0xd0] sm:$0xff]  ;;  %v198_v62 = vld [vmem:[#allocation7 + $0x158] sm:$0xff] }
  0xfa   :  { %v2769_v63 = vpack.c.bf16 %v181_v60, %v173_v59  ;;  %v2771_v0 = vpack.c.bf16 %v198_v62, %v190_v61  ;;  %v333_v59 = vld [vmem:[#allocation7 + $0x590] sm:$0xff]  ;;  %v350_v61 = vld [vmem:[#allocation7 + $0x618] sm:$0xff] }
  0xfb   :  { %2722 = vmatpush1.bf16.msra.mxu0 %v2721_v15  ;;  %v2741_v15 = vpack.c.bf16 %v579_v6, %v571_v5  ;;  %v341_v60 = vld [vmem:[#allocation7 + $0x5d0] sm:$0xff]  ;;  %v358_v62 = vld [vmem:[#allocation7 + $0x658] sm:$0xff] }
  0xfc   :  { %2724 = vmatprep.subr.bf16.mxu0 %v2723_v18  ;;  %v595_v18 = vld [vmem:[#allocation7 + $0xdc0] sm:$0xff]  ;;  %2886 = vmatpush1.bf16.msra.mxu1 %v2885_v9  ;;  %v222_v9 = vld [vmem:[#allocation7 + $0x218] sm:$0xff] }
  0xfd   :  { %2888 = vmatprep.subr.bf16.mxu1 %v2887_v10  ;;  %v2745_v23 = vpack.c.bf16 %v595_v18, %v587_v17  ;;  %v230_v10 = vld [vmem:[#allocation7 + $0x258] sm:$0xff] }
  0xfe   :  { %v2779_v13 = vpack.c.bf16 %v230_v10, %v222_v9  ;;  %v238_v17 = vld [vmem:[#allocation7 + $0x298] sm:$0xff] }
  0xff   :  { %2726 = vmatpush1.bf16.msra.mxu0 %v2725_v28  ;;  %v628_v28 = vld [vmem:[#allocation7 + $0xec8] sm:$0xff]  ;;  %v246_v18 = vld [vmem:[#allocation7 + $0x2d8] sm:$0xff] }
 0x100   :  { %2728 = vmatprep.subr.bf16.mxu0 %v2727_v32  ;;  %2890 = vmatpush1.bf16.msra.mxu1 %v2889_v22  ;;  %v2751_v32 = vpack.c.bf16 %v628_v28, %v620_v27  ;;  %v2783_v20 = vpack.c.bf16 %v246_v18, %v238_v17  ;;  %v237_v22 = vld [vmem:[#allocation7 + $0x290] sm:$0xff]  ;;  %v382_v9 = vld [vmem:[#allocation7 + $0x718] sm:$0xff] }
 0x101   :  { %v253_v28 = vld [vmem:[#allocation7 + $0x310] sm:$0xff]  ;;  %v390_v10 = vld [vmem:[#allocation7 + $0x758] sm:$0xff] }
 0x102   :  { %v398_v17 = vld [vmem:[#allocation7 + $0x798] sm:$0xff] }
 0x103   :  { %2730 = vmatpush1.bf16.msra.mxu0 %v2729_v42  ;;  %1005 = vmatmul.mubr.f32.vlgmr.msra.gmra.mrb[0].mxu1 %v149_v31  ;;  %v635_v42 = vld [vmem:[#allocation7 + $0xf00] sm:$0xff]  ;;  %v406_v18 = vld [vmem:[#allocation7 + $0x7d8] sm:$0xff] }
 0x104   :  { %2732 = vmatprep.subr.bf16.mxu0 %v2731_v45  ;;  %1010 = vmatprep.mubr.f32.mxu1 %v154_v35  ;;  %v660_v45 = vld [vmem:[#allocation7 + $0xfc8] sm:$0xff]  ;;  %v2757_v46 = vpack.c.bf16 %v643_v43, %v635_v42  ;;  %v285_v42 = vld [vmem:[#allocation7 + $0x410] sm:$0xff] }
 0x105   :  { %v2759_v47 = vpack.c.bf16 %v660_v45, %v652_v44  ;;  %v293_v43 = vld [vmem:[#allocation7 + $0x450] sm:$0xff]  ;;  %v302_v44 = vld [vmem:[#allocation7 + $0x498] sm:$0xff] }
 0x106   :  { %v310_v45 = vld [vmem:[#allocation7 + $0x4d8] sm:$0xff] }
 0x107   :  { %2734 = vmatpush1.bf16.msra.mxu0 %v2733_v54  ;;  %1011 = vmatmul.mubr.f32.gmra.mrb[2].mxu1 %v153_v39  ;;  %v157_v54 = vld [vmem:[#allocation7 + $0x10] sm:$0xff] }
 0x108   :  { %2736 = vmatprep.subr.bf16.mxu0 %v2735_v12  ;;  %1235 = vmatprep.mubr.f32.mxu1 %v4073_v41  ;;  %v182_v12 = vld [vmem:[#allocation7 + $0xd8] sm:$0xff]  ;;  %v2765_v57 = vpack.c.bf16 %v165_v55, %v157_v54  ;;  %v317_v54 = vld [vmem:[#allocation7 + $0x510] sm:$0xff] }
 0x109   :  { %v2767_v58 = vpack.c.bf16 %v182_v12, %v174_v56  ;;  %v325_v55 = vld [vmem:[#allocation7 + $0x550] sm:$0xff]  ;;  %v334_v56 = vld [vmem:[#allocation7 + $0x598] sm:$0xff] }
 0x10a   :  { %v342_v12 = vld [vmem:[#allocation7 + $0x5d8] sm:$0xff] }
 0x10b   :  { %2738 = vmatpush1.bf16.msra.mxu0 %v2737_v1  ;;  %v189_v1 = vld [vmem:[#allocation7 + $0x110] sm:$0xff] }
 0x10c   :  { %2740 = vmatprep.subr.bf16.mxu0 %v2739_v4  ;;  %v214_v4 = vld [vmem:[#allocation7 + $0x1d8] sm:$0xff]  ;;  %v2773_v5 = vpack.c.bf16 %v197_v2, %v189_v1  ;;  %v349_v1 = vld [vmem:[#allocation7 + $0x610] sm:$0xff] }
 0x10d   :  { %v2775_v6 = vpack.c.bf16 %v214_v4, %v206_v3  ;;  %v357_v2 = vld [vmem:[#allocation7 + $0x650] sm:$0xff]  ;;  %v366_v3 = vld [vmem:[#allocation7 + $0x698] sm:$0xff] }
 0x10e   :  { %v374_v4 = vld [vmem:[#allocation7 + $0x6d8] sm:$0xff] }
 0x10f   :  { %2742 = vmatpush1.bf16.msra.mxu0 %v2741_v15  ;;  %v221_v15 = vld [vmem:[#allocation7 + $0x210] sm:$0xff] }
 0x110   :  { %2744 = vmatprep.subr.bf16.mxu0 %v2743_v16  ;;  %v229_v16 = vld [vmem:[#allocation7 + $0x250] sm:$0xff] }
 0x111   :  { %v2781_v19 = vpack.c.bf16 %v229_v16, %v221_v15  ;;  %v381_v15 = vld [vmem:[#allocation7 + $0x710] sm:$0xff] }
 0x112   :  { %v389_v16 = vld [vmem:[#allocation7 + $0x750] sm:$0xff] }
 0x113   :  { %2746 = vmatpush1.bf16.msra.mxu0 %v2745_v23  ;;  %v245_v23 = vld [vmem:[#allocation7 + $0x2d0] sm:$0xff] }
 0x114   :  { %2748 = vmatprep.subr.bf16.mxu0 %v2747_v24  ;;  %v254_v24 = vld [vmem:[#allocation7 + $0x318] sm:$0xff]  ;;  %v2785_v26 = vpack.c.bf16 %v245_v23, %v237_v22  ;;  %v397_v22 = vld [vmem:[#allocation7 + $0x790] sm:$0xff] }
 0x115   :  { %v2787_v27 = vpack.c.bf16 %v262_v25, %v254_v24  ;;  %v405_v23 = vld [vmem:[#allocation7 + $0x7d0] sm:$0xff]  ;;  %v160_v25 = vld [vmem:[#allocation7 + $0x28] sm:$0xff] }
 0x116   :  { %v2825_v24 = vpack.c.bf16 %v405_v23, %v397_v22  ;;  %v242_v22 = vld [vmem:[#allocation7 + $0x2b8] sm:$0xff] }
 0x117   :  { %2750 = vmatpush1.bf16.msra.mxu0 %v2749_v30  ;;  %v261_v30 = vld [vmem:[#allocation7 + $0x350] sm:$0xff]  ;;  %v250_v23 = vld [vmem:[#allocation7 + $0x2f8] sm:$0xff] }
 0x118   :  { %2752 = vmatprep.subr.bf16.mxu0 %v2751_v32  ;;  %v278_v32 = vld [vmem:[#allocation7 + $0x3d8] sm:$0xff]  ;;  %v2789_v33 = vpack.c.bf16 %v261_v30, %v253_v28  ;;  %v167_v30 = vld [vmem:[#allocation7 + $0x60] sm:$0xff] }
 0x11b   :  { %2754 = vmatpush1.bf16.msra.mxu0 %v2753_v38  ;;  %v294_v38 = vld [vmem:[#allocation7 + $0x458] sm:$0xff] }
 0x11c   :  { %2756 = vmatprep.subr.bf16.mxu0 %v2755_v40  ;;  %v2795_v40 = vpack.c.bf16 %v294_v38, %v286_v37  ;;  %v161_v37 = vld [vmem:[#allocation7 + $0x30] sm:$0xff] }
 0x11d   :  { %v169_v38 = vld [vmem:[#allocation7 + $0x70] sm:$0xff] }
 0x11f   :  { %2758 = vmatpush1.bf16.msra.mxu0 %v2757_v46  ;;  %v2797_v46 = vpack.c.bf16 %v293_v43, %v285_v42  ;;  %v186_v42 = vld [vmem:[#allocation7 + $0xf8] sm:$0xff]  ;;  %v192_v43 = vld [vmem:[#allocation7 + $0x128] sm:$0xff] }
 0x120   :  { %2760 = vmatprep.subr.bf16.mxu0 %v2759_v47  ;;  %v2799_v47 = vpack.c.bf16 %v310_v45, %v302_v44  ;;  %v200_v45 = vld [vmem:[#allocation7 + $0x168] sm:$0xff] }
 0x123   :  { %2762 = vmatpush1.bf16.msra.mxu0 %v2761_v52  ;;  %v2801_v52 = vpack.c.bf16 %v309_v49, %v301_v48  ;;  %v2899_v48 = vpack.c.bf16 %v200_v45, %v192_v43  ;;  %v282_v45 = vld [vmem:[#allocation7 + $0x3f8] sm:$0xff] }
 0x124   :  { %2764 = vmatprep.subr.bf16.mxu0 %v2763_v53  ;;  %v2803_v53 = vpack.c.bf16 %v326_v51, %v318_v50  ;;  %v191_v50 = vld [vmem:[#allocation7 + $0x120] sm:$0xff] }
 0x125   :  { %v199_v51 = vld [vmem:[#allocation7 + $0x160] sm:$0xff] }
 0x126   :  { %851 = vmatmul.mubr.f32.vlgmr.msra.gmra.mrb[0].mxu0 %v149_v31  ;;  %v270_v31 = vld [vmem:[#allocation7 + $0x398] sm:$0xff] }
 0x127   :  { %2766 = vmatpush1.bf16.msra.mxu0 %v2765_v57  ;;  %856 = vmatprep.mubr.f32.mxu0 %v154_v35  ;;  %v2791_v34 = vpack.c.bf16 %v278_v32, %v270_v31  ;;  %v269_v35 = vld [vmem:[#allocation7 + $0x390] sm:$0xff]  ;;  %v2805_v57 = vpack.c.bf16 %v325_v55, %v317_v54  ;;  %v162_v31 = vld [vmem:[#allocation7 + $0x38] sm:$0xff]  ;;  %v208_v54 = vld [vmem:[#allocation7 + $0x1a8] sm:$0xff] }
 0x128   :  { %2768 = vmatprep.subr.bf16.mxu0 %v2767_v58  ;;  %v2807_v58 = vpack.c.bf16 %v342_v12, %v334_v56  ;;  %v170_v32 = vld [vmem:[#allocation7 + $0x78] sm:$0xff]  ;;  %v216_v55 = vld [vmem:[#allocation7 + $0x1e8] sm:$0xff]  ;;  %v2901_v56 = vpack.c.bf16 %v199_v51, %v191_v50 }
 0x129   :  { %v288_v50 = vld [vmem:[#allocation7 + $0x428] sm:$0xff] }
 0x12a   :  { %857 = vmatmul.mubr.f32.gmra.mrb[2].mxu0 %v153_v39  ;;  %v2793_v39 = vpack.c.bf16 %v277_v36, %v269_v35  ;;  %v176_v35 = vld [vmem:[#allocation7 + $0xa8] sm:$0xff] }
 0x12b   :  { %2770 = vmatpush1.bf16.msra.mxu0 %v2769_v63  ;;  %927 = vmatprep.mubr.f32.mxu0 %v4073_v41  ;;  %v2809_v63 = vpack.c.bf16 %v341_v60, %v333_v59  ;;  %v184_v36 = vld [vmem:[#allocation7 + $0xe8] sm:$0xff]  ;;  %v207_v59 = vld [vmem:[#allocation7 + $0x1a0] sm:$0xff]  ;;  %v2903_v60 = vpack.c.bf16 %v216_v55, %v208_v54  ;;  %v281_v54 = vld [vmem:[#allocation7 + $0x3f0] sm:$0xff] }
 0x12c   :  { %2772 = vmatprep.subr.bf16.mxu0 %v2771_v0  ;;  %v2811_v0 = vpack.c.bf16 %v358_v62, %v350_v61  ;;  %v215_v61 = vld [vmem:[#allocation7 + $0x1e0] sm:$0xff]  ;;  %v210_v62 = vld [vmem:[#allocation7 + $0x1b8] sm:$0xff]  ;;  %v296_v51 = vld [vmem:[#allocation7 + $0x468] sm:$0xff] }
 0x12f   :  { %2774 = vmatpush1.bf16.msra.mxu0 %v2773_v5  ;;  %v2813_v5 = vpack.c.bf16 %v357_v2, %v349_v1  ;;  %v224_v1 = vld [vmem:[#allocation7 + $0x228] sm:$0xff] }
 0x130   :  { %2776 = vmatprep.subr.bf16.mxu0 %v2775_v6  ;;  %v2815_v6 = vpack.c.bf16 %v374_v4, %v366_v3  ;;  %v232_v2 = vld [vmem:[#allocation7 + $0x268] sm:$0xff]  ;;  %v209_v4 = vld [vmem:[#allocation7 + $0x1b0] sm:$0xff] }
 0x133   :  { %2778 = vmatpush1.bf16.msra.mxu0 %v2777_v11  ;;  %v2817_v11 = vpack.c.bf16 %v373_v8, %v365_v7  ;;  %v226_v7 = vld [vmem:[#allocation7 + $0x238] sm:$0xff] }
 0x134   :  { %2780 = vmatprep.subr.bf16.mxu0 %v2779_v13  ;;  %v2819_v13 = vpack.c.bf16 %v390_v10, %v382_v9  ;;  %v234_v8 = vld [vmem:[#allocation7 + $0x278] sm:$0xff]  ;;  %v2907_v9 = vpack.c.bf16 %v232_v2, %v224_v1  ;;  %v223_v10 = vld [vmem:[#allocation7 + $0x220] sm:$0xff]  ;;  %v297_v1 = vld [vmem:[#allocation7 + $0x470] sm:$0xff] }
 0x137   :  { %2782 = vmatpush1.bf16.msra.mxu0 %v2781_v19  ;;  %v2821_v19 = vpack.c.bf16 %v389_v16, %v381_v15  ;;  %v240_v15 = vld [vmem:[#allocation7 + $0x2a8] sm:$0xff] }
 0x138   :  { %2784 = vmatprep.subr.bf16.mxu0 %v2783_v20  ;;  %v2823_v20 = vpack.c.bf16 %v406_v18, %v398_v17  ;;  %v248_v16 = vld [vmem:[#allocation7 + $0x2e8] sm:$0xff]  ;;  %v3035_v17 = vpack.c.bf16 %v234_v8, %v226_v7  ;;  %v225_v18 = vld [vmem:[#allocation7 + $0x230] sm:$0xff]  ;;  %v311_v7 = vld [vmem:[#allocation7 + $0x4e0] sm:$0xff] }
 0x13b   :  { %2786 = vmatpush1.bf16.msra.mxu0 %v2785_v26  ;;  %v168_v26 = vld [vmem:[#allocation7 + $0x68] sm:$0xff] }
 0x13c   :  { %2788 = vmatprep.subr.bf16.mxu0 %v2787_v27  ;;  %v159_v27 = vld [vmem:[#allocation7 + $0x20] sm:$0xff]  ;;  %v2891_v28 = vpack.c.bf16 %v168_v26, %v160_v25 }
 0x13d   :  { %v239_v25 = vld [vmem:[#allocation7 + $0x2a0] sm:$0xff] }
 0x13e   :  { %v247_v26 = vld [vmem:[#allocation7 + $0x2e0] sm:$0xff] }
 0x13f   :  { %2790 = vmatpush1.bf16.msra.mxu0 %v2789_v33  ;;  %v2893_v33 = vpack.c.bf16 %v167_v30, %v159_v27  ;;  %v264_v30 = vld [vmem:[#allocation7 + $0x368] sm:$0xff] }
 0x140   :  { %2792 = vmatprep.subr.bf16.mxu0 %v2791_v34  ;;  %v3019_v34 = vpack.c.bf16 %v170_v32, %v162_v31  ;;  %v3039_v31 = vpack.c.bf16 %v250_v23, %v242_v22  ;;  %v241_v32 = vld [vmem:[#allocation7 + $0x2b0] sm:$0xff]  ;;  %v322_v23 = vld [vmem:[#allocation7 + $0x538] sm:$0xff] }
 0x142   :  { %3020 = vmatprep.subr.bf16.mxu1 %v3019_v34  ;;  %v2913_v34 = vpack.c.bf16 %v247_v26, %v239_v25  ;;  %v336_v26 = vld [vmem:[#allocation7 + $0x5a8] sm:$0xff] }
 0x143   :  { %2794 = vmatpush1.bf16.msra.mxu0 %v2793_v39  ;;  %v183_v39 = vld [vmem:[#allocation7 + $0xe0] sm:$0xff] }
 0x144   :  { %2796 = vmatprep.subr.bf16.mxu0 %v2795_v40  ;;  %v178_v40 = vld [vmem:[#allocation7 + $0xb8] sm:$0xff] }
 0x145   :  { %v3023_v44 = vpack.c.bf16 %v186_v42, %v178_v40  ;;  %v257_v40 = vld [vmem:[#allocation7 + $0x330] sm:$0xff] }
 0x146   :  { %v265_v42 = vld [vmem:[#allocation7 + $0x370] sm:$0xff] }
 0x147   :  { %2798 = vmatpush1.bf16.msra.mxu0 %v2797_v46  ;;  %v177_v46 = vld [vmem:[#allocation7 + $0xb0] sm:$0xff] }
 0x148   :  { %2800 = vmatprep.subr.bf16.mxu0 %v2799_v47  ;;  %v185_v47 = vld [vmem:[#allocation7 + $0xf0] sm:$0xff] }
 0x149   :  { %v3025_v49 = vpack.c.bf16 %v185_v47, %v177_v46  ;;  %v271_v47 = vld [vmem:[#allocation7 + $0x3a0] sm:$0xff] }
 0x14b   :  { %2802 = vmatpush1.bf16.msra.mxu0 %v2801_v52  ;;  %v194_v52 = vld [vmem:[#allocation7 + $0x138] sm:$0xff] }
 0x14c   :  { %2804 = vmatprep.subr.bf16.mxu0 %v2803_v53  ;;  %v202_v53 = vld [vmem:[#allocation7 + $0x178] sm:$0xff] }
 0x14d   :  { %v3027_v12 = vpack.c.bf16 %v202_v53, %v194_v52  ;;  %v273_v53 = vld [vmem:[#allocation7 + $0x3b0] sm:$0xff] }
 0x14f   :  { %2806 = vmatpush1.bf16.msra.mxu0 %v2805_v57  ;;  %v193_v57 = vld [vmem:[#allocation7 + $0x130] sm:$0xff] }
 0x150   :  { %2808 = vmatprep.subr.bf16.mxu0 %v2807_v58  ;;  %v201_v58 = vld [vmem:[#allocation7 + $0x170] sm:$0xff] }
 0x153   :  { %2810 = vmatpush1.bf16.msra.mxu0 %v2809_v63  ;;  %v218_v63 = vld [vmem:[#allocation7 + $0x1f8] sm:$0xff] }
 0x154   :  { %2812 = vmatprep.subr.bf16.mxu0 %v2811_v0  ;;  %v3029_v0 = vpack.c.bf16 %v201_v58, %v193_v57  ;;  %v3031_v3 = vpack.c.bf16 %v218_v63, %v210_v62  ;;  %v2923_v57 = vpack.c.bf16 %v296_v51, %v288_v50  ;;  %v287_v58 = vld [vmem:[#allocation7 + $0x420] sm:$0xff]  ;;  %v312_v62 = vld [vmem:[#allocation7 + $0x4e8] sm:$0xff]  ;;  %v353_v50 = vld [vmem:[#allocation7 + $0x630] sm:$0xff] }
 0x157   :  { %2814 = vmatpush1.bf16.msra.mxu0 %v2813_v5  ;;  %v217_v5 = vld [vmem:[#allocation7 + $0x1f0] sm:$0xff] }
 0x158   :  { %2816 = vmatprep.subr.bf16.mxu0 %v2815_v6  ;;  %v2905_v6 = vpack.c.bf16 %v215_v61, %v207_v59  ;;  %v295_v59 = vld [vmem:[#allocation7 + $0x460] sm:$0xff]  ;;  %v304_v61 = vld [vmem:[#allocation7 + $0x4a8] sm:$0xff] }
 0x159   :  { %v2925_v2 = vpack.c.bf16 %v295_v59, %v287_v58  ;;  %v384_v59 = vld [vmem:[#allocation7 + $0x728] sm:$0xff] }
 0x15b   :  { %2818 = vmatpush1.bf16.msra.mxu0 %v2817_v11  ;;  %v231_v11 = vld [vmem:[#allocation7 + $0x260] sm:$0xff] }
 0x15c   :  { %2820 = vmatprep.subr.bf16.mxu0 %v2819_v13  ;;  %v3033_v13 = vpack.c.bf16 %v217_v5, %v209_v4  ;;  %v314_v4 = vld [vmem:[#allocation7 + $0x4f8] sm:$0xff]  ;;  %v2927_v5 = vpack.c.bf16 %v312_v62, %v304_v61  ;;  %v369_v61 = vld [vmem:[#allocation7 + $0x6b0] sm:$0xff] }
 0x15f   :  { %2822 = vmatpush1.bf16.msra.mxu0 %v2821_v19  ;;  %v233_v19 = vld [vmem:[#allocation7 + $0x270] sm:$0xff] }
 0x160   :  { %2824 = vmatprep.subr.bf16.mxu0 %v2823_v20  ;;  %v2909_v20 = vpack.c.bf16 %v231_v11, %v223_v10  ;;  %v3037_v27 = vpack.c.bf16 %v233_v19, %v225_v18  ;;  %v328_v10 = vld [vmem:[#allocation7 + $0x568] sm:$0xff]  ;;  %v319_v18 = vld [vmem:[#allocation7 + $0x520] sm:$0xff] }
 0x161   :  { %v327_v19 = vld [vmem:[#allocation7 + $0x560] sm:$0xff] }
 0x162   :  { %v2933_v22 = vpack.c.bf16 %v327_v19, %v319_v18  ;;  %v402_v18 = vld [vmem:[#allocation7 + $0x7b8] sm:$0xff] }
 0x163   :  { %2826 = vmatpush1.bf16.msra.mxu0 %v2825_v24  ;;  %v2911_v24 = vpack.c.bf16 %v248_v16, %v240_v15  ;;  %v313_v15 = vld [vmem:[#allocation7 + $0x4f0] sm:$0xff]  ;;  %v410_v19 = vld [vmem:[#allocation7 + $0x7f8] sm:$0xff] }
 0x164   :  { %2892 = vmatprep.subr.bf16.mxu0 %v2891_v28  ;;  %v256_v28 = vld [vmem:[#allocation7 + $0x328] sm:$0xff] }
 0x166   :  { %928 = vmatmul.mubr.f32.vlgmr.msra.gmra.mrb[4].mxu0 %v4079_v14  ;;  %v2895_v14 = vpack.c.bf16 %v184_v36, %v176_v35  ;;  %v258_v35 = vld [vmem:[#allocation7 + $0x338] sm:$0xff] }
 0x167   :  { %933 = vmatprep.mubr.f32.mxu0 %v4081_v21  ;;  %v175_v21 = vld [vmem:[#allocation7 + $0xa0] sm:$0xff]  ;;  %2894 = vmatpush1.bf16.msra.mxu0 %v2893_v33  ;;  %v249_v33 = vld [vmem:[#allocation7 + $0x2f0] sm:$0xff]  ;;  %v266_v36 = vld [vmem:[#allocation7 + $0x378] sm:$0xff] }
 0x168   :  { %2896 = vmatprep.subr.bf16.mxu0 %v2895_v14  ;;  %v255_v14 = vld [vmem:[#allocation7 + $0x320] sm:$0xff] }
 0x16a   :  { %934 = vmatmul.mubr.f32.gmra.mrb[6].mxu0 %v4085_v29  ;;  %v2897_v29 = vpack.c.bf16 %v183_v39, %v175_v21  ;;  %v3041_v21 = vpack.c.bf16 %v249_v33, %v241_v32  ;;  %v272_v39 = vld [vmem:[#allocation7 + $0x3a8] sm:$0xff]  ;;  %v335_v32 = vld [vmem:[#allocation7 + $0x5a0] sm:$0xff] }
 0x16b   :  { %1081 = vmatprep.mubr.f32.mxu0 %v4073_v41  ;;  %v3021_v41 = vpack.c.bf16 %v169_v38, %v161_v37  ;;  %v2915_v37 = vpack.c.bf16 %v264_v30, %v256_v28  ;;  %v263_v38 = vld [vmem:[#allocation7 + $0x360] sm:$0xff]  ;;  %v321_v28 = vld [vmem:[#allocation7 + $0x530] sm:$0xff] }
 0x16c   :  { %2898 = vmatpush1.bf16.msra.mxu0 %v2897_v29  ;;  %v3043_v29 = vpack.c.bf16 %v266_v36, %v258_v35  ;;  %v2917_v43 = vpack.c.bf16 %v263_v38, %v255_v14  ;;  %v343_v33 = vld [vmem:[#allocation7 + $0x5e0] sm:$0xff]  ;;  %v338_v36 = vld [vmem:[#allocation7 + $0x5b8] sm:$0xff]  ;;  %v352_v38 = vld [vmem:[#allocation7 + $0x628] sm:$0xff] }
 0x16d   :  { %3022 = vmatpush1.bf16.msra.mxu1 %v3021_v41  ;;  %2900 = vmatprep.subr.bf16.mxu0 %v2899_v48  ;;  %v280_v41 = vld [vmem:[#allocation7 + $0x3e8] sm:$0xff]  ;;  %v279_v48 = vld [vmem:[#allocation7 + $0x3e0] sm:$0xff]  ;;  %v2937_v35 = vpack.c.bf16 %v343_v33, %v335_v32  ;;  %v418_v32 = vld [vmem:[#allocation7 + $0x838] sm:$0xff] }
 0x16e   :  { %3024 = vmatprep.subr.bf16.mxu1 %v3023_v44  ;;  %v274_v44 = vld [vmem:[#allocation7 + $0x3b8] sm:$0xff]  ;;  %v2919_v46 = vpack.c.bf16 %v280_v41, %v272_v39  ;;  %v2921_v55 = vpack.c.bf16 %v279_v48, %v271_v47  ;;  %v337_v39 = vld [vmem:[#allocation7 + $0x5b0] sm:$0xff]  ;;  %v368_v48 = vld [vmem:[#allocation7 + $0x6a8] sm:$0xff] }
 0x16f   :  { %v3047_v52 = vpack.c.bf16 %v282_v45, %v274_v44  ;;  %v354_v45 = vld [vmem:[#allocation7 + $0x638] sm:$0xff] }
 0x170   :  { %2902 = vmatpush1.bf16.msra.mxu0 %v2901_v56  ;;  %v290_v56 = vld [vmem:[#allocation7 + $0x438] sm:$0xff] }
 0x171   :  { %3026 = vmatpush1.bf16.msra.mxu1 %v3025_v49  ;;  %2904 = vmatprep.subr.bf16.mxu0 %v2903_v60  ;;  %v3045_v49 = vpack.c.bf16 %v265_v42, %v257_v40  ;;  %v3049_v60 = vpack.c.bf16 %v281_v54, %v273_v53  ;;  %v351_v40 = vld [vmem:[#allocation7 + $0x620] sm:$0xff]  ;;  %v426_v33 = vld [vmem:[#allocation7 + $0x878] sm:$0xff] }
 0x172   :  { %3028 = vmatprep.subr.bf16.mxu1 %v3027_v12  ;;  %v298_v12 = vld [vmem:[#allocation7 + $0x478] sm:$0xff]  ;;  %v359_v42 = vld [vmem:[#allocation7 + $0x660] sm:$0xff] }
 0x173   :  { %v3051_v63 = vpack.c.bf16 %v298_v12, %v290_v56  ;;  %v2941_v44 = vpack.c.bf16 %v359_v42, %v351_v40  ;;  %v367_v53 = vld [vmem:[#allocation7 + $0x6a0] sm:$0xff]  ;;  %v370_v12 = vld [vmem:[#allocation7 + $0x6b8] sm:$0xff] }
 0x174   :  { %2906 = vmatpush1.bf16.msra.mxu0 %v2905_v6  ;;  %v303_v6 = vld [vmem:[#allocation7 + $0x4a0] sm:$0xff]  ;;  %v434_v40 = vld [vmem:[#allocation7 + $0x8b8] sm:$0xff] }
 0x175   :  { %3030 = vmatpush1.bf16.msra.mxu1 %v3029_v0  ;;  %2908 = vmatprep.subr.bf16.mxu0 %v2907_v9  ;;  %v289_v0 = vld [vmem:[#allocation7 + $0x430] sm:$0xff]  ;;  %v320_v9 = vld [vmem:[#allocation7 + $0x528] sm:$0xff]  ;;  %v2929_v16 = vpack.c.bf16 %v311_v7, %v303_v6  ;;  %v375_v54 = vld [vmem:[#allocation7 + $0x6e0] sm:$0xff] }
 0x176   :  { %3032 = vmatprep.subr.bf16.mxu1 %v3031_v3  ;;  %v306_v3 = vld [vmem:[#allocation7 + $0x4b8] sm:$0xff]  ;;  %v3053_v8 = vpack.c.bf16 %v297_v1, %v289_v0  ;;  %v2945_v56 = vpack.c.bf16 %v375_v54, %v367_v53  ;;  %v383_v0 = vld [vmem:[#allocation7 + $0x720] sm:$0xff]  ;;  %v400_v7 = vld [vmem:[#allocation7 + $0x7a8] sm:$0xff] }
 0x177   :  { %v3055_v11 = vpack.c.bf16 %v314_v4, %v306_v3  ;;  %v391_v1 = vld [vmem:[#allocation7 + $0x760] sm:$0xff]  ;;  %v386_v4 = vld [vmem:[#allocation7 + $0x738] sm:$0xff] }
 0x178   :  { %2910 = vmatpush1.bf16.msra.mxu0 %v2909_v20  ;;  %v2949_v3 = vpack.c.bf16 %v391_v1, %v383_v0  ;;  %v450_v53 = vld [vmem:[#allocation7 + $0x938] sm:$0xff]  ;;  %v471_v0 = vld [vmem:[#allocation7 + $0x9e0] sm:$0xff] }
 0x179   :  { %3034 = vmatpush1.bf16.msra.mxu1 %v3033_v13  ;;  %2912 = vmatprep.subr.bf16.mxu0 %v2911_v24  ;;  %v305_v13 = vld [vmem:[#allocation7 + $0x4b0] sm:$0xff]  ;;  %v330_v24 = vld [vmem:[#allocation7 + $0x578] sm:$0xff] }
 0x17a   :  { %3036 = vmatprep.subr.bf16.mxu1 %v3035_v17  ;;  %v2931_v17 = vpack.c.bf16 %v328_v10, %v320_v9  ;;  %v3057_v20 = vpack.c.bf16 %v313_v15, %v305_v13  ;;  %v3059_v25 = vpack.c.bf16 %v330_v24, %v322_v23  ;;  %v385_v9 = vld [vmem:[#allocation7 + $0x730] sm:$0xff]  ;;  %v399_v13 = vld [vmem:[#allocation7 + $0x7a0] sm:$0xff]  ;;  %v424_v23 = vld [vmem:[#allocation7 + $0x868] sm:$0xff] }
 0x17b   :  { %v407_v15 = vld [vmem:[#allocation7 + $0x7e0] sm:$0xff]  ;;  %v401_v24 = vld [vmem:[#allocation7 + $0x7b0] sm:$0xff]  ;;  %v458_v54 = vld [vmem:[#allocation7 + $0x978] sm:$0xff] }
 0x17c   :  { %2914 = vmatpush1.bf16.msra.mxu0 %v2913_v34  ;;  %v466_v1 = vld [vmem:[#allocation7 + $0x9b8] sm:$0xff] }
 0x17d   :  { %3038 = vmatpush1.bf16.msra.mxu1 %v3037_v27  ;;  %2916 = vmatprep.subr.bf16.mxu0 %v2915_v37  ;;  %v344_v27 = vld [vmem:[#allocation7 + $0x5e8] sm:$0xff]  ;;  %v346_v37 = vld [vmem:[#allocation7 + $0x5f8] sm:$0xff] }
 0x17e   :  { %3040 = vmatprep.subr.bf16.mxu1 %v3039_v31  ;;  %v2935_v30 = vpack.c.bf16 %v344_v27, %v336_v26  ;;  %v329_v31 = vld [vmem:[#allocation7 + $0x570] sm:$0xff]  ;;  %v3063_v14 = vpack.c.bf16 %v346_v37, %v338_v36  ;;  %v415_v27 = vld [vmem:[#allocation7 + $0x820] sm:$0xff]  ;;  %v3083_v36 = vpack.c.bf16 %v426_v33, %v418_v32  ;;  %v440_v37 = vld [vmem:[#allocation7 + $0x8e8] sm:$0xff] }
 0x17f   :  { %v3061_v34 = vpack.c.bf16 %v329_v31, %v321_v28  ;;  %v409_v26 = vld [vmem:[#allocation7 + $0x7f0] sm:$0xff]  ;;  %v423_v28 = vld [vmem:[#allocation7 + $0x860] sm:$0xff]  ;;  %v512_v32 = vld [vmem:[#allocation7 + $0xb28] sm:$0xff] }
 0x180   :  { %2918 = vmatpush1.bf16.msra.mxu0 %v2917_v43  ;;  %v2957_v31 = vpack.c.bf16 %v423_v28, %v415_v27  ;;  %v495_v27 = vld [vmem:[#allocation7 + $0xaa0] sm:$0xff]  ;;  %v520_v33 = vld [vmem:[#allocation7 + $0xb68] sm:$0xff] }
 0x181   :  { %3042 = vmatpush1.bf16.msra.mxu1 %v3041_v21  ;;  %2920 = vmatprep.subr.bf16.mxu0 %v2919_v46  ;;  %v360_v21 = vld [vmem:[#allocation7 + $0x668] sm:$0xff]  ;;  %v362_v46 = vld [vmem:[#allocation7 + $0x678] sm:$0xff]  ;;  %v503_v28 = vld [vmem:[#allocation7 + $0xae0] sm:$0xff] }
 0x182   :  { %3044 = vmatprep.subr.bf16.mxu1 %v3043_v29  ;;  %v2939_v41 = vpack.c.bf16 %v360_v21, %v352_v38  ;;  %v345_v29 = vld [vmem:[#allocation7 + $0x5f0] sm:$0xff]  ;;  %v3067_v47 = vpack.c.bf16 %v362_v46, %v354_v45  ;;  %v456_v45 = vld [vmem:[#allocation7 + $0x968] sm:$0xff]  ;;  %v3634_v46 = vld [vmem:[#allocation2 + $0x28] sm:$0xff] }
 0x183   :  { %v3065_v43 = vpack.c.bf16 %v345_v29, %v337_v39  ;;  %v425_v38 = vld [vmem:[#allocation7 + $0x870] sm:$0xff]  ;;  %v439_v29 = vld [vmem:[#allocation7 + $0x8e0] sm:$0xff] }
 0x184   :  { %2922 = vmatpush1.bf16.msra.mxu0 %v2921_v55 }
 0x185   :  { %3046 = vmatpush1.bf16.msra.mxu1 %v3045_v49  ;;  %2924 = vmatprep.subr.bf16.mxu0 %v2923_v57  ;;  %v376_v49 = vld [vmem:[#allocation7 + $0x6e8] sm:$0xff]  ;;  %v378_v57 = vld [vmem:[#allocation7 + $0x6f8] sm:$0xff] }
 0x186   :  { %3048 = vmatprep.subr.bf16.mxu1 %v3047_v52  ;;  %v2943_v51 = vpack.c.bf16 %v376_v49, %v368_v48  ;;  %v361_v52 = vld [vmem:[#allocation7 + $0x670] sm:$0xff]  ;;  %v3071_v58 = vpack.c.bf16 %v378_v57, %v370_v12  ;;  %v464_v57 = vld [vmem:[#allocation7 + $0x9a8] sm:$0xff] }
 0x187   :  { %v3069_v55 = vpack.c.bf16 %v361_v52, %v353_v50  ;;  %v433_v49 = vld [vmem:[#allocation7 + $0x8b0] sm:$0xff]  ;;  %v455_v52 = vld [vmem:[#allocation7 + $0x960] sm:$0xff] }
 0x188   :  { %2926 = vmatpush1.bf16.msra.mxu0 %v2925_v2  ;;  %v441_v50 = vld [vmem:[#allocation7 + $0x8f0] sm:$0xff] }
 0x189   :  { %3050 = vmatpush1.bf16.msra.mxu1 %v3049_v60  ;;  %2928 = vmatprep.subr.bf16.mxu0 %v2927_v5  ;;  %v392_v60 = vld [vmem:[#allocation7 + $0x768] sm:$0xff]  ;;  %v394_v5 = vld [vmem:[#allocation7 + $0x778] sm:$0xff] }
 0x18a   :  { %3052 = vmatprep.subr.bf16.mxu1 %v3051_v63  ;;  %v2947_v62 = vpack.c.bf16 %v392_v60, %v384_v59  ;;  %v377_v63 = vld [vmem:[#allocation7 + $0x6f0] sm:$0xff]  ;;  %v3075_v6 = vpack.c.bf16 %v394_v5, %v386_v4  ;;  %v3091_v60 = vpack.c.bf16 %v458_v54, %v450_v53  ;;  %v3636_v4 = vld [vmem:[#allocation2 + $0x18] sm:$0xff] }
 0x18b   :  { %v3073_v2 = vpack.c.bf16 %v377_v63, %v369_v61  ;;  %v449_v59 = vld [vmem:[#allocation7 + $0x930] sm:$0xff]  ;;  %v463_v63 = vld [vmem:[#allocation7 + $0x9a0] sm:$0xff]  ;;  %v488_v5 = vld [vmem:[#allocation7 + $0xa68] sm:$0xff] }
 0x18c   :  { %2930 = vmatpush1.bf16.msra.mxu0 %v2929_v16  ;;  %v544_v53 = vld [vmem:[#allocation7 + $0xc28] sm:$0xff] }
 0x18d   :  { %3054 = vmatpush1.bf16.msra.mxu1 %v3053_v8  ;;  %2932 = vmatprep.subr.bf16.mxu0 %v2931_v17  ;;  %v408_v8 = vld [vmem:[#allocation7 + $0x7e8] sm:$0xff]  ;;  %v2953_v17 = vpack.c.bf16 %v407_v15, %v399_v13  ;;  %v479_v13 = vld [vmem:[#allocation7 + $0xa20] sm:$0xff] }
 0x18e   :  { %3056 = vmatprep.subr.bf16.mxu1 %v3055_v11  ;;  %v2951_v10 = vpack.c.bf16 %v408_v8, %v400_v7  ;;  %v393_v11 = vld [vmem:[#allocation7 + $0x770] sm:$0xff]  ;;  %v2969_v7 = vpack.c.bf16 %v471_v0, %v463_v63  ;;  %v487_v15 = vld [vmem:[#allocation7 + $0xa60] sm:$0xff]  ;;  %v552_v54 = vld [vmem:[#allocation7 + $0xc68] sm:$0xff] }
 0x18f   :  { %v3077_v16 = vpack.c.bf16 %v393_v11, %v385_v9  ;;  %v465_v8 = vld [vmem:[#allocation7 + $0x9b0] sm:$0xff]  ;;  %v554_v63 = vld [vmem:[#allocation7 + $0xc78] sm:$0xff]  ;;  %v560_v0 = vld [vmem:[#allocation7 + $0xca8] sm:$0xff] }
 0x190   :  { %2934 = vmatpush1.bf16.msra.mxu0 %v2933_v22  ;;  %v416_v22 = vld [vmem:[#allocation7 + $0x828] sm:$0xff]  ;;  %v473_v9 = vld [vmem:[#allocation7 + $0x9f0] sm:$0xff] }
 0x191   :  { %3058 = vmatpush1.bf16.msra.mxu1 %v3057_v20  ;;  %2936 = vmatprep.subr.bf16.mxu0 %v2935_v30  ;;  %v3079_v20 = vpack.c.bf16 %v410_v19, %v402_v18  ;;  %v3081_v30 = vpack.c.bf16 %v409_v26, %v401_v24  ;;  %v496_v18 = vld [vmem:[#allocation7 + $0xaa8] sm:$0xff]  ;;  %v489_v24 = vld [vmem:[#allocation7 + $0xa70] sm:$0xff] }
 0x192   :  { %3060 = vmatprep.subr.bf16.mxu1 %v3059_v25  ;;  %v2955_v25 = vpack.c.bf16 %v424_v23, %v416_v22  ;;  %v504_v19 = vld [vmem:[#allocation7 + $0xae8] sm:$0xff]  ;;  %v2973_v22 = vpack.c.bf16 %v487_v15, %v479_v13  ;;  %v481_v23 = vld [vmem:[#allocation7 + $0xa30] sm:$0xff]  ;;  %v562_v13 = vld [vmem:[#allocation7 + $0xcb8] sm:$0xff] }
 0x193   :  { %v2975_v26 = vpack.c.bf16 %v504_v19, %v496_v18  ;;  %v570_v15 = vld [vmem:[#allocation7 + $0xcf8] sm:$0xff] }
 0x194   :  { %2938 = vmatpush1.bf16.msra.mxu0 %v2937_v35  ;;  %v3633_v35 = vld [vmem:[#allocation2] sm:$0xff] }
 0x195   :  { %3062 = vmatpush1.bf16.msra.mxu1 %v3061_v34  ;;  %2940 = vmatprep.subr.bf16.mxu0 %v2939_v41  ;;  %v432_v34 = vld [vmem:[#allocation7 + $0x8a8] sm:$0xff]  ;;  %v431_v41 = vld [vmem:[#allocation7 + $0x8a0] sm:$0xff] }
 0x196   :  { %3064 = vmatprep.subr.bf16.mxu1 %v3063_v14  ;;  %v417_v14 = vld [vmem:[#allocation7 + $0x830] sm:$0xff]  ;;  %v2959_v21 = vpack.c.bf16 %v440_v37, %v432_v34  ;;  %v2961_v42 = vpack.c.bf16 %v439_v29, %v431_v41  ;;  %v3101_v34 = vpack.c.bf16 %v489_v24, %v481_v23  ;;  %v514_v41 = vld [vmem:[#allocation7 + $0xb38] sm:$0xff] }
 0x197   :  { %v3085_v39 = vpack.c.bf16 %v425_v38, %v417_v14  ;;  %v505_v37 = vld [vmem:[#allocation7 + $0xaf0] sm:$0xff]  ;;  %v2979_v38 = vpack.c.bf16 %v520_v33, %v512_v32  ;;  %v522_v29 = vld [vmem:[#allocation7 + $0xb78] sm:$0xff]  ;;  %v592_v32 = vld [vmem:[#allocation7 + $0xda8] sm:$0xff] }
 0x198   :  { %2942 = vmatpush1.bf16.msra.mxu0 %v2941_v44  ;;  %v448_v44 = vld [vmem:[#allocation7 + $0x928] sm:$0xff]  ;;  %v569_v23 = vld [vmem:[#allocation7 + $0xcf0] sm:$0xff] }
 0x199   :  { %3066 = vmatpush1.bf16.msra.mxu1 %v3065_v43  ;;  %2944 = vmatprep.subr.bf16.mxu0 %v2943_v51  ;;  %v442_v43 = vld [vmem:[#allocation7 + $0x8f8] sm:$0xff]  ;;  %v2963_v48 = vpack.c.bf16 %v456_v45, %v448_v44  ;;  %v447_v51 = vld [vmem:[#allocation7 + $0x920] sm:$0xff]  ;;  %v513_v45 = vld [vmem:[#allocation7 + $0xb30] sm:$0xff] }
 0x19a   :  { %3068 = vmatprep.subr.bf16.mxu1 %v3067_v47  ;;  %v3087_v47 = vpack.c.bf16 %v442_v43, %v434_v40  ;;  %v2965_v12 = vpack.c.bf16 %v455_v52, %v447_v51  ;;  %v528_v40 = vld [vmem:[#allocation7 + $0xba8] sm:$0xff]  ;;  %v530_v51 = vld [vmem:[#allocation7 + $0xbb8] sm:$0xff] }
 0x19b   :  { %v538_v52 = vld [vmem:[#allocation7 + $0xbf8] sm:$0xff]  ;;  %v600_v33 = vld [vmem:[#allocation7 + $0xde8] sm:$0xff] }
 0x19c   :  { %2946 = vmatpush1.bf16.msra.mxu0 %v2945_v56  ;;  %v3089_v56 = vpack.c.bf16 %v441_v50, %v433_v49  ;;  %v527_v49 = vld [vmem:[#allocation7 + $0xba0] sm:$0xff] }
 0x19d   :  { %3070 = vmatpush1.bf16.msra.mxu1 %v3069_v55  ;;  %2948 = vmatprep.subr.bf16.mxu0 %v2947_v62  ;;  %v3635_v55 = vld [vmem:[#allocation2 + $0x20] sm:$0xff]  ;;  %v535_v50 = vld [vmem:[#allocation7 + $0xbe0] sm:$0xff] }
 0x19e   :  { %3072 = vmatprep.subr.bf16.mxu1 %v3071_v58  ;;  %v472_v58 = vld [vmem:[#allocation7 + $0x9e8] sm:$0xff]  ;;  %v457_v62 = vld [vmem:[#allocation7 + $0x970] sm:$0xff] }
 0x19f   :  { %v2967_v61 = vpack.c.bf16 %v472_v58, %v464_v57  ;;  %v537_v57 = vld [vmem:[#allocation7 + $0xbf0] sm:$0xff]  ;;  %v3111_v58 = vpack.c.bf16 %v538_v52, %v530_v51  ;;  %v610_v51 = vld [vmem:[#allocation7 + $0xe38] sm:$0xff] }
 0x1a0   :  { %2950 = vmatpush1.bf16.msra.mxu0 %v2949_v3  ;;  %v480_v3 = vld [vmem:[#allocation7 + $0xa28] sm:$0xff]  ;;  %v618_v52 = vld [vmem:[#allocation7 + $0xe78] sm:$0xff] }
 0x1a1   :  { %3074 = vmatpush1.bf16.msra.mxu1 %v3073_v2  ;;  %2952 = vmatprep.subr.bf16.mxu0 %v2951_v10  ;;  %v474_v2 = vld [vmem:[#allocation7 + $0x9f8] sm:$0xff]  ;;  %v2971_v11 = vpack.c.bf16 %v488_v5, %v480_v3  ;;  %v545_v5 = vld [vmem:[#allocation7 + $0xc30] sm:$0xff] }
 0x1a2   :  { %3076 = vmatprep.subr.bf16.mxu1 %v3075_v6  ;;  %v3093_v6 = vpack.c.bf16 %v457_v62, %v449_v59  ;;  %v3095_v10 = vpack.c.bf16 %v474_v2, %v466_v1  ;;  %v2987_v59 = vpack.c.bf16 %v552_v54, %v544_v53  ;;  %v546_v62 = vld [vmem:[#allocation7 + $0xc38] sm:$0xff]  ;;  %v568_v1 = vld [vmem:[#allocation7 + $0xce8] sm:$0xff] }
 0x1a3   :  { %v624_v53 = vld [vmem:[#allocation7 + $0xea8] sm:$0xff] }
 0x1a4   :  { %2954 = vmatpush1.bf16.msra.mxu0 %v2953_v17  ;;  %v490_v17 = vld [vmem:[#allocation7 + $0xa78] sm:$0xff]  ;;  %v632_v54 = vld [vmem:[#allocation7 + $0xee8] sm:$0xff] }
 0x1a5   :  { %3078 = vmatpush1.bf16.msra.mxu1 %v3077_v16  ;;  %2956 = vmatprep.subr.bf16.mxu0 %v2955_v25  ;;  %v482_v16 = vld [vmem:[#allocation7 + $0xa38] sm:$0xff] }
 0x1a6   :  { %3080 = vmatprep.subr.bf16.mxu1 %v3079_v20  ;;  %v3097_v20 = vpack.c.bf16 %v473_v9, %v465_v8  ;;  %v3099_v25 = vpack.c.bf16 %v490_v17, %v482_v16  ;;  %v3115_v8 = vpack.c.bf16 %v554_v63, %v546_v62  ;;  %v2991_v9 = vpack.c.bf16 %v568_v1, %v560_v0  ;;  %v576_v16 = vld [vmem:[#allocation7 + $0xd28] sm:$0xff]  ;;  %v626_v62 = vld [vmem:[#allocation7 + $0xeb8] sm:$0xff] }
 0x1a7   :  { %1082 = vmatmul.mubr.f32.vlgmr.msra.gmra.mrb[8].mxu0 %v3633_v35  ;;  %v584_v17 = vld [vmem:[#allocation7 + $0xd68] sm:$0xff]  ;;  %v634_v0 = vld [vmem:[#allocation7 + $0xef8] sm:$0xff] }
 0x1a8   :  { %2958 = vmatpush1.bf16.msra.mxu0 %v2957_v31  ;;  %1087 = vmatprep.mubr.f32.mxu0 %v3634_v46  ;;  %v506_v31 = vld [vmem:[#allocation7 + $0xaf8] sm:$0xff]  ;;  %v640_v1 = vld [vmem:[#allocation7 + $0xf28] sm:$0xff] }
 0x1a9   :  { %3082 = vmatpush1.bf16.msra.mxu1 %v3081_v30  ;;  %2960 = vmatprep.subr.bf16.mxu0 %v2959_v21  ;;  %v498_v30 = vld [vmem:[#allocation7 + $0xab8] sm:$0xff]  ;;  %v511_v21 = vld [vmem:[#allocation7 + $0xb20] sm:$0xff] }
 0x1aa   :  { %3084 = vmatprep.subr.bf16.mxu1 %v3083_v36  ;;  %v497_v36 = vld [vmem:[#allocation7 + $0xab0] sm:$0xff]  ;;  %v3103_v14 = vpack.c.bf16 %v506_v31, %v498_v30  ;;  %v578_v30 = vld [vmem:[#allocation7 + $0xd38] sm:$0xff] }
 0x1ab   :  { %1088 = vmatmul.mubr.f32.gmra.mrb[10].mxu0 %v3635_v55  ;;  %v3105_v43 = vpack.c.bf16 %v505_v37, %v497_v36  ;;  %v586_v31 = vld [vmem:[#allocation7 + $0xd78] sm:$0xff]  ;;  %v577_v36 = vld [vmem:[#allocation7 + $0xd30] sm:$0xff] }
 0x1ac   :  { %1236 = vmatmul.mubr.f32.vlgmr.msra.gmra.mrb[4].mxu1 %v3633_v35  ;;  %2962 = vmatpush1.bf16.msra.mxu0 %v2961_v42  ;;  %v2977_v35 = vpack.c.bf16 %v503_v28, %v495_v27  ;;  %v536_v42 = vld [vmem:[#allocation7 + $0xbe8] sm:$0xff]  ;;  %v575_v27 = vld [vmem:[#allocation7 + $0xd20] sm:$0xff]  ;;  %v585_v37 = vld [vmem:[#allocation7 + $0xd70] sm:$0xff] }
 0x1ad   :  { %3086 = vmatpush1.bf16.msra.mxu1 %v3085_v39  ;;  %2964 = vmatprep.subr.bf16.mxu0 %v2963_v48  ;;  %v519_v39 = vld [vmem:[#allocation7 + $0xb60] sm:$0xff]  ;;  %v2983_v48 = vpack.c.bf16 %v536_v42, %v528_v40  ;;  %v608_v40 = vld [vmem:[#allocation7 + $0xe28] sm:$0xff] }
 0x1ae   :  { %3088 = vmatprep.subr.bf16.mxu1 %v3087_v47  ;;  %1241 = vmatprep.mubr.f32.mxu1 %v3634_v46  ;;  %v2981_v44 = vpack.c.bf16 %v519_v39, %v511_v21  ;;  %v521_v46 = vld [vmem:[#allocation7 + $0xb70] sm:$0xff]  ;;  %v3107_v47 = vpack.c.bf16 %v522_v29, %v514_v41  ;;  %v583_v28 = vld [vmem:[#allocation7 + $0xd60] sm:$0xff]  ;;  %v594_v41 = vld [vmem:[#allocation7 + $0xdb8] sm:$0xff] }
 0x1af   :  { %1158 = vmatprep.mubr.f32.mxu0 %v3636_v4  ;;  %v591_v21 = vld [vmem:[#allocation7 + $0xda0] sm:$0xff]  ;;  %v602_v29 = vld [vmem:[#allocation7 + $0xdf8] sm:$0xff]  ;;  %v616_v42 = vld [vmem:[#allocation7 + $0xe68] sm:$0xff] }
 0x1b0   :  { %1242 = vmatmul.mubr.f32.gmra.mrb[6].mxu1 %v3635_v55  ;;  %2966 = vmatpush1.bf16.msra.mxu0 %v2965_v12  ;;  %v3109_v55 = vpack.c.bf16 %v521_v46, %v513_v45  ;;  %v529_v12 = vld [vmem:[#allocation7 + $0xbb0] sm:$0xff]  ;;  %v599_v39 = vld [vmem:[#allocation7 + $0xde0] sm:$0xff] }
 0x1b1   :  { %3090 = vmatpush1.bf16.msra.mxu1 %v3089_v56  ;;  %2968 = vmatprep.subr.bf16.mxu0 %v2967_v61  ;;  %v2985_v56 = vpack.c.bf16 %v535_v50, %v527_v49  ;;  %v551_v61 = vld [vmem:[#allocation7 + $0xc60] sm:$0xff]  ;;  %v3113_v3 = vpack.c.bf16 %v537_v57, %v529_v12  ;;  %v593_v45 = vld [vmem:[#allocation7 + $0xdb0] sm:$0xff] }
 0x1b2   :  { %3092 = vmatprep.subr.bf16.mxu1 %v3091_v60  ;;  %1312 = vmatprep.mubr.f32.mxu1 %v3636_v4  ;;  %v543_v60 = vld [vmem:[#allocation7 + $0xc20] sm:$0xff]  ;;  %v601_v46 = vld [vmem:[#allocation7 + $0xdf0] sm:$0xff] }
 0x1b3   :  { %v2989_v4 = vpack.c.bf16 %v551_v61, %v543_v60  ;;  %v607_v49 = vld [vmem:[#allocation7 + $0xe20] sm:$0xff]  ;;  %v609_v12 = vld [vmem:[#allocation7 + $0xe30] sm:$0xff] }
 0x1b4   :  { %2970 = vmatpush1.bf16.msra.mxu0 %v2969_v7  ;;  %v615_v50 = vld [vmem:[#allocation7 + $0xe60] sm:$0xff]  ;;  %v617_v57 = vld [vmem:[#allocation7 + $0xe70] sm:$0xff] }
 0x1b5   :  { %3094 = vmatpush1.bf16.msra.mxu1 %v3093_v6  ;;  %2972 = vmatprep.subr.bf16.mxu0 %v2971_v11  ;;  %v553_v6 = vld [vmem:[#allocation7 + $0xc70] sm:$0xff]  ;;  %v567_v11 = vld [vmem:[#allocation7 + $0xce0] sm:$0xff] }
 0x1b6   :  { %3096 = vmatprep.subr.bf16.mxu1 %v3095_v10  ;;  %v559_v10 = vld [vmem:[#allocation7 + $0xca0] sm:$0xff]  ;;  %v3117_v19 = vpack.c.bf16 %v553_v6, %v545_v5  ;;  %v3133_v5 = vpack.c.bf16 %v617_v57, %v609_v12 }
 0x1b7   :  { %v623_v60 = vld [vmem:[#allocation7 + $0xea0] sm:$0xff] }
 0x1b8   :  { %2974 = vmatpush1.bf16.msra.mxu0 %v2973_v22  ;;  %v561_v22 = vld [vmem:[#allocation7 + $0xcb0] sm:$0xff]  ;;  %v631_v61 = vld [vmem:[#allocation7 + $0xee0] sm:$0xff] }
 0x1b9   :  { %3098 = vmatpush1.bf16.msra.mxu1 %v3097_v20  ;;  %2976 = vmatprep.subr.bf16.mxu0 %v2975_v26  ;;  %v2993_v20 = vpack.c.bf16 %v567_v11, %v559_v10  ;;  %v2995_v26 = vpack.c.bf16 %v584_v17, %v576_v16  ;;  %v3009_v6 = vpack.c.bf16 %v631_v61, %v623_v60  ;;  %v642_v16 = vld [vmem:[#allocation7 + $0xf38] sm:$0xff] }
 0x1ba   :  { %3100 = vmatprep.subr.bf16.mxu1 %v3099_v25  ;;  %v3119_v25 = vpack.c.bf16 %v570_v15, %v562_v13  ;;  %v3135_v10 = vpack.c.bf16 %v634_v0, %v626_v62  ;;  %v639_v13 = vld [vmem:[#allocation7 + $0xf20] sm:$0xff] }
 0x1bb   :  { %v647_v15 = vld [vmem:[#allocation7 + $0xf60] sm:$0xff] }
 0x1bc   :  { %2978 = vmatpush1.bf16.msra.mxu0 %v2977_v35  ;;  %v2997_v35 = vpack.c.bf16 %v583_v28, %v575_v27  ;;  %v641_v27 = vld [vmem:[#allocation7 + $0xf30] sm:$0xff] }
 0x1bd   :  { %3102 = vmatpush1.bf16.msra.mxu1 %v3101_v34  ;;  %2980 = vmatprep.subr.bf16.mxu0 %v2979_v38  ;;  %v3121_v34 = vpack.c.bf16 %v569_v23, %v561_v22  ;;  %v2999_v38 = vpack.c.bf16 %v600_v33, %v592_v32  ;;  %v664_v22 = vld [vmem:[#allocation7 + $0xfe8] sm:$0xff]  ;;  %v655_v32 = vld [vmem:[#allocation7 + $0xfa0] sm:$0xff] }
 0x1be   :  { %3104 = vmatprep.subr.bf16.mxu1 %v3103_v14  ;;  %v3123_v14 = vpack.c.bf16 %v586_v31, %v578_v30  ;;  %v649_v31 = vld [vmem:[#allocation7 + $0xf70] sm:$0xff]  ;;  %v663_v33 = vld [vmem:[#allocation7 + $0xfe0] sm:$0xff] }
 0x1c0   :  { %2982 = vmatpush1.bf16.msra.mxu0 %v2981_v44  ;;  %v3001_v44 = vpack.c.bf16 %v599_v39, %v591_v21  ;;  %v665_v21 = vld [vmem:[#allocation7 + $0xff0] sm:$0xff] }
 0x1c1   :  { %3106 = vmatpush1.bf16.msra.mxu1 %v3105_v43  ;;  %2984 = vmatprep.subr.bf16.mxu0 %v2983_v48  ;;  %v3125_v43 = vpack.c.bf16 %v585_v37, %v577_v36  ;;  %v3003_v48 = vpack.c.bf16 %v616_v42, %v608_v40  ;;  %v3141_v36 = vpack.c.bf16 %v649_v31, %v641_v27  ;;  %v3639_v40 = vld [vmem:[#allocation2 + $0x30] sm:$0xff]  ;;  %v669_v42 = vlaneseq }
 0x1c2   :  { %3108 = vmatprep.subr.bf16.mxu1 %v3107_v47  ;;  %v3127_v47 = vpack.c.bf16 %v602_v29, %v594_v41  ;;  %v3017_v37 = vpack.c.bf16 %v663_v33, %v655_v32  ;;  %v3637_v41 = vld [vmem:[#allocation2 + $0x10] sm:$0xff]  ;;  %v3638_v29 = vld [vmem:[#allocation2 + $0x38] sm:$0xff] }
 0x1c4   :  { %2986 = vmatpush1.bf16.msra.mxu0 %v2985_v56  ;;  %v3005_v56 = vpack.c.bf16 %v615_v50, %v607_v49 }
 0x1c5   :  { %3110 = vmatpush1.bf16.msra.mxu1 %v3109_v55  ;;  %2988 = vmatprep.subr.bf16.mxu0 %v2987_v59  ;;  %v3129_v55 = vpack.c.bf16 %v601_v46, %v593_v45  ;;  %v3007_v59 = vpack.c.bf16 %v632_v54, %v624_v53  ;;  %v4115_v46 = vld [vmem:[#allocation8] sm:$0xff] }
 0x1c6   :  { %3112 = vmatprep.subr.bf16.mxu1 %v3111_v58  ;;  %v3131_v58 = vpack.c.bf16 %v618_v52, %v610_v51 }
 0x1c8   :  { %2990 = vmatpush1.bf16.msra.mxu0 %v2989_v4 }
 0x1c9   :  { %3114 = vmatpush1.bf16.msra.mxu1 %v3113_v3  ;;  %2992 = vmatprep.subr.bf16.mxu0 %v2991_v9  ;;  %v648_v3 = vld [vmem:[#allocation7 + $0xf68] sm:$0xff]  ;;  %v633_v9 = vld [vmem:[#allocation7 + $0xef0] sm:$0xff] }
 0x1ca   :  { %3116 = vmatprep.subr.bf16.mxu1 %v3115_v8  ;;  %v625_v8 = vld [vmem:[#allocation7 + $0xeb0] sm:$0xff]  ;;  %v3011_v11 = vpack.c.bf16 %v648_v3, %v640_v1 }
 0x1cc   :  { %2994 = vmatpush1.bf16.msra.mxu0 %v2993_v20  ;;  %v656_v20 = vld [vmem:[#allocation7 + $0xfa8] sm:$0xff] }
 0x1cd   :  { %3118 = vmatpush1.bf16.msra.mxu1 %v3117_v19  ;;  %2996 = vmatprep.subr.bf16.mxu0 %v2995_v26  ;;  %v650_v19 = vld [vmem:[#allocation7 + $0xf78] sm:$0xff]  ;;  %v3013_v26 = vpack.c.bf16 %v647_v15, %v639_v13  ;;  %v3015_v30 = vpack.c.bf16 %v664_v22, %v656_v20 }
 0x1ce   :  { %3120 = vmatprep.subr.bf16.mxu1 %v3119_v25  ;;  %v3137_v25 = vpack.c.bf16 %v633_v9, %v625_v8  ;;  %v3139_v28 = vpack.c.bf16 %v650_v19, %v642_v16 }
 0x1d0   :  { %2998 = vmatpush1.bf16.msra.mxu0 %v2997_v35  ;;  %v666_v35 = vld [vmem:[#allocation7 + $0xff8] sm:$0xff] }
 0x1d1   :  { %3122 = vmatpush1.bf16.msra.mxu1 %v3121_v34  ;;  %3000 = vmatprep.subr.bf16.mxu0 %v2999_v38  ;;  %v658_v34 = vld [vmem:[#allocation7 + $0xfb8] sm:$0xff]  ;;  %v657_v38 = vld [vmem:[#allocation7 + $0xfb0] sm:$0xff] }
 0x1d2   :  { %3124 = vmatprep.subr.bf16.mxu1 %v3123_v14  ;;  %v3143_v14 = vpack.c.bf16 %v666_v35, %v658_v34  ;;  %v3145_v39 = vpack.c.bf16 %v665_v21, %v657_v38 }
 0x1d4   :  { %3002 = vmatpush1.bf16.msra.mxu0 %v3001_v44 }
 0x1d5   :  { %3126 = vmatpush1.bf16.msra.mxu1 %v3125_v43  ;;  %3004 = vmatprep.subr.bf16.mxu0 %v3003_v48  ;;  %v4107_v43 = vshrl.u32 %v669_v42, 7 }
 0x1d6   :  { %v4095_v2 = vpop.f32.mrb[0].mxu1  ;;  %3128 = vmatprep.subr.bf16.mxu1 %v3127_v47 }
 0x1d7   :  { %v4097_v7 = vpop.f32.mrb[1].mxu1  ;;  %v4110_v44 = vsub.s32 0, %v4107_v43  ;;  %v4113_v45 = vsub.s32 1, %v4107_v43  ;;  %v4122_v49 = vsub.s32 2, %v4107_v43  ;;  %v4125_v50 = vsub.s32 3, %v4107_v43 }
 0x1d8   :  { %3006 = vmatpush1.bf16.msra.mxu0 %v3005_v56  ;;  %v687_v27 = vsub.s32 4, %v4107_v43  ;;  %v699_v32 = vsub.s32 7, %v4107_v43 }
 0x1d9   :  { %3130 = vmatpush1.bf16.msra.mxu1 %v3129_v55  ;;  %3008 = vmatprep.subr.bf16.mxu0 %v3007_v59  ;;  %v672_v47 = vrot.slane %v4115_v46, %v4110_v44  ;;  %v676_v48 = vrot.slane %v4115_v46, %v4113_v45  ;;  %v680_v53 = vrot.slane %v4115_v46, %v4122_v49 }
 0x1da   :  { %v4099_v18 = vpop.f32.mrb[2].mxu1  ;;  %3132 = vmatprep.subr.bf16.mxu1 %v3131_v58  ;;  %v684_v54 = vrot.slane %v4115_v46, %v4125_v50 }
 0x1db   :  { %v4101_v24 = vpop.f32.mrb[3].mxu1 }
 0x1dc   :  { %3010 = vmatpush1.bf16.msra.mxu0 %v3009_v6 }
 0x1dd   :  { %3134 = vmatpush1.bf16.msra.mxu1 %v3133_v5  ;;  %3012 = vmatprep.subr.bf16.mxu0 %v3011_v11 }
 0x1de   :  { %3136 = vmatprep.subr.bf16.mxu1 %v3135_v10 }
 0x1e0   :  { %3014 = vmatpush1.bf16.msra.mxu0 %v3013_v26 }
 0x1e1   :  { %3138 = vmatpush1.bf16.msra.mxu1 %v3137_v25  ;;  %3016 = vmatprep.subr.bf16.mxu0 %v3015_v30  ;;  %v695_v30 = vsub.s32 6, %v4107_v43 }
 0x1e2   :  { %3140 = vmatprep.subr.bf16.mxu1 %v3139_v28  ;;  %v1385_v28 = vld [vmem:[#allocation10] sm:$0xf] }
 0x1e3   :  { %v1390_v33 = vrot.slane %v1385_v28, %v4110_v44  ;;  %v1394_v34 = vrot.slane %v1385_v28, %v4113_v45  ;;  %v696_v21 = vrot.slane %v4115_v46, %v695_v30 }
 0x1e4   :  { %3018 = vmatpush1.bf16.msra.mxu0 %v3017_v37  ;;  %v1398_v37 = vrot.slane %v1385_v28, %v4122_v49 }
 0x1e5   :  { %3142 = vmatpush1.bf16.msra.mxu1 %v3141_v36 }
 0x1e6   :  { %3144 = vmatprep.subr.bf16.mxu1 %v3143_v14 }
 0x1e7   :  { %1159 = vmatmul.mubr.f32.vlgmr.msra.gmra.mrb[8].mxu0 %v3637_v41 }
 0x1e8   :  { %1164 = vmatprep.mubr.f32.mxu0 %v3638_v29 }
 0x1e9   :  { %3146 = vmatpush1.bf16.msra.mxu1 %v3145_v39 }
 0x1eb   :  { %1165 = vmatmul.mubr.f32.gmra.mrb[10].mxu0 %v3639_v40 }
 0x1ec   :  { %1313 = vmatmul.mubr.f32.vlgmr.msra.gmra.mrb[4].mxu1 %v3637_v41 }
 0x1ed   :  { %1318 = vmatprep.mubr.f32.mxu1 %v3638_v29 }
 0x1f0   :  { %1319 = vmatmul.mubr.f32.gmra.mrb[6].mxu1 %v3639_v40  ;;  %v1402_v40 = vrot.slane %v1385_v28, %v4125_v50 }
 0x1f9   :  { %v4103_v63 = vpop.f32.mrb[0].mxu0 }
 0x1fa   :  { %v4105_v4 = vpop.f32.mrb[1].mxu0  ;;  %v3543_v51 = vadd.f32 %v4103_v63, %v672_v47 }
 0x1fb   :  { %v3544_v52 = vadd.f32 %v4105_v4, %v676_v48 }
 0x1fc   :  { %v1325_v55 = vmul.f32 %v3543_v51, %v3543_v51 }
 0x1fd   :  { %v858_v17 = vpop.f32.mrb[2].mxu0  ;;  %v1326_v56 = vmul.f32 %v3544_v52, %v3544_v52 }
 0x1fe   :  { %v860_v23 = vpop.f32.mrb[3].mxu0  ;;  %v4133_v57 = vadd.f32 %v858_v17, %v672_v47 }
 0x1ff   :  { %v4135_v58 = vadd.f32 %v860_v23, %v676_v48  ;;  %v1333_v1 = vadd.f32 %v1326_v56, %v1325_v55  ;;  %v700_v48 = vrot.slane %v4115_v46, %v699_v32 }
 0x200   :  { %v1329_v3 = vmul.f32 %v4133_v57, %v4133_v57 }
 0x201   :  { %v1330_v4 = vmul.f32 %v4135_v58, %v4135_v58 }
 0x203   :  { %v1338_v15 = vadd.f32 %v1330_v4, %v1329_v3 }
 0x239   :  { %v929_v12 = vpop.f32.mrb[4].mxu0 }
 0x23a   :  { %v930_v59 = vadd.f32 %v929_v12, %v680_v53  ;;  %v931_v60 = vpop.f32.mrb[5].mxu0 }
 0x23b   :  { %v932_v61 = vadd.f32 %v931_v60, %v684_v54 }
 0x23c   :  { %v1007_v62 = vadd.f32 %v4095_v2, %v930_v59 }
 0x23d   :  { %v1009_v63 = vadd.f32 %v4097_v7, %v932_v61  ;;  %v935_v0 = vpop.f32.mrb[6].mxu0 }
 0x23e   :  { %v1327_v5 = vmul.f32 %v1007_v62, %v1007_v62  ;;  %v936_v6 = vadd.f32 %v935_v0, %v680_v53  ;;  %v937_v8 = vpop.f32.mrb[7].mxu0 }
 0x23f   :  { %v938_v9 = vadd.f32 %v937_v8, %v684_v54  ;;  %v1328_v10 = vmul.f32 %v1009_v63, %v1009_v63 }
 0x240   :  { %v1013_v11 = vadd.f32 %v4099_v18, %v936_v6  ;;  %v1334_v13 = vadd.f32 %v1333_v1, %v1327_v5  ;;  %v691_v18 = vsub.s32 5, %v4107_v43 }
 0x241   :  { %v1015_v2 = vadd.f32 %v4101_v24, %v938_v9  ;;  %v688_v24 = vrot.slane %v4115_v46, %v687_v27 }
 0x242   :  { %v1331_v7 = vmul.f32 %v1013_v11, %v1013_v11  ;;  %v1335_v16 = vadd.f32 %v1334_v13, %v1328_v10  ;;  %v692_v31 = vrot.slane %v4115_v46, %v691_v18 }
 0x243   :  { %v1332_v17 = vmul.f32 %v1015_v2, %v1015_v2 }
 0x244   :  { %1336 = vadd.xlane.f32.xlu0 %v1335_v16  ;;  %v1339_v19 = vadd.f32 %v1338_v15, %v1331_v7  ;;  %v1427_v16 = vld [vmem:[#allocation5] sm:$0xff] }
 0x245   :  { %2632 = vmatprep.mubr.msk.f32.mxu0 %vm1431_vm0, %v1427_v16 }
 0x246   :  { %v1340_v20 = vadd.f32 %v1339_v19, %v1332_v17 }
 0x248   :  { %1341 = vadd.xlane.f32.xlu0 %v1340_v20 }
 0x2ba   :  { %v1160_v35 = vpop.f32.mrb[8].mxu0 }
 0x2bb   :  { %v4154_v14 = vadd.f32 %v1160_v35, %v688_v24  ;;  %v1162_v38 = vpop.f32.mrb[9].mxu0 }
 0x2bc   :  { %v4168_v47 = vadd.f32 %v1162_v38, %v692_v31 }
 0x2bd   :  { %v1355_v43 = vmul.f32 %v4154_v14, %v4154_v14 }
 0x2be   :  { %v1356_v56 = vmul.f32 %v4168_v47, %v4168_v47  ;;  %v1166_v17 = vpop.f32.mrb[10].mxu0 }
 0x2bf   :  { %v1314_v54 = vpop.f32.mrb[4].mxu1  ;;  %v4200_v20 = vadd.f32 %v1166_v17, %v688_v24  ;;  %v1711_v17 = vld [vmem:[#allocation11 + $0x30] sm:$0xff] }
 0x2c0   :  { %v4176_v12 = vadd.f32 %v1314_v54, %v696_v21  ;;  %v1316_v59 = vpop.f32.mrb[5].mxu1  ;;  %v1363_v0 = vadd.f32 %v1356_v56, %v1355_v43 }
 0x2c1   :  { %v4189_v3 = vadd.f32 %v1316_v59, %v700_v48  ;;  %v1359_v28 = vmul.f32 %v4200_v20, %v4200_v20 }
 0x2c2   :  { %v1357_v1 = vmul.f32 %v4176_v12, %v4176_v12 }
 0x2c3   :  { %v1320_v19 = vpop.f32.mrb[6].mxu1 }
 0x2c4   :  { %v1364_v8 = vadd.f32 %v1363_v0, %v1357_v1  ;;  %v1428_v0 = vld [vmem:[#allocation5 + $0x8] sm:$0xff] }
 0x2d1   :  { %v1337_v22 = vpop.xlane.xlu0 %1336 }
 0x2d2   :  { %v1343_v23 = vmax.f32 %v1337_v22, 1e-24  ;;  %v1168_v22 = vpop.f32.mrb[11].mxu0 }
 0x2d3   :  { %v4204_v27 = vadd.f32 %v1168_v22, %v692_v31  ;;  %v1718_v22 = vld [vmem:[#allocation11 + $0x68] sm:$0xff] }
 0x2d4   :  { %3621 = vrsqrt.f32 %v1343_v23  ;;  %v4202_v23 = vadd.f32 %v1320_v19, %v696_v21 }
 0x2d5   :  { %v1342_v25 = vpop.xlane.xlu0 %1341  ;;  %v1360_v30 = vmul.f32 %v4204_v27, %v4204_v27 }
 0x2d6   :  { %v1344_v26 = vmax.f32 %v1342_v25, 1e-24  ;;  %v1322_v25 = vpop.f32.mrb[7].mxu1  ;;  %v1361_v24 = vmul.f32 %v4202_v23, %v4202_v23 }
 0x2d7   :  { %v4206_v18 = vadd.f32 %v1322_v25, %v700_v48  ;;  %v1368_v32 = vadd.f32 %v1360_v30, %v1359_v28  ;;  %v1716_v25 = vld [vmem:[#allocation11 + $0x58] sm:$0xff] }
 0x2d8   :  { %3623 = vrsqrt.f32 %v1344_v26  ;;  %v3889_v26 = vmov 0.0  }
 0x2d9   :  { %1585 = vmatprep.mubr.f32.mxu1 %v3889_v26 }
 0x2de   :  { %v3622_v36 = vpop.eup %3621 }
 0x2df   :  { %v4157_v39 = vmul.f32 %v3622_v36, %v3543_v51  ;;  %v4159_v41 = vmul.f32 %v3622_v36, %v3544_v52  ;;  %v4161_v29 = vmul.f32 %v3622_v36, %v1007_v62  ;;  %v4164_v42 = vmul.f32 %v3622_v36, %v1009_v63 }
 0x2e1   :  { %v1407_v53 = vmul.f32 %v1390_v33, %v4157_v39  ;;  %v1408_v51 = vmul.f32 %v1394_v34, %v4159_v41  ;;  %v1409_v55 = vmul.f32 %v1398_v37, %v4161_v29  ;;  %v1410_v63 = vmul.f32 %v1402_v40, %v4164_v42 }
 0x2e2   :  { %v3624_v52 = vpop.eup %3623 }
 0x2e3   :  { %v1415_v60 = vadd.f32 %v1408_v51, %v1407_v53  ;;  %v4179_v61 = vmul.f32 %v3624_v52, %v4133_v57  ;;  %v4182_v46 = vmul.f32 %v3624_v52, %v4135_v58  ;;  %v4184_v62 = vmul.f32 %v3624_v52, %v1013_v11 }
 0x2e4   :  { %v4191_v5 = vmul.f32 %v3624_v52, %v1015_v2  ;;  %v1358_v58 = vmul.f32 %v4189_v3, %v4189_v3 }
 0x2e5   :  { %v1416_v4 = vadd.f32 %v1415_v60, %v1409_v55  ;;  %v1411_v6 = vmul.f32 %v1390_v33, %v4179_v61  ;;  %v1412_v57 = vmul.f32 %v1394_v34, %v4182_v46  ;;  %v1413_v10 = vmul.f32 %v1398_v37, %v4184_v62 }
 0x2e6   :  { %v1365_v13 = vadd.f32 %v1364_v8, %v1358_v58  ;;  %v1414_v15 = vmul.f32 %v1402_v40, %v4191_v5  ;;  %v1362_v33 = vmul.f32 %v4206_v18, %v4206_v18  ;;  %v1369_v34 = vadd.f32 %v1368_v32, %v1361_v24  ;;  %v1710_v58 = vld [vmem:[#allocation11 + $0x28] sm:$0xff]  ;;  %v1708_v8 = vld [vmem:[#allocation11 + $0x18] sm:$0xff]  ;;  %v1713_v24 = vld [vmem:[#allocation11 + $0x40] sm:$0xff] }
 0x2e7   :  { %v1417_v9 = vadd.f32 %v1416_v4, %v1410_v63  ;;  %v1420_v11 = vadd.f32 %v1412_v57, %v1411_v6  ;;  %v3890_v6 = vmov 0   ;;  %v1706_v57 = vld [vmem:[#allocation11 + $0x8] sm:$0xff]  ;;  %v1717_v32 = vld [vmem:[#allocation11 + $0x60] sm:$0xff] }
 0x2e8   :  { %1366 = vadd.xlane.f32.xlu0 %v1365_v13  ;;  %v1370_v35 = vadd.f32 %v1369_v34, %v1362_v33  ;;  %3619 = vset.pattern.permute.xlu1 %v3890_v6  ;;  %v1709_v13 = vld [vmem:[#allocation11 + $0x20] sm:$0xff]  ;;  %v1715_v33 = vld [vmem:[#allocation11 + $0x50] sm:$0xff]  ;;  %v3165_v34 = vpack.c.bf16 %v1717_v32, %v1713_v24 }
 0x2e9   :  { %1418 = vadd.xlane.f32.xlu1 %v1417_v9  ;;  %v1421_v7 = vadd.f32 %v1420_v11, %v1413_v10  ;;  %3620 = vset.pattern.permute.xlu0 %v3890_v6  ;;  %v3159_v9 = vpack.c.bf16 %v1710_v58, %v1706_v57  ;;  %v1712_v10 = vld [vmem:[#allocation11 + $0x38] sm:$0xff]  ;;  %v1705_v11 = vld [vmem:[#allocation11] sm:$0xff]  ;;  %v1731_v57 = vld [vmem:[#allocation11 + $0xd0] sm:$0xff] }
 0x2ea   :  { %v1735_v58 = vld [vmem:[#allocation11 + $0xf0] sm:$0xff] }
 0x2eb   :  { %v1422_v2 = vadd.f32 %v1421_v7, %v1414_v15  ;;  %v3287_v15 = vpack.c.bf16 %v1712_v10, %v1708_v8  ;;  %v3161_v7 = vpack.c.bf16 %v1709_v13, %v1705_v11  ;;  %v1738_v8 = vld [vmem:[#allocation11 + $0x108] sm:$0xff]  ;;  %v1740_v10 = vld [vmem:[#allocation11 + $0x118] sm:$0xff] }
 0x2ec   :  { %1371 = vadd.xlane.f32.xlu0 %v1370_v35  ;;  %v1719_v35 = vld [vmem:[#allocation11 + $0x70] sm:$0xff]  ;;  %v1744_v11 = vld [vmem:[#allocation11 + $0x138] sm:$0xff] }
 0x2ed   :  { %1423 = vadd.xlane.f32.xlu1 %v1422_v2  ;;  %v1707_v2 = vld [vmem:[#allocation11 + $0x10] sm:$0xff] }
 0x2ee   :  { %v3289_v19 = vpack.c.bf16 %v1711_v17, %v1707_v2  ;;  %v1737_v2 = vld [vmem:[#allocation11 + $0x100] sm:$0xff] }
 0x2ef   :  { %v1741_v17 = vld [vmem:[#allocation11 + $0x120] sm:$0xff] }
 0x2f0   :  { %v3177_v24 = vpack.c.bf16 %v1741_v17, %v1737_v2  ;;  %v1776_v2 = vld [vmem:[#allocation11 + $0x238] sm:$0xff] }
 0x376   :  { %v1419_v31 = vpop.xlane.xlu1 %1418 }
 0x377   :  { %v1425_v36 = vmul.f32 0.0625, %v1419_v31  ;;  %v1722_v31 = vld [vmem:[#allocation11 + $0x88] sm:$0xff] }
 0x379   :  { %v1429_v21 = vmul.f32 %v1425_v36, %v1425_v36  ;;  %v1514_v40 = vmul.f32 %v1425_v36, %v4159_v41  ;;  %v1513_v43 = vmul.f32 %v1425_v36, %v4157_v39  ;;  %v1516_v59 = vmul.f32 %v1425_v36, %v4164_v42 }
 0x37a   :  { %v1424_v37 = vpop.xlane.xlu1 %1423  ;;  %v1515_v1 = vmul.f32 %v1425_v36, %v4161_v29  ;;  %v1726_v36 = vld [vmem:[#allocation11 + $0xa8] sm:$0xff] }
 0x37b   :  { %v1426_v38 = vmul.f32 0.0625, %v1424_v37  ;;  %v3293_v37 = vpack.c.bf16 %v1719_v35, %v1715_v33  ;;  %v1749_v35 = vld [vmem:[#allocation11 + $0x160] sm:$0xff] }
 0x37d   :  { %v1430_v48 = vmul.f32 %v1426_v38, %v1426_v38  ;;  %v1518_v53 = vmul.f32 %v1426_v38, %v4182_v46  ;;  %v1517_v51 = vmul.f32 %v1426_v38, %v4179_v61  ;;  %v1520_v54 = vmul.f32 %v1426_v38, %v4191_v5 }
 0x37e   :  { %v1519_v60 = vmul.f32 %v1426_v38, %v4184_v62  ;;  %v3167_v38 = vpack.c.bf16 %v1726_v36, %v1722_v31  ;;  %v1747_v31 = vld [vmem:[#allocation11 + $0x150] sm:$0xff] }
 0x37f   :  { %v3147_v52 = vpack.c.bf16 %v1430_v48, %v1429_v21  ;;  %v3151_v55 = vpack.c.bf16 %v1518_v53, %v1514_v40  ;;  %v3153_v56 = vpack.c.bf16 %v1517_v51, %v1513_v43  ;;  %v3155_v63 = vpack.c.bf16 %v1520_v54, %v1516_v59  ;;  %v1724_v21 = vld [vmem:[#allocation11 + $0x98] sm:$0xff]  ;;  %v1721_v43 = vld [vmem:[#allocation11 + $0x80] sm:$0xff]  ;;  %v1723_v51 = vld [vmem:[#allocation11 + $0x90] sm:$0xff] }
 0x380   :  { %v3157_v4 = vpack.c.bf16 %v1519_v60, %v1515_v1  ;;  %v1728_v40 = vld [vmem:[#allocation11 + $0xb8] sm:$0xff]  ;;  %v1725_v53 = vld [vmem:[#allocation11 + $0xa0] sm:$0xff]  ;;  %v1727_v54 = vld [vmem:[#allocation11 + $0xb0] sm:$0xff] }
 0x381   :  { %3148 = vmatprep.subr.bf16.mxu0 %v3147_v52  ;;  %3152 = vmatprep.subr.bf16.mxu1 %v3151_v55  ;;  %v3295_v48 = vpack.c.bf16 %v1728_v40, %v1724_v21  ;;  %v1730_v55 = vld [vmem:[#allocation11 + $0xc8] sm:$0xff]  ;;  %v1732_v59 = vld [vmem:[#allocation11 + $0xd8] sm:$0xff]  ;;  %v3297_v60 = vpack.c.bf16 %v1727_v54, %v1723_v51  ;;  %v1729_v1 = vld [vmem:[#allocation11 + $0xc0] sm:$0xff] }
 0x382   :  { %3150 = vmatpush3.bf16.msra.mxu0 %v3147_v52  ;;  %3154 = vmatpush1.bf16.msra.mxu1 %v3153_v56  ;;  %v3169_v52 = vpack.c.bf16 %v1725_v53, %v1721_v43  ;;  %v1734_v56 = vld [vmem:[#allocation11 + $0xe8] sm:$0xff]  ;;  %v1756_v40 = vld [vmem:[#allocation11 + $0x198] sm:$0xff]  ;;  %v1753_v54 = vld [vmem:[#allocation11 + $0x180] sm:$0xff] }
 0x383   :  { %3156 = vmatprep.subr.bf16.mxu0 %v3155_v63  ;;  %3160 = vmatprep.subr.bf16.mxu1 %v3159_v9  ;;  %v3171_v63 = vpack.c.bf16 %v1734_v56, %v1730_v55  ;;  %v1742_v9 = vld [vmem:[#allocation11 + $0x128] sm:$0xff]  ;;  %v1760_v43 = vld [vmem:[#allocation11 + $0x1b8] sm:$0xff]  ;;  %v1755_v55 = vld [vmem:[#allocation11 + $0x190] sm:$0xff] }
 0x384   :  { %v1758_v21 = vld [vmem:[#allocation11 + $0x1a8] sm:$0xff]  ;;  %v3311_v56 = vpack.c.bf16 %v1760_v43, %v1756_v40  ;;  %v1783_v43 = vld [vmem:[#allocation11 + $0x270] sm:$0xff] }
 0x385   :  { %2633 = vmatmul.mubr.msk.f32.vlgmr.msra.gmra.mrb[12].mxu0 %vm1431_vm0, %v1428_v0  ;;  %2620 = vmatmul.mubr.msk.f32.vlgmr.msra.gmra.mrb[8].mxu1 %vm1431_vm0, %v1427_v16 }
 0x386   :  { %3158 = vmatpush1.bf16.msra.mxu0 %v3157_v4  ;;  %1662 = vmatprep.mubr.f32.mxu0 %v3889_v26  ;;  %v1733_v4 = vld [vmem:[#allocation11 + $0xe0] sm:$0xff] }
 0x387   :  { %1591 = vmatprep.mubr.f32.mxu1 %v3889_v26  ;;  %3288 = vmatprep.subr.bf16.mxu0 %v3287_v15  ;;  %v3173_v13 = vpack.c.bf16 %v1733_v4, %v1729_v1  ;;  %v3301_v15 = vpack.c.bf16 %v1735_v58, %v1731_v57  ;;  %v1768_v1 = vld [vmem:[#allocation11 + $0x1f8] sm:$0xff]  ;;  %v1761_v58 = vld [vmem:[#allocation11 + $0x1c0] sm:$0xff] }
 0x388   :  { %3162 = vmatpush1.bf16.msra.mxu1 %v3161_v7  ;;  %v3175_v7 = vpack.c.bf16 %v1742_v9, %v1738_v8  ;;  %v1765_v8 = vld [vmem:[#allocation11 + $0x1e0] sm:$0xff]  ;;  %v1763_v9 = vld [vmem:[#allocation11 + $0x1d0] sm:$0xff] }
 0x389   :  { %2622 = vmatmul.mubr.msk.f32.vlgmr.msra.gmra.mrb[14].mxu0 %vm1431_vm0, %v1427_v16  ;;  %2621 = vmatmul.mubr.msk.f32.gmra.mrb[10].mxu1 %vm1431_vm0, %v1428_v0  ;;  %v1714_v16 = vld [vmem:[#allocation11 + $0x48] sm:$0xff]  ;;  %v3189_v17 = vpack.c.bf16 %v1765_v8, %v1761_v58  ;;  %v1800_v58 = vld [vmem:[#allocation11 + $0x2f8] sm:$0xff] }
 0x38a   :  { %1668 = vmatprep.mubr.f32.mxu0 %v3889_v26  ;;  %v1720_v26 = vld [vmem:[#allocation11 + $0x78] sm:$0xff]  ;;  %v3163_v28 = vpack.c.bf16 %v1718_v22, %v1714_v16  ;;  %3290 = vmatpush1.bf16.msra.mxu0 %v3289_v19  ;;  %v1739_v16 = vld [vmem:[#allocation11 + $0x110] sm:$0xff]  ;;  %v3303_v19 = vpack.c.bf16 %v1744_v11, %v1740_v10 }
 0x38b   :  { %v3291_v30 = vpack.c.bf16 %v1720_v26, %v1716_v25  ;;  %v1743_v22 = vld [vmem:[#allocation11 + $0x130] sm:$0xff]  ;;  %v1746_v25 = vld [vmem:[#allocation11 + $0x148] sm:$0xff] }
 0x38c   :  { %3164 = vmatprep.subr.bf16.mxu1 %v3163_v28  ;;  %v1750_v26 = vld [vmem:[#allocation11 + $0x168] sm:$0xff]  ;;  %v1748_v28 = vld [vmem:[#allocation11 + $0x158] sm:$0xff]  ;;  %v3305_v32 = vpack.c.bf16 %v1743_v22, %v1739_v16  ;;  %v1767_v11 = vld [vmem:[#allocation11 + $0x1f0] sm:$0xff] }
 0x38d   :  { %2623 = vmatmul.mubr.msk.f32.gmra.mrb[16].mxu0 %vm1431_vm0, %v1428_v0  ;;  %3292 = vmatprep.subr.bf16.mxu0 %v3291_v30  ;;  %v1736_v0 = vld [vmem:[#allocation11 + $0xf8] sm:$0xff]  ;;  %v3179_v33 = vpack.c.bf16 %v1750_v26, %v1746_v25  ;;  %v3317_v16 = vpack.c.bf16 %v1767_v11, %v1763_v9  ;;  %v1769_v22 = vld [vmem:[#allocation11 + $0x200] sm:$0xff]  ;;  %v1771_v26 = vld [vmem:[#allocation11 + $0x210] sm:$0xff] }
 0x38e   :  { %3166 = vmatpush1.bf16.msra.mxu1 %v3165_v34  ;;  %3294 = vmatpush1.bf16.msra.mxu0 %v3293_v37  ;;  %v3299_v6 = vpack.c.bf16 %v1736_v0, %v1732_v59  ;;  %v1752_v30 = vld [vmem:[#allocation11 + $0x178] sm:$0xff]  ;;  %v1745_v34 = vld [vmem:[#allocation11 + $0x140] sm:$0xff]  ;;  %v1751_v37 = vld [vmem:[#allocation11 + $0x170] sm:$0xff] }
 0x38f   :  { %3168 = vmatprep.subr.bf16.mxu1 %v3167_v38  ;;  %3296 = vmatprep.subr.bf16.mxu0 %v3295_v48  ;;  %v3307_v36 = vpack.c.bf16 %v1752_v30, %v1748_v28  ;;  %v1754_v38 = vld [vmem:[#allocation11 + $0x188] sm:$0xff]  ;;  %v3181_v48 = vpack.c.bf16 %v1749_v35, %v1745_v34  ;;  %v3309_v53 = vpack.c.bf16 %v1751_v37, %v1747_v31  ;;  %v1759_v59 = vld [vmem:[#allocation11 + $0x1b0] sm:$0xff]  ;;  %v1764_v0 = vld [vmem:[#allocation11 + $0x1d8] sm:$0xff] }
 0x390   :  { %v3183_v51 = vpack.c.bf16 %v1758_v21, %v1754_v38  ;;  %v3315_v10 = vpack.c.bf16 %v1768_v1, %v1764_v0  ;;  %v1773_v25 = vld [vmem:[#allocation11 + $0x220] sm:$0xff]  ;;  %v1775_v30 = vld [vmem:[#allocation11 + $0x230] sm:$0xff]  ;;  %v1784_v34 = vld [vmem:[#allocation11 + $0x278] sm:$0xff] }
 0x391   :  { %v3193_v35 = vpack.c.bf16 %v1773_v25, %v1769_v22  ;;  %v3321_v31 = vpack.c.bf16 %v1775_v30, %v1771_v26  ;;  %v1777_v37 = vld [vmem:[#allocation11 + $0x240] sm:$0xff]  ;;  %v1779_v21 = vld [vmem:[#allocation11 + $0x250] sm:$0xff]  ;;  %v1808_v22 = vld [vmem:[#allocation11 + $0x338] sm:$0xff] }
 0x392   :  { %3170 = vmatpush1.bf16.msra.mxu1 %v3169_v52  ;;  %3298 = vmatpush1.bf16.msra.mxu0 %v3297_v60  ;;  %v1757_v52 = vld [vmem:[#allocation11 + $0x1a0] sm:$0xff]  ;;  %v1762_v60 = vld [vmem:[#allocation11 + $0x1c8] sm:$0xff]  ;;  %v1791_v1 = vld [vmem:[#allocation11 + $0x2b0] sm:$0xff] }
 0x393   :  { %3172 = vmatprep.subr.bf16.mxu1 %v3171_v63  ;;  %3300 = vmatprep.subr.bf16.mxu0 %v3299_v6  ;;  %v1766_v63 = vld [vmem:[#allocation11 + $0x1e8] sm:$0xff]  ;;  %v3185_v4 = vpack.c.bf16 %v1757_v52, %v1753_v54  ;;  %v3313_v6 = vpack.c.bf16 %v1759_v59, %v1755_v55  ;;  %v1781_v38 = vld [vmem:[#allocation11 + $0x260] sm:$0xff]  ;;  %v1792_v54 = vld [vmem:[#allocation11 + $0x2b8] sm:$0xff]  ;;  %v3325_v55 = vpack.c.bf16 %v1783_v43, %v1779_v21 }
 0x394   :  { %v3187_v57 = vpack.c.bf16 %v1766_v63, %v1762_v60  ;;  %v3197_v52 = vpack.c.bf16 %v1781_v38, %v1777_v37  ;;  %v1785_v59 = vld [vmem:[#allocation11 + $0x280] sm:$0xff]  ;;  %v1787_v63 = vld [vmem:[#allocation11 + $0x290] sm:$0xff]  ;;  %v1816_v37 = vld [vmem:[#allocation11 + $0x378] sm:$0xff] }
 0x395   :  { %v1789_v60 = vld [vmem:[#allocation11 + $0x2a0] sm:$0xff]  ;;  %v3329_v9 = vpack.c.bf16 %v1791_v1, %v1787_v63 }
 0x396   :  { %3174 = vmatpush1.bf16.msra.mxu1 %v3173_v13  ;;  %3302 = vmatpush1.bf16.msra.mxu0 %v3301_v15  ;;  %v1770_v13 = vld [vmem:[#allocation11 + $0x208] sm:$0xff]  ;;  %v3201_v8 = vpack.c.bf16 %v1789_v60, %v1785_v59  ;;  %v1793_v11 = vld [vmem:[#allocation11 + $0x2c0] sm:$0xff]  ;;  %v1824_v59 = vld [vmem:[#allocation11 + $0x3b8] sm:$0xff] }
 0x397   :  { %3176 = vmatprep.subr.bf16.mxu1 %v3175_v7  ;;  %3304 = vmatprep.subr.bf16.mxu0 %v3303_v19  ;;  %v1774_v15 = vld [vmem:[#allocation11 + $0x228] sm:$0xff]  ;;  %v1772_v7 = vld [vmem:[#allocation11 + $0x218] sm:$0xff]  ;;  %v1801_v30 = vld [vmem:[#allocation11 + $0x300] sm:$0xff] }
 0x398   :  { %v3191_v19 = vpack.c.bf16 %v1774_v15, %v1770_v13  ;;  %v3319_v28 = vpack.c.bf16 %v1776_v2, %v1772_v7  ;;  %v1797_v13 = vld [vmem:[#allocation11 + $0x2e0] sm:$0xff]  ;;  %v1795_v15 = vld [vmem:[#allocation11 + $0x2d0] sm:$0xff] }
 0x399   :  { %v1799_v2 = vld [vmem:[#allocation11 + $0x2f0] sm:$0xff]  ;;  %v3205_v25 = vpack.c.bf16 %v1797_v13, %v1793_v11  ;;  %v1809_v43 = vld [vmem:[#allocation11 + $0x340] sm:$0xff] }
 0x39a   :  { %3178 = vmatpush1.bf16.msra.mxu1 %v3177_v24  ;;  %3306 = vmatpush1.bf16.msra.mxu0 %v3305_v32  ;;  %v1778_v24 = vld [vmem:[#allocation11 + $0x248] sm:$0xff]  ;;  %v3333_v26 = vpack.c.bf16 %v1799_v2, %v1795_v15  ;;  %v1817_v1 = vld [vmem:[#allocation11 + $0x380] sm:$0xff] }
 0x39b   :  { %3180 = vmatprep.subr.bf16.mxu1 %v3179_v33  ;;  %3308 = vmatprep.subr.bf16.mxu0 %v3307_v36  ;;  %v1782_v32 = vld [vmem:[#allocation11 + $0x268] sm:$0xff]  ;;  %v1780_v33 = vld [vmem:[#allocation11 + $0x258] sm:$0xff] }
 0x39c   :  { %v3195_v36 = vpack.c.bf16 %v1782_v32, %v1778_v24  ;;  %v3323_v40 = vpack.c.bf16 %v1784_v34, %v1780_v33  ;;  %v1805_v24 = vld [vmem:[#allocation11 + $0x320] sm:$0xff]  ;;  %v1803_v32 = vld [vmem:[#allocation11 + $0x310] sm:$0xff] }
 0x39d   :  { %v1807_v34 = vld [vmem:[#allocation11 + $0x330] sm:$0xff]  ;;  %v3209_v38 = vpack.c.bf16 %v1805_v24, %v1801_v30  ;;  %v1826_v30 = vld [vmem:[#allocation11 + $0x3c8] sm:$0xff] }
 0x39e   :  { %3182 = vmatpush1.bf16.msra.mxu1 %v3181_v48  ;;  %3310 = vmatpush1.bf16.msra.mxu0 %v3309_v53  ;;  %v1786_v48 = vld [vmem:[#allocation11 + $0x288] sm:$0xff]  ;;  %v3337_v21 = vpack.c.bf16 %v1807_v34, %v1803_v32  ;;  %v1828_v32 = vld [vmem:[#allocation11 + $0x3d8] sm:$0xff] }
 0x39f   :  { %3184 = vmatprep.subr.bf16.mxu1 %v3183_v51  ;;  %3312 = vmatprep.subr.bf16.mxu0 %v3311_v56  ;;  %v1790_v53 = vld [vmem:[#allocation11 + $0x2a8] sm:$0xff]  ;;  %v1788_v51 = vld [vmem:[#allocation11 + $0x298] sm:$0xff] }
 0x3a0   :  { %v3199_v56 = vpack.c.bf16 %v1790_v53, %v1786_v48  ;;  %v3327_v0 = vpack.c.bf16 %v1792_v54, %v1788_v51  ;;  %v1813_v48 = vld [vmem:[#allocation11 + $0x360] sm:$0xff]  ;;  %v1811_v53 = vld [vmem:[#allocation11 + $0x350] sm:$0xff]  ;;  %v1830_v24 = vld [vmem:[#allocation11 + $0x3e8] sm:$0xff] }
 0x3a1   :  { %v1815_v54 = vld [vmem:[#allocation11 + $0x370] sm:$0xff]  ;;  %v3213_v60 = vpack.c.bf16 %v1813_v48, %v1809_v43  ;;  %v3219_v34 = vpack.c.bf16 %v1830_v24, %v1826_v30  ;;  %v1834_v48 = vld [vmem:[#allocation11 + $0x408] sm:$0xff] }
 0x3a2   :  { %3186 = vmatpush1.bf16.msra.mxu1 %v3185_v4  ;;  %3314 = vmatpush1.bf16.msra.mxu0 %v3313_v6  ;;  %v1794_v4 = vld [vmem:[#allocation11 + $0x2c8] sm:$0xff]  ;;  %v3341_v63 = vpack.c.bf16 %v1815_v54, %v1811_v53 }
 0x3a3   :  { %3188 = vmatprep.subr.bf16.mxu1 %v3187_v57  ;;  %3316 = vmatprep.subr.bf16.mxu0 %v3315_v10  ;;  %v1798_v6 = vld [vmem:[#allocation11 + $0x2e8] sm:$0xff]  ;;  %v1796_v57 = vld [vmem:[#allocation11 + $0x2d8] sm:$0xff] }
 0x3a4   :  { %v3203_v10 = vpack.c.bf16 %v1798_v6, %v1794_v4  ;;  %v3331_v7 = vpack.c.bf16 %v1800_v58, %v1796_v57  ;;  %v1821_v4 = vld [vmem:[#allocation11 + $0x3a0] sm:$0xff]  ;;  %v1819_v57 = vld [vmem:[#allocation11 + $0x390] sm:$0xff]  ;;  %v1838_v53 = vld [vmem:[#allocation11 + $0x428] sm:$0xff] }
 0x3a5   :  { %v1823_v58 = vld [vmem:[#allocation11 + $0x3b0] sm:$0xff]  ;;  %v3223_v54 = vpack.c.bf16 %v1838_v53, %v1834_v48  ;;  %v1850_v53 = vld [vmem:[#allocation11 + $0x488] sm:$0xff] }
 0x3a6   :  { %3190 = vmatpush1.bf16.msra.mxu1 %v3189_v17  ;;  %3318 = vmatpush1.bf16.msra.mxu0 %v3317_v16  ;;  %v1802_v17 = vld [vmem:[#allocation11 + $0x308] sm:$0xff] }
 0x3a7   :  { %3192 = vmatprep.subr.bf16.mxu1 %v3191_v19  ;;  %3320 = vmatprep.subr.bf16.mxu0 %v3319_v28  ;;  %v1806_v16 = vld [vmem:[#allocation11 + $0x328] sm:$0xff]  ;;  %v1804_v19 = vld [vmem:[#allocation11 + $0x318] sm:$0xff] }
 0x3a8   :  { %v3207_v28 = vpack.c.bf16 %v1806_v16, %v1802_v17  ;;  %v3335_v33 = vpack.c.bf16 %v1808_v22, %v1804_v19 }
 0x3aa   :  { %3194 = vmatpush1.bf16.msra.mxu1 %v3193_v35  ;;  %3322 = vmatpush1.bf16.msra.mxu0 %v3321_v31  ;;  %v1810_v35 = vld [vmem:[#allocation11 + $0x348] sm:$0xff] }
 0x3ab   :  { %3196 = vmatprep.subr.bf16.mxu1 %v3195_v36  ;;  %3324 = vmatprep.subr.bf16.mxu0 %v3323_v40  ;;  %v1814_v31 = vld [vmem:[#allocation11 + $0x368] sm:$0xff]  ;;  %v1812_v36 = vld [vmem:[#allocation11 + $0x358] sm:$0xff] }
 0x3ac   :  { %v3211_v40 = vpack.c.bf16 %v1814_v31, %v1810_v35  ;;  %v3339_v51 = vpack.c.bf16 %v1816_v37, %v1812_v36  ;;  %v1832_v35 = vld [vmem:[#allocation11 + $0x3f8] sm:$0xff]  ;;  %v1825_v31 = vld [vmem:[#allocation11 + $0x3c0] sm:$0xff] }
 0x3ad   :  { %v1829_v36 = vld [vmem:[#allocation11 + $0x3e0] sm:$0xff]  ;;  %v3347_v37 = vpack.c.bf16 %v1832_v35, %v1828_v32  ;;  %v1842_v35 = vld [vmem:[#allocation11 + $0x448] sm:$0xff] }
 0x3ae   :  { %3198 = vmatpush1.bf16.msra.mxu1 %v3197_v52  ;;  %3326 = vmatpush1.bf16.msra.mxu0 %v3325_v55  ;;  %v1818_v52 = vld [vmem:[#allocation11 + $0x388] sm:$0xff] }
 0x3af   :  { %3200 = vmatprep.subr.bf16.mxu1 %v3199_v56  ;;  %3328 = vmatprep.subr.bf16.mxu0 %v3327_v0  ;;  %v1822_v55 = vld [vmem:[#allocation11 + $0x3a8] sm:$0xff]  ;;  %v1820_v56 = vld [vmem:[#allocation11 + $0x398] sm:$0xff] }
 0x3b0   :  { %v3215_v0 = vpack.c.bf16 %v1822_v55, %v1818_v52  ;;  %v3343_v6 = vpack.c.bf16 %v1824_v59, %v1820_v56  ;;  %v1840_v52 = vld [vmem:[#allocation11 + $0x438] sm:$0xff]  ;;  %v1367_v56 = vpop.xlane.xlu0 %1366 }
 0x3b1   :  { %v1373_v59 = vmax.f32 %v1367_v56, 1e-24  ;;  %v1852_v56 = vld [vmem:[#allocation11 + $0x498] sm:$0xff] }
 0x3b2   :  { %3202 = vmatpush1.bf16.msra.mxu1 %v3201_v8  ;;  %3330 = vmatpush1.bf16.msra.mxu0 %v3329_v9  ;;  %v3217_v8 = vpack.c.bf16 %v1821_v4, %v1817_v1  ;;  %v3345_v9 = vpack.c.bf16 %v1823_v58, %v1819_v57  ;;  %v1833_v58 = vld [vmem:[#allocation11 + $0x400] sm:$0xff] }
 0x3b3   :  { %3204 = vmatprep.subr.bf16.mxu1 %v3203_v10  ;;  %3332 = vmatprep.subr.bf16.mxu0 %v3331_v7 }
 0x3b6   :  { %3206 = vmatpush1.bf16.msra.mxu1 %v3205_v25  ;;  %3334 = vmatpush1.bf16.msra.mxu0 %v3333_v26 }
 0x3b7   :  { %3208 = vmatprep.subr.bf16.mxu1 %v3207_v28  ;;  %3336 = vmatprep.subr.bf16.mxu0 %v3335_v33 }
 0x3ba   :  { %3210 = vmatpush1.bf16.msra.mxu1 %v3209_v38  ;;  %3338 = vmatpush1.bf16.msra.mxu0 %v3337_v21  ;;  %v3221_v38 = vpack.c.bf16 %v1829_v36, %v1825_v31  ;;  %v1827_v21 = vld [vmem:[#allocation11 + $0x3d0] sm:$0xff]  ;;  %v1844_v36 = vld [vmem:[#allocation11 + $0x458] sm:$0xff] }
 0x3bb   :  { %3212 = vmatprep.subr.bf16.mxu1 %v3211_v40  ;;  %3340 = vmatprep.subr.bf16.mxu0 %v3339_v51  ;;  %v1831_v40 = vld [vmem:[#allocation11 + $0x3f0] sm:$0xff]  ;;  %v1836_v51 = vld [vmem:[#allocation11 + $0x418] sm:$0xff] }
 0x3bc   :  { %v3349_v43 = vpack.c.bf16 %v1831_v40, %v1827_v21  ;;  %v3351_v55 = vpack.c.bf16 %v1840_v52, %v1836_v51  ;;  %v1841_v40 = vld [vmem:[#allocation11 + $0x440] sm:$0xff] }
 0x3be   :  { %3214 = vmatpush1.bf16.msra.mxu1 %v3213_v60  ;;  %3342 = vmatpush1.bf16.msra.mxu0 %v3341_v63  ;;  %v1372_v60 = vpop.xlane.xlu0 %1371 }
 0x3bf   :  { %3216 = vmatprep.subr.bf16.mxu1 %v3215_v0  ;;  %3344 = vmatprep.subr.bf16.mxu0 %v3343_v6  ;;  %v1374_v63 = vmax.f32 %v1372_v60, 1e-24  ;;  %v1849_v60 = vld [vmem:[#allocation11 + $0x480] sm:$0xff] }
 0x3c2   :  { %3218 = vmatpush1.bf16.msra.mxu1 %v3217_v8  ;;  %3346 = vmatpush1.bf16.msra.mxu0 %v3345_v9  ;;  %v1837_v8 = vld [vmem:[#allocation11 + $0x420] sm:$0xff] }
 0x3c3   :  { %3220 = vmatprep.subr.bf16.mxu1 %v3219_v34  ;;  %3348 = vmatprep.subr.bf16.mxu0 %v3347_v37  ;;  %v3225_v31 = vpack.c.bf16 %v1837_v8, %v1833_v58  ;;  %v1848_v37 = vld [vmem:[#allocation11 + $0x478] sm:$0xff]  ;;  %v1858_v58 = vld [vmem:[#allocation11 + $0x4c8] sm:$0xff] }
 0x3c4   :  { %v3355_v48 = vpack.c.bf16 %v1848_v37, %v1844_v36  ;;  %v1862_v8 = vld [vmem:[#allocation11 + $0x4e8] sm:$0xff]  ;;  %v1865_v36 = vld [vmem:[#allocation11 + $0x500] sm:$0xff] }
 0x3c5   :  { %v1869_v37 = vld [vmem:[#allocation11 + $0x520] sm:$0xff] }
 0x3c6   :  { %3222 = vmatpush1.bf16.msra.mxu1 %v3221_v38  ;;  %3350 = vmatpush1.bf16.msra.mxu0 %v3349_v43 }
 0x3c7   :  { %3224 = vmatprep.subr.bf16.mxu1 %v3223_v54  ;;  %3352 = vmatprep.subr.bf16.mxu0 %v3351_v55  ;;  %v1854_v55 = vld [vmem:[#allocation11 + $0x4a8] sm:$0xff] }
 0x458   :  { %v2634_v10 = vpop.f32.mrb[12].mxu0  ;;  %v1587_v11 = vpop.f32.mrb[8].mxu1 }
 0x459   :  { %v1676_v13 = vmax.f32 %v2634_v10, 1e-24  ;;  %v1504_v15 = vpop.f32.mrb[13].mxu0  ;;  %v1589_v7 = vpop.f32.mrb[9].mxu1 }
 0x45a   :  { %v1675_v2 = vmax.f32 %v1504_v15, 1e-24  ;;  %v1835_v15 = vld [vmem:[#allocation11 + $0x410] sm:$0xff] }
 0x45b   :  { %3625 = vrsqrt.f32 %v1676_v13 }
 0x45c   :  { %3627 = vrsqrt.f32 %v1675_v2  ;;  %v1664_v17 = vpop.f32.mrb[14].mxu0  ;;  %v4229_v16 = vpop.f32.mrb[10].mxu1  ;;  %v1839_v2 = vld [vmem:[#allocation11 + $0x430] sm:$0xff] }
 0x45d   :  { %v4231_v19 = vpop.f32.mrb[15].mxu0  ;;  %v1595_v22 = vpop.f32.mrb[11].mxu1  ;;  %3629 = vrsqrt.f32 %v1373_v59 }
 0x45e   :  { %3631 = vrsqrt.f32 %v1374_v63  ;;  %v1853_v63 = vld [vmem:[#allocation11 + $0x4a0] sm:$0xff] }
 0x460   :  { %v1670_v25 = vpop.f32.mrb[16].mxu0 }
 0x461   :  { %v1672_v26 = vpop.f32.mrb[17].mxu0 }
 0x465   :  { %v3626_v28 = vpop.eup %3625 }
 0x466   :  { %v3628_v33 = vpop.eup %3627  ;;  %1686 = vperm.xlu0 %3620, %v3626_v28  }
 0x467   :  { %1681 = vperm.xlu1 %3619, %v3628_v33   ;;  %v3630_v0 = vpop.eup %3629 }
 0x468   :  { %v3632_v1 = vpop.eup %3631  ;;  %v1377_v6 = vmul.f32 %v3630_v0, %v4154_v14  ;;  %v1378_v57 = vmul.f32 %v3630_v0, %v4168_v47  ;;  %v1379_v24 = vmul.f32 %v3630_v0, %v4176_v12  ;;  %v1846_v47 = vld [vmem:[#allocation11 + $0x468] sm:$0xff] }
 0x469   :  { %v1384_v28 = vmul.f32 %v3632_v1, %v4206_v18  ;;  %v1383_v30 = vmul.f32 %v3632_v1, %v4202_v23  ;;  %v3353_v23 = vpack.c.bf16 %v1839_v2, %v1835_v15  ;;  %v3227_v43 = vpack.c.bf16 %v1846_v47, %v1842_v35  ;;  %v1868_v35 = vld [vmem:[#allocation11 + $0x518] sm:$0xff] }
 0x46a   :  { %v1381_v52 = vmul.f32 %v3632_v1, %v4200_v20  ;;  %v3231_v20 = vpack.c.bf16 %v1854_v55, %v1850_v53  ;;  %v3233_v15 = vpack.c.bf16 %v1853_v63, %v1849_v60  ;;  %v1877_v53 = vld [vmem:[#allocation11 + $0x560] sm:$0xff]  ;;  %v1879_v55 = vld [vmem:[#allocation11 + $0x570] sm:$0xff] }
 0x4e5   :  { %v1687_v4 = vpop.permute.xlu0 %1686 }
 0x4e6   :  { %v1695_v9 = vmul.f32 %v1687_v4, %v1670_v25  ;;  %v1696_v10 = vmul.f32 %v1687_v4, %v1672_v26  ;;  %v1682_v13 = vpop.permute.xlu1 %1681  ;;  %v1694_v14 = vmul.f32 %v1687_v4, %v1595_v22  ;;  %v1693_v12 = vmul.f32 %v1687_v4, %v4229_v16  ;;  %v1847_v22 = vld [vmem:[#allocation11 + $0x470] sm:$0xff]  ;;  %v1856_v16 = vld [vmem:[#allocation11 + $0x4b8] sm:$0xff] }
 0x4e7   :  { %v1689_v32 = vmul.f32 %v1682_v13, %v1587_v11  ;;  %v1690_v33 = vmul.f32 %v1682_v13, %v1589_v7  ;;  %v1691_v34 = vmul.f32 %v1682_v13, %v1664_v17  ;;  %v1382_v11 = vmul.f32 %v3632_v1, %v4204_v27  ;;  %v1845_v7 = vld [vmem:[#allocation11 + $0x460] sm:$0xff]  ;;  %v1843_v17 = vld [vmem:[#allocation11 + $0x450] sm:$0xff] }
 0x4e8   :  { %v4238_v25 = vmul.f32 %v1696_v10, %v1384_v28  ;;  %v4240_v26 = vmul.f32 %v1695_v9, %v1383_v30  ;;  %v1692_v51 = vmul.f32 %v1682_v13, %v4231_v19  ;;  %v3229_v27 = vpack.c.bf16 %v1845_v7, %v1841_v40  ;;  %v1851_v19 = vld [vmem:[#allocation11 + $0x490] sm:$0xff]  ;;  %v1860_v9 = vld [vmem:[#allocation11 + $0x4d8] sm:$0xff]  ;;  %v1857_v28 = vld [vmem:[#allocation11 + $0x4c0] sm:$0xff] }
 0x4e9   :  { %v1697_v38 = vmul.f32 %v1689_v32, %v1377_v6  ;;  %v4242_v21 = vmul.f32 %v1691_v34, %v1379_v24  ;;  %v1698_v18 = vmul.f32 %v1690_v33, %v1378_v57  ;;  %v1702_v54 = vmul.f32 %v1694_v14, %v1382_v11  ;;  %v1855_v57 = vld [vmem:[#allocation11 + $0x4b0] sm:$0xff]  ;;  %v1864_v10 = vld [vmem:[#allocation11 + $0x4f8] sm:$0xff]  ;;  %v1861_v30 = vld [vmem:[#allocation11 + $0x4e0] sm:$0xff] }
 0x4ea   :  { %v3357_v59 = vpack.c.bf16 %v1847_v22, %v1843_v17  ;;  %v1701_v4 = vmul.f32 %v1693_v12, %v1381_v52  ;;  %v1380_v6 = vmul.f32 %v3630_v0, %v4189_v3  ;;  %v3359_v1 = vpack.c.bf16 %v1856_v16, %v1852_v56  ;;  %v1859_v24 = vld [vmem:[#allocation11 + $0x4d0] sm:$0xff]  ;;  %v1866_v33 = vld [vmem:[#allocation11 + $0x508] sm:$0xff]  ;;  %v1872_v14 = vld [vmem:[#allocation11 + $0x538] sm:$0xff] }
 0x4eb   :  { %2047 = vmatprep.mubr.f32.mxu1 %v1698_v18  ;;  %2201 = vmatprep.mubr.f32.mxu0 %v1698_v18  ;;  %v3361_v2 = vpack.c.bf16 %v1855_v57, %v1851_v19  ;;  %v3235_v3 = vpack.c.bf16 %v1862_v8, %v1858_v58  ;;  %v3363_v0 = vpack.c.bf16 %v1864_v10, %v1860_v9  ;;  %v1863_v32 = vld [vmem:[#allocation11 + $0x4f0] sm:$0xff]  ;;  %v1870_v34 = vld [vmem:[#allocation11 + $0x528] sm:$0xff]  ;;  %v1876_v7 = vld [vmem:[#allocation11 + $0x558] sm:$0xff] }
 0x4ec   :  { %2048 = vmatmul.mubr.f32.vlgmr.msra.gmra.mrb[12].mxu1 %v1697_v38  ;;  %2202 = vmatmul.mubr.f32.vlgmr.msra.gmra.mrb[18].mxu0 %v1697_v38  ;;  %v1700_v13 = vmul.f32 %v1692_v51, %v1380_v6  ;;  %v3365_v47 = vpack.c.bf16 %v1863_v32, %v1859_v24  ;;  %v3239_v38 = vpack.c.bf16 %v1870_v34, %v1866_v33  ;;  %v1871_v40 = vld [vmem:[#allocation11 + $0x530] sm:$0xff]  ;;  %v1874_v12 = vld [vmem:[#allocation11 + $0x548] sm:$0xff]  ;;  %v1880_v17 = vld [vmem:[#allocation11 + $0x578] sm:$0xff] }
 0x4ed   :  { %3226 = vmatpush1.bf16.msra.mxu1 %v3225_v31  ;;  %3354 = vmatpush1.bf16.msra.mxu0 %v3353_v23  ;;  %v3237_v31 = vpack.c.bf16 %v1861_v30, %v1857_v28  ;;  %v3367_v18 = vpack.c.bf16 %v1872_v14, %v1868_v35  ;;  %v1867_v23 = vld [vmem:[#allocation11 + $0x510] sm:$0xff]  ;;  %v1878_v11 = vld [vmem:[#allocation11 + $0x568] sm:$0xff]  ;;  %v3241_v22 = vpack.c.bf16 %v1869_v37, %v1865_v36  ;;  %v1885_v6 = vld [vmem:[#allocation11 + $0x5a0] sm:$0xff] }
 0x4ee   :  { %2053 = vmatprep.mubr.f32.mxu1 %v1702_v54  ;;  %2207 = vmatprep.mubr.f32.mxu0 %v1702_v54  ;;  %v3243_v51 = vpack.c.bf16 %v1878_v11, %v1874_v12  ;;  %v3371_v54 = vpack.c.bf16 %v1880_v17, %v1876_v7  ;;  %v1875_v52 = vld [vmem:[#allocation11 + $0x550] sm:$0xff]  ;;  %v1882_v56 = vld [vmem:[#allocation11 + $0x588] sm:$0xff]  ;;  %v1892_v9 = vld [vmem:[#allocation11 + $0x5d8] sm:$0xff] }
 0x4ef   :  { %3228 = vmatprep.subr.bf16.mxu1 %v3227_v43  ;;  %3356 = vmatprep.subr.bf16.mxu0 %v3355_v48  ;;  %v3369_v43 = vpack.c.bf16 %v1871_v40, %v1867_v23  ;;  %v1873_v48 = vld [vmem:[#allocation11 + $0x540] sm:$0xff]  ;;  %v1886_v16 = vld [vmem:[#allocation11 + $0x5a8] sm:$0xff]  ;;  %v3373_v63 = vpack.c.bf16 %v1879_v55, %v1875_v52  ;;  %v1883_v58 = vld [vmem:[#allocation11 + $0x590] sm:$0xff] }
 0x4f0   :  { %2054 = vmatmul.mubr.f32.gmra.mrb[14].mxu1 %v1701_v4  ;;  %2208 = vmatmul.mubr.f32.gmra.mrb[20].mxu0 %v1701_v4  ;;  %v3245_v60 = vpack.c.bf16 %v1877_v53, %v1873_v48  ;;  %v1881_v4 = vld [vmem:[#allocation11 + $0x580] sm:$0xff]  ;;  %v3247_v19 = vpack.c.bf16 %v1886_v16, %v1882_v56  ;;  %v1894_v8 = vld [vmem:[#allocation11 + $0x5e8] sm:$0xff]  ;;  %v1896_v10 = vld [vmem:[#allocation11 + $0x5f8] sm:$0xff] }
 0x4f1   :  { %3230 = vmatpush1.bf16.msra.mxu1 %v3229_v27  ;;  %3358 = vmatpush1.bf16.msra.mxu0 %v3357_v59  ;;  %v1884_v27 = vld [vmem:[#allocation11 + $0x598] sm:$0xff]  ;;  %v1893_v28 = vld [vmem:[#allocation11 + $0x5e0] sm:$0xff]  ;;  %v1895_v24 = vld [vmem:[#allocation11 + $0x5f0] sm:$0xff] }
 0x4f2   :  { %2124 = vmatprep.mubr.f32.mxu1 %v1700_v13  ;;  %2278 = vmatprep.mubr.f32.mxu0 %v1700_v13  ;;  %v1888_v59 = vld [vmem:[#allocation11 + $0x5b8] sm:$0xff]  ;;  %v3249_v13 = vpack.c.bf16 %v1885_v6, %v1881_v4  ;;  %v1898_v32 = vld [vmem:[#allocation11 + $0x608] sm:$0xff]  ;;  %v1901_v36 = vld [vmem:[#allocation11 + $0x620] sm:$0xff] }
 0x4f3   :  { %3232 = vmatprep.subr.bf16.mxu1 %v3231_v20  ;;  %3360 = vmatprep.subr.bf16.mxu0 %v3359_v1  ;;  %v3375_v57 = vpack.c.bf16 %v1888_v59, %v1884_v27  ;;  %v1887_v20 = vld [vmem:[#allocation11 + $0x5b0] sm:$0xff]  ;;  %v1890_v1 = vld [vmem:[#allocation11 + $0x5c8] sm:$0xff]  ;;  %v1900_v34 = vld [vmem:[#allocation11 + $0x618] sm:$0xff] }
 0x4f4   :  { %v3251_v30 = vpack.c.bf16 %v1894_v8, %v1890_v1  ;;  %v1902_v33 = vld [vmem:[#allocation11 + $0x628] sm:$0xff]  ;;  %v1904_v35 = vld [vmem:[#allocation11 + $0x638] sm:$0xff]  ;;  %v1903_v23 = vld [vmem:[#allocation11 + $0x630] sm:$0xff] }
 0x4f5   :  { %3234 = vmatpush1.bf16.msra.mxu1 %v3233_v15  ;;  %3362 = vmatpush1.bf16.msra.mxu0 %v3361_v2  ;;  %v3377_v15 = vpack.c.bf16 %v1887_v20, %v1883_v58  ;;  %v1889_v2 = vld [vmem:[#allocation11 + $0x5c0] sm:$0xff]  ;;  %v3255_v37 = vpack.c.bf16 %v1902_v33, %v1898_v32  ;;  %v1906_v40 = vld [vmem:[#allocation11 + $0x648] sm:$0xff]  ;;  %v1908_v11 = vld [vmem:[#allocation11 + $0x658] sm:$0xff] }
 0x4f6   :  { %3236 = vmatprep.subr.bf16.mxu1 %v3235_v3  ;;  %3364 = vmatprep.subr.bf16.mxu0 %v3363_v0  ;;  %v3379_v3 = vpack.c.bf16 %v1896_v10, %v1892_v9  ;;  %v1891_v0 = vld [vmem:[#allocation11 + $0x5d0] sm:$0xff]  ;;  %v3253_v14 = vpack.c.bf16 %v1893_v28, %v1889_v2  ;;  %v1910_v12 = vld [vmem:[#allocation11 + $0x668] sm:$0xff]  ;;  %v1912_v7 = vld [vmem:[#allocation11 + $0x678] sm:$0xff] }
 0x4f7   :  { %v1909_v48 = vld [vmem:[#allocation11 + $0x660] sm:$0xff]  ;;  %v3259_v53 = vpack.c.bf16 %v1910_v12, %v1906_v40  ;;  %v1911_v52 = vld [vmem:[#allocation11 + $0x670] sm:$0xff]  ;;  %v1914_v55 = vld [vmem:[#allocation11 + $0x688] sm:$0xff] }
 0x4f8   :  { %v1918_v56 = vld [vmem:[#allocation11 + $0x6a8] sm:$0xff]  ;;  %v1916_v16 = vld [vmem:[#allocation11 + $0x698] sm:$0xff]  ;;  %v1917_v4 = vld [vmem:[#allocation11 + $0x6a0] sm:$0xff] }
 0x4f9   :  { %3238 = vmatpush1.bf16.msra.mxu1 %v3237_v31  ;;  %3366 = vmatpush1.bf16.msra.mxu0 %v3365_v47  ;;  %v3381_v31 = vpack.c.bf16 %v1895_v24, %v1891_v0  ;;  %v1897_v47 = vld [vmem:[#allocation11 + $0x600] sm:$0xff]  ;;  %v1920_v27 = vld [vmem:[#allocation11 + $0x6b8] sm:$0xff]  ;;  %v3263_v6 = vpack.c.bf16 %v1918_v56, %v1914_v55  ;;  %v1919_v58 = vld [vmem:[#allocation11 + $0x6b0] sm:$0xff] }
 0x4fa   :  { %3240 = vmatprep.subr.bf16.mxu1 %v3239_v38  ;;  %3368 = vmatprep.subr.bf16.mxu0 %v3367_v18  ;;  %v3383_v38 = vpack.c.bf16 %v1904_v35, %v1900_v34  ;;  %v1899_v18 = vld [vmem:[#allocation11 + $0x610] sm:$0xff]  ;;  %v3257_v17 = vpack.c.bf16 %v1901_v36, %v1897_v47  ;;  %v1922_v20 = vld [vmem:[#allocation11 + $0x6c8] sm:$0xff]  ;;  %v1924_v8 = vld [vmem:[#allocation11 + $0x6d8] sm:$0xff] }
 0x4fb   :  { %v1926_v1 = vld [vmem:[#allocation11 + $0x6e8] sm:$0xff]  ;;  %v1928_v9 = vld [vmem:[#allocation11 + $0x6f8] sm:$0xff]  ;;  %v1925_v2 = vld [vmem:[#allocation11 + $0x6e0] sm:$0xff] }
 0x4fc   :  { %v3267_v28 = vpack.c.bf16 %v1926_v1, %v1922_v20  ;;  %v1927_v0 = vld [vmem:[#allocation11 + $0x6f0] sm:$0xff]  ;;  %v1930_v24 = vld [vmem:[#allocation11 + $0x708] sm:$0xff]  ;;  %v1932_v33 = vld [vmem:[#allocation11 + $0x718] sm:$0xff] }
 0x4fd   :  { %3242 = vmatpush1.bf16.msra.mxu1 %v3241_v22  ;;  %3370 = vmatpush1.bf16.msra.mxu0 %v3369_v43  ;;  %v3385_v22 = vpack.c.bf16 %v1903_v23, %v1899_v18  ;;  %v1905_v43 = vld [vmem:[#allocation11 + $0x640] sm:$0xff]  ;;  %v1934_v32 = vld [vmem:[#allocation11 + $0x728] sm:$0xff]  ;;  %v1936_v34 = vld [vmem:[#allocation11 + $0x738] sm:$0xff] }
 0x4fe   :  { %3244 = vmatprep.subr.bf16.mxu1 %v3243_v51  ;;  %3372 = vmatprep.subr.bf16.mxu0 %v3371_v54  ;;  %v3387_v51 = vpack.c.bf16 %v1912_v7, %v1908_v11  ;;  %v1907_v54 = vld [vmem:[#allocation11 + $0x650] sm:$0xff]  ;;  %v3261_v59 = vpack.c.bf16 %v1909_v48, %v1905_v43  ;;  %v1933_v47 = vld [vmem:[#allocation11 + $0x720] sm:$0xff]  ;;  %v3271_v36 = vpack.c.bf16 %v1934_v32, %v1930_v24  ;;  %v1938_v23 = vld [vmem:[#allocation11 + $0x748] sm:$0xff] }
 0x4ff   :  { %v1935_v18 = vld [vmem:[#allocation11 + $0x730] sm:$0xff]  ;;  %v1942_v40 = vld [vmem:[#allocation11 + $0x768] sm:$0xff]  ;;  %v1940_v12 = vld [vmem:[#allocation11 + $0x758] sm:$0xff] }
 0x500   :  { %v1944_v11 = vld [vmem:[#allocation11 + $0x778] sm:$0xff]  ;;  %v1941_v43 = vld [vmem:[#allocation11 + $0x760] sm:$0xff]  ;;  %v3275_v48 = vpack.c.bf16 %v1942_v40, %v1938_v23  ;;  %v1950_v55 = vld [vmem:[#allocation11 + $0x7a8] sm:$0xff] }
 0x501   :  { %3246 = vmatpush1.bf16.msra.mxu1 %v3245_v60  ;;  %3374 = vmatpush1.bf16.msra.mxu0 %v3373_v63  ;;  %v3389_v60 = vpack.c.bf16 %v1911_v52, %v1907_v54  ;;  %v1913_v63 = vld [vmem:[#allocation11 + $0x680] sm:$0xff]  ;;  %v1943_v54 = vld [vmem:[#allocation11 + $0x770] sm:$0xff]  ;;  %v1946_v52 = vld [vmem:[#allocation11 + $0x788] sm:$0xff] }
 0x502   :  { %3248 = vmatprep.subr.bf16.mxu1 %v3247_v19  ;;  %3376 = vmatprep.subr.bf16.mxu0 %v3375_v57  ;;  %v3391_v19 = vpack.c.bf16 %v1920_v27, %v1916_v16  ;;  %v1915_v57 = vld [vmem:[#allocation11 + $0x690] sm:$0xff]  ;;  %v3265_v10 = vpack.c.bf16 %v1917_v4, %v1913_v63  ;;  %v1948_v56 = vld [vmem:[#allocation11 + $0x798] sm:$0xff]  ;;  %v1949_v63 = vld [vmem:[#allocation11 + $0x7a0] sm:$0xff]  ;;  %v3279_v4 = vpack.c.bf16 %v1950_v55, %v1946_v52 }
 0x503   :  { %v1952_v16 = vld [vmem:[#allocation11 + $0x7b8] sm:$0xff]  ;;  %v1958_v20 = vld [vmem:[#allocation11 + $0x7e8] sm:$0xff] }
 0x504   :  { %v1956_v1 = vld [vmem:[#allocation11 + $0x7d8] sm:$0xff]  ;;  %v2308_v23 = vld [vmem:[#allocation14 + $0x48] sm:$0xff] }
 0x505   :  { %3250 = vmatpush1.bf16.msra.mxu1 %v3249_v13  ;;  %3378 = vmatpush1.bf16.msra.mxu0 %v3377_v15  ;;  %v3393_v13 = vpack.c.bf16 %v1919_v58, %v1915_v57  ;;  %v1921_v15 = vld [vmem:[#allocation11 + $0x6c0] sm:$0xff]  ;;  %v1951_v57 = vld [vmem:[#allocation11 + $0x7b0] sm:$0xff]  ;;  %v1954_v58 = vld [vmem:[#allocation11 + $0x7c8] sm:$0xff] }
 0x506   :  { %3252 = vmatprep.subr.bf16.mxu1 %v3251_v30  ;;  %3380 = vmatprep.subr.bf16.mxu0 %v3379_v3  ;;  %v3395_v30 = vpack.c.bf16 %v1928_v9, %v1924_v8  ;;  %v1923_v3 = vld [vmem:[#allocation11 + $0x6d0] sm:$0xff]  ;;  %v3269_v35 = vpack.c.bf16 %v1925_v2, %v1921_v15  ;;  %v1960_v8 = vld [vmem:[#allocation11 + $0x7f8] sm:$0xff]  ;;  %v3283_v15 = vpack.c.bf16 %v1958_v20, %v1954_v58  ;;  %v2323_v20 = vld [vmem:[#allocation14 + $0xc0] sm:$0xff] }
 0x507   :  { %v3411_v2 = vpack.c.bf16 %v1960_v8, %v1956_v1  ;;  %v2302_v24 = vld [vmem:[#allocation14 + $0x18] sm:$0xff]  ;;  %v2325_v1 = vld [vmem:[#allocation14 + $0xd0] sm:$0xff]  ;;  %v2328_v8 = vld [vmem:[#allocation14 + $0xe8] sm:$0xff] }
 0x508   :  { %v2310_v40 = vld [vmem:[#allocation14 + $0x58] sm:$0xff] }
 0x509   :  { %3254 = vmatpush1.bf16.msra.mxu1 %v3253_v14  ;;  %3382 = vmatpush1.bf16.msra.mxu0 %v3381_v31  ;;  %v3397_v14 = vpack.c.bf16 %v1927_v0, %v1923_v3  ;;  %v1929_v31 = vld [vmem:[#allocation11 + $0x700] sm:$0xff]  ;;  %v1959_v3 = vld [vmem:[#allocation11 + $0x7f0] sm:$0xff] }
 0x50a   :  { %3256 = vmatprep.subr.bf16.mxu1 %v3255_v37  ;;  %3384 = vmatprep.subr.bf16.mxu0 %v3383_v38  ;;  %v3399_v37 = vpack.c.bf16 %v1936_v34, %v1932_v33  ;;  %v1931_v38 = vld [vmem:[#allocation11 + $0x710] sm:$0xff]  ;;  %v3273_v7 = vpack.c.bf16 %v1933_v47, %v1929_v31  ;;  %v2306_v47 = vld [vmem:[#allocation14 + $0x38] sm:$0xff] }
 0x50b   :  { %v2300_v0 = vld [vmem:[#allocation14 + $0x8] sm:$0xff] }
 0x50c   :  { %v3415_v34 = vpack.c.bf16 %v2302_v24, %v2300_v0  ;;  %v2304_v31 = vld [vmem:[#allocation14 + $0x28] sm:$0xff]  ;;  %v2331_v24 = vld [vmem:[#allocation14 + $0x100] sm:$0xff] }
 0x50d   :  { %3258 = vmatpush1.bf16.msra.mxu1 %v3257_v17  ;;  %3386 = vmatpush1.bf16.msra.mxu0 %v3385_v22  ;;  %v3401_v17 = vpack.c.bf16 %v1935_v18, %v1931_v38  ;;  %v1937_v22 = vld [vmem:[#allocation11 + $0x740] sm:$0xff]  ;;  %v2305_v18 = vld [vmem:[#allocation14 + $0x30] sm:$0xff] }
 0x50e   :  { %3260 = vmatprep.subr.bf16.mxu1 %v3259_v53  ;;  %3388 = vmatprep.subr.bf16.mxu0 %v3387_v51  ;;  %v3403_v53 = vpack.c.bf16 %v1944_v11, %v1940_v12  ;;  %v1939_v51 = vld [vmem:[#allocation11 + $0x750] sm:$0xff]  ;;  %v3277_v27 = vpack.c.bf16 %v1941_v43, %v1937_v22  ;;  %v2303_v38 = vld [vmem:[#allocation14 + $0x20] sm:$0xff]  ;;  %v3423_v11 = vpack.c.bf16 %v2310_v40, %v2308_v23  ;;  %v2314_v43 = vld [vmem:[#allocation14 + $0x78] sm:$0xff] }
 0x50f   :  { %v3421_v12 = vpack.c.bf16 %v2305_v18, %v2303_v38  ;;  %v2312_v22 = vld [vmem:[#allocation14 + $0x68] sm:$0xff]  ;;  %v2339_v23 = vld [vmem:[#allocation14 + $0x140] sm:$0xff]  ;;  %v2341_v40 = vld [vmem:[#allocation14 + $0x150] sm:$0xff] }
 0x511   :  { %3262 = vmatpush1.bf16.msra.mxu1 %v3261_v59  ;;  %3390 = vmatpush1.bf16.msra.mxu0 %v3389_v60  ;;  %v3405_v59 = vpack.c.bf16 %v1943_v54, %v1939_v51  ;;  %v1945_v60 = vld [vmem:[#allocation11 + $0x780] sm:$0xff]  ;;  %v2313_v51 = vld [vmem:[#allocation14 + $0x70] sm:$0xff]  ;;  %v2316_v54 = vld [vmem:[#allocation14 + $0x88] sm:$0xff] }
 0x512   :  { %3264 = vmatprep.subr.bf16.mxu1 %v3263_v6  ;;  %3392 = vmatprep.subr.bf16.mxu0 %v3391_v19  ;;  %v3407_v6 = vpack.c.bf16 %v1952_v16, %v1948_v56  ;;  %v1947_v19 = vld [vmem:[#allocation11 + $0x790] sm:$0xff]  ;;  %v3281_v9 = vpack.c.bf16 %v1949_v63, %v1945_v60  ;;  %v2315_v56 = vld [vmem:[#allocation14 + $0x80] sm:$0xff] }
 0x513   :  { %v2317_v16 = vld [vmem:[#allocation14 + $0x90] sm:$0xff]  ;;  %v2319_v63 = vld [vmem:[#allocation14 + $0xa0] sm:$0xff] }
 0x515   :  { %3266 = vmatpush1.bf16.msra.mxu1 %v3265_v10  ;;  %3394 = vmatpush1.bf16.msra.mxu0 %v3393_v13  ;;  %v3409_v10 = vpack.c.bf16 %v1951_v57, %v1947_v19  ;;  %v1953_v13 = vld [vmem:[#allocation11 + $0x7c0] sm:$0xff] }
 0x516   :  { %3268 = vmatprep.subr.bf16.mxu1 %v3267_v28  ;;  %3396 = vmatprep.subr.bf16.mxu0 %v3395_v30  ;;  %v1957_v28 = vld [vmem:[#allocation11 + $0x7e0] sm:$0xff]  ;;  %v1955_v30 = vld [vmem:[#allocation11 + $0x7d0] sm:$0xff] }
 0x517   :  { %v3285_v32 = vpack.c.bf16 %v1957_v28, %v1953_v13  ;;  %v3413_v33 = vpack.c.bf16 %v1959_v3, %v1955_v30  ;;  %v2326_v19 = vld [vmem:[#allocation14 + $0xd8] sm:$0xff]  ;;  %v2332_v28 = vld [vmem:[#allocation14 + $0x108] sm:$0xff] }
 0x518   :  { %v2334_v30 = vld [vmem:[#allocation14 + $0x118] sm:$0xff] }
 0x519   :  { %3270 = vmatpush1.bf16.msra.mxu1 %v3269_v35  ;;  %3398 = vmatpush1.bf16.msra.mxu0 %v3397_v14  ;;  %v2299_v35 = vld [vmem:[#allocation14] sm:$0xff]  ;;  %v2301_v14 = vld [vmem:[#allocation14 + $0x10] sm:$0xff]  ;;  %v3447_v0 = vpack.c.bf16 %v2334_v30, %v2332_v28  ;;  %v4255_v28 = vld [vmem:[#allocation13] sm:$0xf] }
 0x51a   :  { %3272 = vmatprep.subr.bf16.mxu1 %v3271_v36  ;;  %3400 = vmatprep.subr.bf16.mxu0 %v3399_v37  ;;  %v3417_v36 = vpack.c.bf16 %v2301_v14, %v2299_v35  ;;  %v3419_v37 = vpack.c.bf16 %v2306_v47, %v2304_v31  ;;  %v2335_v31 = vld [vmem:[#allocation14 + $0x120] sm:$0xff]  ;;  %v2337_v47 = vld [vmem:[#allocation14 + $0x130] sm:$0xff]  ;;  %v1966_v30 = vrot.slane %v4255_v28, %v4110_v44 }
 0x51b   :  { %v3453_v38 = vpack.c.bf16 %v2337_v47, %v2335_v31  ;;  %v4265_v47 = vrot.slane %v4255_v28, %v4125_v50 }
 0x51d   :  { %3274 = vmatpush1.bf16.msra.mxu1 %v3273_v7  ;;  %3402 = vmatpush1.bf16.msra.mxu0 %v3401_v17  ;;  %v2307_v7 = vld [vmem:[#allocation14 + $0x40] sm:$0xff]  ;;  %v2309_v17 = vld [vmem:[#allocation14 + $0x50] sm:$0xff] }
 0x51e   :  { %3276 = vmatprep.subr.bf16.mxu1 %v3275_v48  ;;  %3404 = vmatprep.subr.bf16.mxu0 %v3403_v53  ;;  %v3427_v48 = vpack.c.bf16 %v2314_v43, %v2312_v22  ;;  %v2311_v53 = vld [vmem:[#allocation14 + $0x60] sm:$0xff]  ;;  %v2345_v43 = vld [vmem:[#allocation14 + $0x170] sm:$0xff] }
 0x51f   :  { %v3429_v52 = vpack.c.bf16 %v2313_v51, %v2311_v53  ;;  %v2343_v22 = vld [vmem:[#allocation14 + $0x160] sm:$0xff] }
 0x520   :  { %v3461_v53 = vpack.c.bf16 %v2345_v43, %v2343_v22  ;;  %v2367_v43 = vld [vmem:[#allocation14 + $0x220] sm:$0xff] }
 0x521   :  { %3278 = vmatpush1.bf16.msra.mxu1 %v3277_v27  ;;  %3406 = vmatpush1.bf16.msra.mxu0 %v3405_v59  ;;  %v2320_v27 = vld [vmem:[#allocation14 + $0xa8] sm:$0xff]  ;;  %v2322_v59 = vld [vmem:[#allocation14 + $0xb8] sm:$0xff] }
 0x522   :  { %3280 = vmatprep.subr.bf16.mxu1 %v3279_v4  ;;  %3408 = vmatprep.subr.bf16.mxu0 %v3407_v6  ;;  %v3435_v60 = vpack.c.bf16 %v2322_v59, %v2320_v27  ;;  %v2321_v4 = vld [vmem:[#allocation14 + $0xb0] sm:$0xff]  ;;  %v2324_v6 = vld [vmem:[#allocation14 + $0xc8] sm:$0xff]  ;;  %v2351_v27 = vld [vmem:[#allocation14 + $0x1a0] sm:$0xff] }
 0x523   :  { %v3437_v57 = vpack.c.bf16 %v2321_v4, %v2319_v63  ;;  %v3439_v58 = vpack.c.bf16 %v2326_v19, %v2324_v6  ;;  %v2353_v59 = vld [vmem:[#allocation14 + $0x1b0] sm:$0xff]  ;;  %v2355_v6 = vld [vmem:[#allocation14 + $0x1c0] sm:$0xff] }
 0x524   :  { %v3469_v63 = vpack.c.bf16 %v2353_v59, %v2351_v27  ;;  %v2357_v19 = vld [vmem:[#allocation14 + $0x1d0] sm:$0xff]  ;;  %v2378_v27 = vld [vmem:[#allocation14 + $0x278] sm:$0xff] }
 0x525   :  { %3282 = vmatpush1.bf16.msra.mxu1 %v3281_v9  ;;  %3410 = vmatpush1.bf16.msra.mxu0 %v3409_v10  ;;  %v2330_v9 = vld [vmem:[#allocation14 + $0xf8] sm:$0xff]  ;;  %v3441_v10 = vpack.c.bf16 %v2325_v1, %v2323_v20 }
 0x526   :  { %3284 = vmatprep.subr.bf16.mxu1 %v3283_v15  ;;  %3412 = vmatprep.subr.bf16.mxu0 %v3411_v2  ;;  %v3443_v13 = vpack.c.bf16 %v2330_v9, %v2328_v8  ;;  %v2327_v15 = vld [vmem:[#allocation14 + $0xe0] sm:$0xff]  ;;  %v2329_v2 = vld [vmem:[#allocation14 + $0xf0] sm:$0xff]  ;;  %v2362_v20 = vld [vmem:[#allocation14 + $0x1f8] sm:$0xff] }
 0x527   :  { %v3445_v3 = vpack.c.bf16 %v2329_v2, %v2327_v15  ;;  %v2359_v8 = vld [vmem:[#allocation14 + $0x1e0] sm:$0xff]  ;;  %v2361_v9 = vld [vmem:[#allocation14 + $0x1f0] sm:$0xff]  ;;  %v2366_v15 = vld [vmem:[#allocation14 + $0x218] sm:$0xff] }
 0x529   :  { %3286 = vmatpush1.bf16.msra.mxu1 %v3285_v32  ;;  %3414 = vmatpush1.bf16.msra.mxu0 %v3413_v33  ;;  %v2333_v32 = vld [vmem:[#allocation14 + $0x110] sm:$0xff]  ;;  %v2336_v33 = vld [vmem:[#allocation14 + $0x128] sm:$0xff] }
 0x52a   :  { %3416 = vmatprep.subr.bf16.mxu1 %v3415_v34  ;;  %v2338_v34 = vld [vmem:[#allocation14 + $0x138] sm:$0xff]  ;;  %v3449_v35 = vpack.c.bf16 %v2333_v32, %v2331_v24 }
 0x52b   :  { %v3451_v14 = vpack.c.bf16 %v2338_v34, %v2336_v33 }
 0x52c   :  { %2125 = vmatmul.mubr.f32.vlgmr.msra.gmra.mrb[12].mxu1 %v4242_v21  ;;  %2279 = vmatmul.mubr.f32.vlgmr.msra.gmra.mrb[18].mxu0 %v4242_v21  ;;  %v3425_v21 = vpack.c.bf16 %v2309_v17, %v2307_v7  ;;  %v3457_v7 = vpack.c.bf16 %v2341_v40, %v2339_v23 }
 0x52d   :  { %2130 = vmatprep.mubr.f32.mxu1 %v4238_v25  ;;  %2284 = vmatprep.mubr.f32.mxu0 %v4238_v25  ;;  %v2318_v25 = vld [vmem:[#allocation14 + $0x98] sm:$0xff] }
 0x52e   :  { %3418 = vmatpush1.bf16.msra.mxu1 %v3417_v36  ;;  %v3431_v55 = vpack.c.bf16 %v2318_v25, %v2316_v54  ;;  %v2340_v36 = vld [vmem:[#allocation14 + $0x148] sm:$0xff]  ;;  %v2347_v54 = vld [vmem:[#allocation14 + $0x180] sm:$0xff]  ;;  %v2349_v25 = vld [vmem:[#allocation14 + $0x190] sm:$0xff] }
 0x52f   :  { %3420 = vmatprep.subr.bf16.mxu1 %v3419_v37  ;;  %v2342_v37 = vld [vmem:[#allocation14 + $0x158] sm:$0xff] }
 0x530   :  { %2131 = vmatmul.mubr.f32.gmra.mrb[14].mxu1 %v4240_v26  ;;  %2285 = vmatmul.mubr.f32.gmra.mrb[20].mxu0 %v4240_v26  ;;  %v3433_v26 = vpack.c.bf16 %v2317_v16, %v2315_v56  ;;  %v3455_v18 = vpack.c.bf16 %v2342_v37, %v2340_v36  ;;  %v3465_v56 = vpack.c.bf16 %v2349_v25, %v2347_v54  ;;  %v2368_v36 = vld [vmem:[#allocation14 + $0x228] sm:$0xff]  ;;  %v2370_v37 = vld [vmem:[#allocation14 + $0x238] sm:$0xff] }
 0x531   :  { %v3483_v22 = vpack.c.bf16 %v2370_v37, %v2368_v36  ;;  %v2398_v36 = vld [vmem:[#allocation14 + $0x318] sm:$0xff] }
 0x532   :  { %3422 = vmatpush1.bf16.msra.mxu1 %v3421_v12  ;;  %v2344_v12 = vld [vmem:[#allocation14 + $0x168] sm:$0xff] }
 0x533   :  { %3424 = vmatprep.subr.bf16.mxu1 %v3423_v11  ;;  %v2346_v11 = vld [vmem:[#allocation14 + $0x178] sm:$0xff] }
 0x534   :  { %v3459_v17 = vpack.c.bf16 %v2346_v11, %v2344_v12 }
 0x536   :  { %3426 = vmatpush1.bf16.msra.mxu1 %v3425_v21  ;;  %v2348_v21 = vld [vmem:[#allocation14 + $0x188] sm:$0xff] }
 0x537   :  { %3428 = vmatprep.subr.bf16.mxu1 %v3427_v48  ;;  %v2350_v48 = vld [vmem:[#allocation14 + $0x198] sm:$0xff] }
 0x538   :  { %v3463_v51 = vpack.c.bf16 %v2350_v48, %v2348_v21  ;;  %v2369_v21 = vld [vmem:[#allocation14 + $0x230] sm:$0xff] }
 0x539   :  { %v3485_v54 = vpack.c.bf16 %v2369_v21, %v2367_v43  ;;  %v2399_v43 = vld [vmem:[#allocation14 + $0x320] sm:$0xff]  ;;  %v2401_v21 = vld [vmem:[#allocation14 + $0x330] sm:$0xff] }
 0x53a   :  { %3430 = vmatpush1.bf16.msra.mxu1 %v3429_v52  ;;  %v2352_v52 = vld [vmem:[#allocation14 + $0x1a8] sm:$0xff] }
 0x53b   :  { %3432 = vmatprep.subr.bf16.mxu1 %v3431_v55  ;;  %v2354_v55 = vld [vmem:[#allocation14 + $0x1b8] sm:$0xff] }
 0x53c   :  { %v3467_v16 = vpack.c.bf16 %v2354_v55, %v2352_v52  ;;  %v2371_v52 = vld [vmem:[#allocation14 + $0x240] sm:$0xff]  ;;  %v2373_v55 = vld [vmem:[#allocation14 + $0x250] sm:$0xff] }
 0x53d   :  { %v3489_v59 = vpack.c.bf16 %v2373_v55, %v2371_v52 }
 0x53e   :  { %3434 = vmatpush1.bf16.msra.mxu1 %v3433_v26  ;;  %v2356_v26 = vld [vmem:[#allocation14 + $0x1c8] sm:$0xff] }
 0x53f   :  { %3436 = vmatprep.subr.bf16.mxu1 %v3435_v60  ;;  %v2358_v60 = vld [vmem:[#allocation14 + $0x1d8] sm:$0xff] }
 0x540   :  { %v3471_v4 = vpack.c.bf16 %v2358_v60, %v2356_v26  ;;  %v2377_v60 = vld [vmem:[#allocation14 + $0x270] sm:$0xff] }
 0x542   :  { %3438 = vmatpush1.bf16.msra.mxu1 %v3437_v57  ;;  %v3473_v57 = vpack.c.bf16 %v2357_v19, %v2355_v6  ;;  %v2379_v19 = vld [vmem:[#allocation14 + $0x280] sm:$0xff] }
 0x543   :  { %3440 = vmatprep.subr.bf16.mxu1 %v3439_v58  ;;  %v2360_v58 = vld [vmem:[#allocation14 + $0x1e8] sm:$0xff] }
 0x544   :  { %v3475_v1 = vpack.c.bf16 %v2362_v20, %v2360_v58  ;;  %v2386_v58 = vld [vmem:[#allocation14 + $0x2b8] sm:$0xff] }
 0x546   :  { %3442 = vmatpush1.bf16.msra.mxu1 %v3441_v10  ;;  %v3477_v10 = vpack.c.bf16 %v2361_v9, %v2359_v8  ;;  %v2383_v8 = vld [vmem:[#allocation14 + $0x2a0] sm:$0xff]  ;;  %v2385_v9 = vld [vmem:[#allocation14 + $0x2b0] sm:$0xff] }
 0x547   :  { %3444 = vmatprep.subr.bf16.mxu1 %v3443_v13  ;;  %v2364_v13 = vld [vmem:[#allocation14 + $0x208] sm:$0xff] }
 0x548   :  { %v3479_v2 = vpack.c.bf16 %v2366_v15, %v2364_v13  ;;  %v2390_v13 = vld [vmem:[#allocation14 + $0x2d8] sm:$0xff]  ;;  %v3501_v15 = vpack.c.bf16 %v2385_v9, %v2383_v8  ;;  %v2419_v9 = vld [vmem:[#allocation14 + $0x3c0] sm:$0xff] }
 0x54a   :  { %3446 = vmatpush1.bf16.msra.mxu1 %v3445_v3  ;;  %v1970_v3 = vrot.slane %v4255_v28, %v4113_v45 }
 0x54b   :  { %3448 = vmatprep.subr.bf16.mxu1 %v3447_v0 }
 0x54e   :  { %3450 = vmatpush1.bf16.msra.mxu1 %v3449_v35  ;;  %v2363_v35 = vld [vmem:[#allocation14 + $0x200] sm:$0xff] }
 0x54f   :  { %3452 = vmatprep.subr.bf16.mxu1 %v3451_v14  ;;  %v2365_v14 = vld [vmem:[#allocation14 + $0x210] sm:$0xff] }
 0x550   :  { %v3481_v40 = vpack.c.bf16 %v2365_v14, %v2363_v35  ;;  %v2391_v35 = vld [vmem:[#allocation14 + $0x2e0] sm:$0xff]  ;;  %v2393_v14 = vld [vmem:[#allocation14 + $0x2f0] sm:$0xff] }
 0x551   :  { %v3509_v37 = vpack.c.bf16 %v2393_v14, %v2391_v35 }
 0x552   :  { %3454 = vmatpush1.bf16.msra.mxu1 %v3453_v38 }
 0x553   :  { %3456 = vmatprep.subr.bf16.mxu1 %v3455_v18 }
 0x556   :  { %3458 = vmatpush1.bf16.msra.mxu1 %v3457_v7 }
 0x557   :  { %3460 = vmatprep.subr.bf16.mxu1 %v3459_v17 }
 0x55a   :  { %3462 = vmatpush1.bf16.msra.mxu1 %v3461_v53  ;;  %v2372_v53 = vld [vmem:[#allocation14 + $0x248] sm:$0xff] }
 0x55b   :  { %3464 = vmatprep.subr.bf16.mxu1 %v3463_v51  ;;  %v2374_v51 = vld [vmem:[#allocation14 + $0x258] sm:$0xff] }
 0x55c   :  { %v3487_v25 = vpack.c.bf16 %v2374_v51, %v2372_v53  ;;  %v3517_v53 = vpack.c.bf16 %v2401_v21, %v2399_v43 }
 0x55e   :  { %3466 = vmatpush1.bf16.msra.mxu1 %v3465_v56 }
 0x55f   :  { %3468 = vmatprep.subr.bf16.mxu1 %v3467_v16  ;;  %v2376_v16 = vld [vmem:[#allocation14 + $0x268] sm:$0xff] }
 0x560   :  { %v3491_v26 = vpack.c.bf16 %v2378_v27, %v2376_v16  ;;  %v2409_v16 = vld [vmem:[#allocation14 + $0x370] sm:$0xff]  ;;  %v2412_v27 = vld [vmem:[#allocation14 + $0x388] sm:$0xff] }
 0x562   :  { %3470 = vmatpush1.bf16.msra.mxu1 %v3469_v63  ;;  %v2380_v63 = vld [vmem:[#allocation14 + $0x288] sm:$0xff] }
 0x563   :  { %3472 = vmatprep.subr.bf16.mxu1 %v3471_v4  ;;  %v2382_v4 = vld [vmem:[#allocation14 + $0x298] sm:$0xff] }
 0x564   :  { %v3495_v6 = vpack.c.bf16 %v2382_v4, %v2380_v63  ;;  %v2413_v63 = vld [vmem:[#allocation14 + $0x390] sm:$0xff]  ;;  %v2416_v4 = vld [vmem:[#allocation14 + $0x3a8] sm:$0xff] }
 0x566   :  { %3474 = vmatpush1.bf16.msra.mxu1 %v3473_v57  ;;  %v2381_v57 = vld [vmem:[#allocation14 + $0x290] sm:$0xff] }
 0x567   :  { %3476 = vmatprep.subr.bf16.mxu1 %v3475_v1  ;;  %v3497_v20 = vpack.c.bf16 %v2381_v57, %v2379_v19  ;;  %v2415_v57 = vld [vmem:[#allocation14 + $0x3a0] sm:$0xff] }
 0x56a   :  { %3478 = vmatpush1.bf16.msra.mxu1 %v3477_v10  ;;  %v2388_v10 = vld [vmem:[#allocation14 + $0x2c8] sm:$0xff] }
 0x56b   :  { %3480 = vmatprep.subr.bf16.mxu1 %v3479_v2  ;;  %v3503_v2 = vpack.c.bf16 %v2390_v13, %v2388_v10  ;;  %v2421_v10 = vld [vmem:[#allocation14 + $0x3d0] sm:$0xff]  ;;  %v2424_v13 = vld [vmem:[#allocation14 + $0x3e8] sm:$0xff] }
 0x5ff   :  { %v2126_v0 = vpop.f32.mrb[12].mxu1  ;;  %v4261_v24 = vpop.f32.mrb[18].mxu0 }
 0x600   :  { %v3563_v32 = vadd.f32 %v2126_v0, %v1966_v30  ;;  %v2128_v33 = vpop.f32.mrb[13].mxu1  ;;  %v2282_v34 = vpop.f32.mrb[19].mxu0  ;;  %v2392_v0 = vld [vmem:[#allocation14 + $0x2e8] sm:$0xff] }
 0x601   :  { %v3564_v31 = vadd.f32 %v2128_v33, %v1970_v3  ;;  %v3568_v50 = vadd.f32 %v2282_v34, %v4265_v47 }
 0x602   :  { %v2291_v12 = vadd.f32 %v3563_v32, %v4157_v39  ;;  %v2394_v32 = vld [vmem:[#allocation14 + $0x2f8] sm:$0xff] }
 0x603   :  { %v2292_v38 = vadd.f32 %v3564_v31, %v4159_v41  ;;  %v2132_v18 = vpop.f32.mrb[14].mxu1  ;;  %v4268_v23 = vpop.f32.mrb[20].mxu0  ;;  %v2294_v56 = vadd.f32 %v3568_v50, %v4164_v42  ;;  %v2384_v42 = vld [vmem:[#allocation14 + $0x2a8] sm:$0xff]  ;;  %v3507_v34 = vpack.c.bf16 %v2394_v32, %v2392_v0  ;;  %v2423_v0 = vld [vmem:[#allocation14 + $0x3e0] sm:$0xff]  ;;  %v2425_v32 = vld [vmem:[#allocation14 + $0x3f0] sm:$0xff] }
 0x604   :  { %v3565_v11 = vadd.f32 %v2132_v18, %v1966_v30  ;;  %v2134_v7 = vpop.f32.mrb[15].mxu1  ;;  %v4271_v17 = vpop.f32.mrb[21].mxu0  ;;  %v3499_v1 = vpack.c.bf16 %v2386_v58, %v2384_v42  ;;  %v2387_v30 = vld [vmem:[#allocation14 + $0x2c0] sm:$0xff]  ;;  %v2396_v31 = vld [vmem:[#allocation14 + $0x308] sm:$0xff]  ;;  %v2417_v42 = vld [vmem:[#allocation14 + $0x3b0] sm:$0xff] }
 0x605   :  { %v3566_v48 = vadd.f32 %v2134_v7, %v1970_v3  ;;  %2503 = vmatprep.mubr.f32.mxu1 %v2292_v38  ;;  %v2389_v3 = vld [vmem:[#allocation14 + $0x2d0] sm:$0xff]  ;;  %v3511_v38 = vpack.c.bf16 %v2398_v36, %v2396_v31  ;;  %v2395_v18 = vld [vmem:[#allocation14 + $0x300] sm:$0xff]  ;;  %v2404_v50 = vld [vmem:[#allocation14 + $0x348] sm:$0xff]  ;;  %v3570_v35 = vadd.f32 %v4271_v17, %v4265_v47 }
 0x606   :  { %2504 = vmatmul.mubr.f32.vlgmr.msra.gmra.mrb[16].mxu1 %v2291_v12  ;;  %v2295_v39 = vadd.f32 %v3565_v11, %v4179_v61  ;;  %v3505_v33 = vpack.c.bf16 %v2389_v3, %v2387_v30  ;;  %v2400_v12 = vld [vmem:[#allocation14 + $0x328] sm:$0xff]  ;;  %v2402_v11 = vld [vmem:[#allocation14 + $0x338] sm:$0xff]  ;;  %v1974_v30 = vrot.slane %v4255_v28, %v4122_v49  ;;  %v2427_v28 = vld [vmem:[#allocation16] sm:$0x3] }
 0x607   :  { %v2296_v41 = vadd.f32 %v3566_v48, %v4182_v46  ;;  %3482 = vmatpush1.bf16.msra.mxu1 %v3481_v40  ;;  %v2375_v46 = vld [vmem:[#allocation14 + $0x260] sm:$0xff]  ;;  %v2397_v40 = vld [vmem:[#allocation14 + $0x310] sm:$0xff]  ;;  %v2406_v48 = vld [vmem:[#allocation14 + $0x358] sm:$0xff]  ;;  %v2298_v36 = vadd.f32 %v3570_v35, %v4191_v5 }
 0x608   :  { %3484 = vmatprep.subr.bf16.mxu1 %v3483_v22  ;;  %v3493_v61 = vpack.c.bf16 %v2377_v60, %v2375_v46  ;;  %v3513_v7 = vpack.c.bf16 %v2397_v40, %v2395_v18  ;;  %v3515_v22 = vpack.c.bf16 %v2402_v11, %v2400_v12  ;;  %v3519_v51 = vpack.c.bf16 %v2406_v48, %v2404_v50  ;;  %v2411_v60 = vld [vmem:[#allocation14 + $0x380] sm:$0xff]  ;;  %v2420_v58 = vld [vmem:[#allocation14 + $0x3c8] sm:$0xff] }
 0x609   :  { %2509 = vmatprep.mubr.f32.mxu1 %v2296_v41  ;;  %v2403_v41 = vld [vmem:[#allocation14 + $0x340] sm:$0xff]  ;;  %v3569_v31 = vadd.f32 %v4268_v23, %v1974_v30 }
 0x60a   :  { %2510 = vmatmul.mubr.f32.gmra.mrb[18].mxu1 %v2295_v39  ;;  %v2408_v39 = vld [vmem:[#allocation14 + $0x368] sm:$0xff] }
 0x60b   :  { %3486 = vmatpush1.bf16.msra.mxu1 %v3485_v54  ;;  %2580 = vmatprep.mubr.f32.mxu1 %v2294_v56  ;;  %v2405_v54 = vld [vmem:[#allocation14 + $0x350] sm:$0xff]  ;;  %v2407_v56 = vld [vmem:[#allocation14 + $0x360] sm:$0xff]  ;;  %v2297_v49 = vadd.f32 %v3569_v31, %v4184_v62 }
 0x60c   :  { %3488 = vmatprep.subr.bf16.mxu1 %v3487_v25  ;;  %v2410_v25 = vld [vmem:[#allocation14 + $0x378] sm:$0xff]  ;;  %v3521_v52 = vpack.c.bf16 %v2405_v54, %v2403_v41 }
 0x60d   :  { %v3523_v55 = vpack.c.bf16 %v2410_v25, %v2408_v39 }
 0x60f   :  { %3490 = vmatpush1.bf16.msra.mxu1 %v3489_v59  ;;  %v2414_v59 = vld [vmem:[#allocation14 + $0x398] sm:$0xff] }
 0x610   :  { %3492 = vmatprep.subr.bf16.mxu1 %v3491_v26  ;;  %v3525_v26 = vpack.c.bf16 %v2409_v16, %v2407_v56  ;;  %v3527_v46 = vpack.c.bf16 %v2414_v59, %v2412_v27 }
 0x613   :  { %3494 = vmatpush1.bf16.msra.mxu1 %v3493_v61  ;;  %v2418_v61 = vld [vmem:[#allocation14 + $0x3b8] sm:$0xff] }
 0x614   :  { %3496 = vmatprep.subr.bf16.mxu1 %v3495_v6  ;;  %v3529_v6 = vpack.c.bf16 %v2413_v63, %v2411_v60  ;;  %v3531_v19 = vpack.c.bf16 %v2418_v61, %v2416_v4 }
 0x617   :  { %3498 = vmatpush1.bf16.msra.mxu1 %v3497_v20  ;;  %v2422_v20 = vld [vmem:[#allocation14 + $0x3d8] sm:$0xff] }
 0x618   :  { %3500 = vmatprep.subr.bf16.mxu1 %v3499_v1  ;;  %v3533_v1 = vpack.c.bf16 %v2417_v42, %v2415_v57  ;;  %v3535_v8 = vpack.c.bf16 %v2422_v20, %v2420_v58 }
 0x61b   :  { %3502 = vmatpush1.bf16.msra.mxu1 %v3501_v15  ;;  %v2426_v15 = vld [vmem:[#allocation14 + $0x3f8] sm:$0xff] }
 0x61c   :  { %3504 = vmatprep.subr.bf16.mxu1 %v3503_v2  ;;  %v3537_v2 = vpack.c.bf16 %v2421_v10, %v2419_v9  ;;  %v3539_v3 = vpack.c.bf16 %v2426_v15, %v2424_v13 }
 0x61f   :  { %3506 = vmatpush1.bf16.msra.mxu1 %v3505_v33  ;;  %v3541_v33 = vpack.c.bf16 %v2425_v32, %v2423_v0 }
 0x620   :  { %3508 = vmatprep.subr.bf16.mxu1 %v3507_v34  ;;  %v3567_v34 = vadd.f32 %v4261_v24, %v1974_v30  ;;  %v2436_v24 = vrot.slane %v2427_v28, %v4113_v45 }
 0x622   :  { %v2293_v14 = vadd.f32 %v3567_v34, %v4161_v29 }
 0x623   :  { %3510 = vmatpush1.bf16.msra.mxu1 %v3509_v37  ;;  %v2432_v37 = vrot.slane %v2427_v28, %v4110_v44 }
 0x624   :  { %3512 = vmatprep.subr.bf16.mxu1 %v3511_v38 }
 0x627   :  { %3514 = vmatpush1.bf16.msra.mxu1 %v3513_v7 }
 0x628   :  { %3516 = vmatprep.subr.bf16.mxu1 %v3515_v22 }
 0x62b   :  { %3518 = vmatpush1.bf16.msra.mxu1 %v3517_v53 }
 0x62c   :  { %3520 = vmatprep.subr.bf16.mxu1 %v3519_v51 }
 0x62f   :  { %3522 = vmatpush1.bf16.msra.mxu1 %v3521_v52 }
 0x630   :  { %3524 = vmatprep.subr.bf16.mxu1 %v3523_v55 }
 0x633   :  { %3526 = vmatpush1.bf16.msra.mxu1 %v3525_v26 }
 0x634   :  { %3528 = vmatprep.subr.bf16.mxu1 %v3527_v46 }
 0x637   :  { %3530 = vmatpush1.bf16.msra.mxu1 %v3529_v6 }
 0x638   :  { %3532 = vmatprep.subr.bf16.mxu1 %v3531_v19 }
 0x63b   :  { %3534 = vmatpush1.bf16.msra.mxu1 %v3533_v1 }
 0x63c   :  { %3536 = vmatprep.subr.bf16.mxu1 %v3535_v8 }
 0x63f   :  { %3538 = vmatpush1.bf16.msra.mxu1 %v3537_v2 }
 0x640   :  { %3540 = vmatprep.subr.bf16.mxu1 %v3539_v3 }
 0x643   :  { %3542 = vmatpush1.bf16.msra.mxu1 %v3541_v33 }
 0x646   :  { %2581 = vmatmul.mubr.f32.vlgmr.msra.gmra.mrb[16].mxu1 %v2293_v14 }
 0x647   :  { %2586 = vmatprep.mubr.f32.mxu1 %v2298_v36 }
 0x64a   :  { %2587 = vmatmul.mubr.f32.gmra.mrb[18].mxu1 %v2297_v49 }
 0x719   :  { %v2582_v38 = vpop.f32.mrb[16].mxu1 }
 0x71a   :  { %v3571_v18 = vadd.f32 %v2582_v38, %v2432_v37  ;;  %v2584_v47 = vpop.f32.mrb[17].mxu1 }
 0x71b   :  { %v3572_v17 = vadd.f32 %v2584_v47, %v2436_v24 }
 0x71c   :  { %2593 = vst [vmem:[#allocation17] sm:$0xff] %v3571_v18 }
 0x71d   :  { %2594 = vst [vmem:[#allocation17 + $0x8] sm:$0xff] %v3572_v17  ;;  %v2588_v29 = vpop.f32.mrb[18].mxu1 }
 0x71e   :  { %v3573_v5 = vadd.f32 %v2588_v29, %v2432_v37  ;;  %v2590_v23 = vpop.f32.mrb[19].mxu1 }
 0x71f   :  { %v3574_v40 = vadd.f32 %v2590_v23, %v2436_v24 }
 0x720   :  { %2595 = vst [vmem:[#allocation17 + $0x10] sm:$0xff] %v3573_v5 }
 0x721   :  { %2596 = vst [vmem:[#allocation17 + $0x18] sm:$0xff] %v3574_v40 }
 0x722   :  { %3849 = shalt.err (!%p3846_p6)
}
 0x723   :  { %s3850_s11 = scalar_lea.hbm %s4312_s9, 512 }
 0x724   :  { %p3851_p7 = scmp.ne.s32.totalorder %s4312_s9, %s3850_s11  ;;  %p3854_p8 = scmp.lt.u32.totalorder %s3850_s11, %s4312_s9 }
 0x726   :  { %p3856_p9 = pnand %p3854_p8, %p3851_p7 }
 0x728   :  { %3859 = shalt.err (!%p3856_p9)
}
 0x729   :  { %2608 = dma.vmem_to_hbm [thread:$0]  %s2603_s16, 512, %s4312_s9, [#allocation4], %s3880_s5, %s3880_s5, %s3881_s14  }
 0x72a   :  { %3870 = dma.done.wait [#allocation4], 512  }
 0x72b   :  { %3871 = vsyncadd [#allocation4], 4294966784 }
 0x72c   :  { %2612 = vsyncpa [#allocation3], 1 }
 0x72d   :  { %2613 = vsyncpa [#allocation6], 1 }
 0x72e   :  { %2614 = vsyncpa [#allocation9], 1 }
 0x72f   :  { %2615 = vsyncpa [#allocation12], 1 }
 0x730   :  { %2616 = vsyncpa [#allocation15], 1 }
 0x731   :  { %2617 = vsyncpa [#allocation4], 1 }

</bundles_post_ra>
